<compile_context>
chip_gen: v5e
topology: v5e:2x2
jax: 0.10.0
libtpu: 0.0.40
codegen_flags: <defaults>
</compile_context>

<pallas_src>
import math

import jax
import jax.numpy as jnp
from jax.experimental import pallas as pl
from jax.experimental.pallas import tpu as pltpu

EPS = 1e-5


def _round_up(n, m):
    return ((n + m - 1) // m) * m


def _pick_bt(B, T, target_rows):
    """Choose bt = sequences per grid block.

    Constraints / preferences:
      * bt * T % 8 == 0        (sublane alignment of the (bt*T, C) block)
      * bt divides B           (no padded batch rows computed / written back)
      * grid = B // bt >= 2 when possible (v7x megacore)
      * bt * T as large as possible without exceeding target_rows
    """
    m8 = 8 // math.gcd(T, 8)  # bt must be a multiple of this
    divs = [d for d in range(1, B + 1) if B % d == 0 and d % m8 == 0]
    if divs:
        good = [d for d in divs if B // d >= 2] or divs
        fitting = [d for d in good if d * T <= target_rows]
        bt = max(fitting) if fitting else min(good)
        return bt, B
    # No divisor of B satisfies alignment -> pad the batch (rare: e.g. odd T
    # with B smaller than 8 / gcd(T, 8)).
    bt = m8 * max(1, target_rows // (m8 * T))
    return bt, _round_up(B, bt)


def _make_kernel(T, odim, hidden, m_blk, p_o, p_h):
    """Kernel factory; all sizes are baked in as Python constants."""
    inv_h = 1.0 / float(hidden)
    need_ch_mask = hidden != p_h
    need_out_slice = odim != p_o

    def kernel(x_ref, a1_ref, a2_ref,
               w0_ref, b0_ref, w1_ref, b1_ref, g1_ref, be1_ref,
               dw_ref, db_ref, g2_ref, be2_ref, ws_ref, bs_ref,
               out_ref):
        # PReLU slopes as SMEM scalars.
        a1 = a1_ref[0]
        a2 = a2_ref[0]

        # --- Conv1d(1, odim, 1) + ReLU (odim padded to lane-dense P_o) ------
        x = x_ref[...]                                           # (M, 1) f32
        h = jnp.maximum(x * w0_ref[...] + b0_ref[...], 0.0)      # (M, P_o)

        # --- Conv1DBlock ----------------------------------------------------
        # conv1x1: odim -> hidden on the MXU, bf16 operands / f32 accumulate.
        y = jnp.dot(h.astype(jnp.bfloat16), w1_ref[...],
                    preferred_element_type=jnp.float32)          # (M, P_h)
        y = y + b1_ref[...]
        y = jnp.where(y >= 0.0, y, y * a1)                       # PReLU 1

        if need_ch_mask:
            ch = jax.lax.broadcasted_iota(jnp.int32, (m_blk, p_h), 1)
            ch_valid = ch < hidden

        def cln(z, g, b):
            # ChannelWiseLayerNorm over the *real* `hidden` channels.
            # Padded lanes of z are exactly zero by construction, so the mean
            # needs no mask; the variance masks the (z - mu) tail.
            mu = jnp.sum(z, axis=-1, keepdims=True) * inv_h
            d = z - mu
            if need_ch_mask:
                d = jnp.where(ch_valid, d, 0.0)
            var = jnp.sum(d * d, axis=-1, keepdims=True) * inv_h
            return d * jax.lax.rsqrt(var + EPS) * g + b

        y = cln(y, g1_ref[...], be1_ref[...])

        # depthwise Conv1d(hidden, hidden, k=3, groups=hidden, padding=1).
        # The block holds bt whole sequences stacked along rows; shifts are
        # XLU rolls over the flattened row axis, masked at sequence edges.
        # tpos is generated in-kernel (no extra input DMA).
        tpos = jax.lax.broadcasted_iota(jnp.int32, (m_blk, 1), 0) % T
        first = tpos == 0
        last = tpos == (T - 1)
        y_prev = jnp.where(first, 0.0, pltpu.roll(y, shift=1, axis=0))
        y_next = jnp.where(last, 0.0, pltpu.roll(y, shift=m_blk - 1, axis=0))
        dw = dw_ref[...]                                         # (3, P_h)
        y = (y_prev * dw[0:1, :] + y * dw[1:2, :] + y_next * dw[2:3, :]
             + db_ref[...])

        y = jnp.where(y >= 0.0, y, y * a2)                       # PReLU 2
        y = cln(y, g2_ref[...], be2_ref[...])

        # sconv: hidden -> odim on the MXU (bf16 operands) + residual.
        y = jnp.dot(y.astype(jnp.bfloat16), ws_ref[...],
                    preferred_element_type=jnp.float32)          # (M, P_o)
        res = h + y + bs_ref[...]
        # Unpadded (odim-wide) writeback: 1x HBM bytes instead of P_o/odim x.
        out_ref[...] = res[:, :odim] if need_out_slice else res

    return kernel


def sas_encoder(x, params, *, target_block_rows=1024):
    """x: (B, T, 1) float32 -> (B, T, odim) float32."""
    B, T, _ = x.shape
    odim = params["w0"].shape[-1]
    hidden = params["w1"].shape[-1]
    p_o = _round_up(odim, 128)      # lane-dense padded channel widths
    p_h = _round_up(hidden, 128)

    # --- batch tiling: bt whole sequences per grid step ------------------
    bt, b_pad = _pick_bt(B, T, target_block_rows)
    grid = b_pad // bt
    m_blk = bt * T

    # --- zero-pad channel dims (padded lanes stay exactly zero) ----------
    def pc(a, c):
        return jnp.pad(a, ((0, 0), (0, c - a.shape[1])))

    def prc(a, r, c):
        return jnp.pad(a, ((0, r - a.shape[0]), (0, c - a.shape[1])))

    f32, bf16 = jnp.float32, jnp.bfloat16
    w0 = pc(params["w0"], p_o).astype(f32)
    b0 = pc(params["b0"], p_o).astype(f32)
    w1 = prc(params["w1"], p_o, p_h).astype(bf16)      # MXU operand (bf16)
    b1 = pc(params["b1"], p_h).astype(f32)
    g1, be1 = pc(params["g1"], p_h).astype(f32), pc(params["be1"], p_h).astype(f32)
    dw, db = pc(params["dw"], p_h).astype(f32), pc(params["db"], p_h).astype(f32)
    g2, be2 = pc(params["g2"], p_h).astype(f32), pc(params["be2"], p_h).astype(f32)
    ws = prc(params["ws"], p_h, p_o).astype(bf16)      # MXU operand (bf16)
    bs = pc(params["bs"], p_o).astype(f32)
    a1 = params["a1"].reshape(-1)[:1].astype(f32)      # SMEM scalar
    a2 = params["a2"].reshape(-1)[:1].astype(f32)      # SMEM scalar

    # flattened (rows = batch*time, channels) layout
    xp = x.astype(f32)
    if b_pad != B:
        xp = jnp.pad(xp, ((0, b_pad - B), (0, 0), (0, 0)))
    xp = xp.reshape(b_pad * T, 1)

    vmem_params = [w0, b0, w1, b1, g1, be1, dw, db, g2, be2, ws, bs]
    smem_spec = pl.BlockSpec(memory_space=pltpu.MemorySpace.SMEM)
    in_specs = (
        [pl.BlockSpec((m_blk, 1), lambda b: (b, 0)),   # x slab
         smem_spec, smem_spec]                         # a1, a2 scalars
        + [pl.BlockSpec(p.shape, lambda b: (0, 0)) for p in vmem_params]
    )

    m_total = b_pad * T
    cost = pl.CostEstimate(
        flops=int(4 * m_total * p_o * p_h + 30 * m_total * p_h),
        transcendentals=int(2 * m_total),
        bytes_accessed=int(4 * m_total * (1 + odim)     # x in + odim-wide out
                           + 2 * 2 * p_o * p_h          # bf16 matmul weights
                           + 4 * (10 * p_h + 3 * p_o)), # small vectors
    )

    kernel = _make_kernel(T, odim, hidden, m_blk, p_o, p_h)
    out2d = pl.pallas_call(
        kernel,
        out_shape=jax.ShapeDtypeStruct((b_pad * T, odim), f32),
        grid_spec=pltpu.PrefetchScalarGridSpec(
            num_scalar_prefetch=0,
            grid=(grid,),
            in_specs=in_specs,
            out_specs=pl.BlockSpec((m_blk, odim), lambda b: (b, 0)),
        ),
        compiler_params=pltpu.CompilerParams(
            dimension_semantics=("parallel",),
        ),
        cost_estimate=cost,
    )(xp, a1, a2, *vmem_params)

    out = out2d.reshape(b_pad, T, odim)
    if b_pad != B:
        out = out[:B]
    return out


def sas_encoder_ref(x, p, *, matmul_dtype=jnp.float32):
    """Pure-JAX reference matching the PyTorch forward semantics.

    matmul_dtype=bf16 reproduces the kernel's bf16-operand / f32-accumulate
    matmuls exactly (all other math stays f32)."""
    md = matmul_dtype
    h = jnp.maximum(x * p["w0"][None] + p["b0"][None], 0.0)           # (B,T,odim)
    y = jnp.einsum("btc,ch->bth", h.astype(md), p["w1"].astype(md),
                   preferred_element_type=jnp.float32) + p["b1"][None]
    y = jnp.where(y >= 0.0, y, y * p["a1"])

    def ln(z, g, b):
        mu = jnp.mean(z, axis=-1, keepdims=True)
        var = jnp.mean((z - mu) ** 2, axis=-1, keepdims=True)
        return (z - mu) / jnp.sqrt(var + EPS) * g + b

    y = ln(y, p["g1"], p["be1"])
    yp = jnp.pad(y, ((0, 0), (1, 1), (0, 0)))
    y = (yp[:, :-2, :] * p["dw"][0] + yp[:, 1:-1, :] * p["dw"][1]
         + yp[:, 2:, :] * p["dw"][2]) + p["db"]
    y = jnp.where(y >= 0.0, y, y * p["a2"])
    y = ln(y, p["g2"], p["be2"])
    y = jnp.einsum("bth,ho->bto", y.astype(md), p["ws"].astype(md),
                   preferred_element_type=jnp.float32) + p["bs"]
    return h + y


def init_params(key, odim, hidden, scale=0.1):
    ks = jax.random.split(key, 8)
    f32 = jnp.float32
    return {
        # Conv1d(1, odim, 1): weight (odim,1,1) -> (1, odim), bias -> (1, odim)
        "w0": (jax.random.normal(ks[0], (1, odim)) * scale).astype(f32),
        "b0": (jax.random.normal(ks[1], (1, odim)) * scale).astype(f32),
        # conv1x1: Conv1d(odim, hidden, 1): weight (hidden,odim,1) -> (odim, hidden)
        "w1": (jax.random.normal(ks[2], (odim, hidden)) * scale).astype(f32),
        "b1": (jax.random.normal(ks[3], (1, hidden)) * scale).astype(f32),
        # PReLU default init 0.25 (single shared parameter)
        "a1": jnp.full((1, 1), 0.25, dtype=f32),
        # ChannelWiseLayerNorm affine params
        "g1": jnp.ones((1, hidden), dtype=f32),
        "be1": jnp.zeros((1, hidden), dtype=f32),
        # depthwise conv: weight (hidden,1,3) -> (3, hidden), bias -> (1, hidden)
        "dw": (jax.random.normal(ks[4], (3, hidden)) * scale).astype(f32),
        "db": (jax.random.normal(ks[5], (1, hidden)) * scale).astype(f32),
        "a2": jnp.full((1, 1), 0.25, dtype=f32),
        "g2": jnp.ones((1, hidden), dtype=f32),
        "be2": jnp.zeros((1, hidden), dtype=f32),
        # sconv: Conv1d(hidden, odim, 1): weight (odim,hidden,1) -> (hidden, odim)
        "ws": (jax.random.normal(ks[6], (hidden, odim)) * scale).astype(f32),
        "bs": (jax.random.normal(ks[7], (1, odim)) * scale).astype(f32),
    }


if __name__ == "__main__":
    # Small shapes that still exercise batching (bt=8 -> 256-row slabs, grid=2
    # so the 'parallel' axis can use both v7x TCs) and the lane-padding path
    # (odim=32 -> 128, hidden=64 -> 128) plus the unpadded odim-wide writeback.
    B, T, odim, hidden = 16, 32, 32, 64

    key = jax.random.PRNGKey(0)
    k_x, k_p = jax.random.split(key)
    x = jax.random.normal(k_x, (B, T, 1), dtype=jnp.float32)
    params = init_params(k_p, odim, hidden)

    out = jax.block_until_ready(sas_encoder(x, params))
    assert out.shape == (B, T, odim), out.shape

    # Tight check against a reference that matches the kernel's bf16-operand
    # matmuls (f32 everywhere else) ...
    ref_bf16 = sas_encoder_ref(x, params, matmul_dtype=jnp.bfloat16)
    err_bf16 = float(jnp.max(jnp.abs(out - ref_bf16)))
    assert jnp.allclose(out, ref_bf16, rtol=2e-3, atol=2e-3), err_bf16

    # ... and a looser check against the pure-f32 PyTorch-semantics reference
    # (bf16 MXU operands introduce ~1e-3-level deviations).
    ref_f32 = sas_encoder_ref(x, params)
    err_f32 = float(jnp.max(jnp.abs(out - ref_f32)))
    assert jnp.allclose(out, ref_f32, rtol=2e-2, atol=2e-2), err_f32

    print("KERNEL_OK")
</pallas_src>

<mosaic_0001>
module attributes {stable_mosaic.version = 11 : i64} {
  func.func @kernel(%arg0: i32, %arg1: memref<256x1xf32, #tpu.memory_space<vmem>>, %arg2: memref<1xf32, #tpu.memory_space<smem>>, %arg3: memref<1xf32, #tpu.memory_space<smem>>, %arg4: memref<1x128xf32, #tpu.memory_space<vmem>>, %arg5: memref<1x128xf32, #tpu.memory_space<vmem>>, %arg6: memref<128x128xbf16, #tpu.memory_space<vmem>>, %arg7: memref<1x128xf32, #tpu.memory_space<vmem>>, %arg8: memref<1x128xf32, #tpu.memory_space<vmem>>, %arg9: memref<1x128xf32, #tpu.memory_space<vmem>>, %arg10: memref<3x128xf32, #tpu.memory_space<vmem>>, %arg11: memref<1x128xf32, #tpu.memory_space<vmem>>, %arg12: memref<1x128xf32, #tpu.memory_space<vmem>>, %arg13: memref<1x128xf32, #tpu.memory_space<vmem>>, %arg14: memref<128x128xbf16, #tpu.memory_space<vmem>>, %arg15: memref<1x128xf32, #tpu.memory_space<vmem>>, %arg16: memref<256x32xf32, #tpu.memory_space<vmem>>) attributes {dimension_semantics = [#tpu.dimension_semantics<parallel>], iteration_bounds = array<i64: 2>, scalar_prefetch = 0 : i64, scratch_operands = 0 : i64, tpu.core_type = #tpu.core_type<tc>, window_params = [{transform_indices = @transform_0, window_bounds = array<i64: 256, 1>}, {transform_indices = @transform_1, window_bounds = array<i64: 1>}, {transform_indices = @transform_2, window_bounds = array<i64: 1>}, {pipeline_mode = #tpu.pipeline_mode<synchronous>, transform_indices = @transform_3, window_bounds = array<i64: 1, 128>}, {pipeline_mode = #tpu.pipeline_mode<synchronous>, transform_indices = @transform_4, window_bounds = array<i64: 1, 128>}, {pipeline_mode = #tpu.pipeline_mode<synchronous>, transform_indices = @transform_5, window_bounds = array<i64: 128, 128>}, {pipeline_mode = #tpu.pipeline_mode<synchronous>, transform_indices = @transform_6, window_bounds = array<i64: 1, 128>}, {pipeline_mode = #tpu.pipeline_mode<synchronous>, transform_indices = @transform_7, window_bounds = array<i64: 1, 128>}, {pipeline_mode = #tpu.pipeline_mode<synchronous>, transform_indices = @transform_8, window_bounds = array<i64: 1, 128>}, {pipeline_mode = #tpu.pipeline_mode<synchronous>, transform_indices = @transform_9, window_bounds = array<i64: 3, 128>}, {pipeline_mode = #tpu.pipeline_mode<synchronous>, transform_indices = @transform_10, window_bounds = array<i64: 1, 128>}, {pipeline_mode = #tpu.pipeline_mode<synchronous>, transform_indices = @transform_11, window_bounds = array<i64: 1, 128>}, {pipeline_mode = #tpu.pipeline_mode<synchronous>, transform_indices = @transform_12, window_bounds = array<i64: 1, 128>}, {pipeline_mode = #tpu.pipeline_mode<synchronous>, transform_indices = @transform_13, window_bounds = array<i64: 128, 128>}, {pipeline_mode = #tpu.pipeline_mode<synchronous>, transform_indices = @transform_14, window_bounds = array<i64: 1, 128>}, {transform_indices = @transform_15, window_bounds = array<i64: 256, 32>}]} {
    %c0 = arith.constant 0 : index
    %0 = memref.load %arg2[%c0] : memref<1xf32, #tpu.memory_space<smem>>
    %c0_0 = arith.constant 0 : index
    %1 = memref.load %arg3[%c0_0] : memref<1xf32, #tpu.memory_space<smem>>
    %c0_1 = arith.constant 0 : index
    %c0_2 = arith.constant 0 : index
    %2 = vector.load %arg1[%c0_1, %c0_2] : memref<256x1xf32, #tpu.memory_space<vmem>>, vector<256x1xf32>
    %c0_3 = arith.constant 0 : index
    %c0_4 = arith.constant 0 : index
    %3 = vector.load %arg4[%c0_3, %c0_4] : memref<1x128xf32, #tpu.memory_space<vmem>>, vector<1x128xf32>
    %4 = vector.broadcast %2 : vector<256x1xf32> to vector<256x128xf32>
    %5 = vector.broadcast %3 : vector<1x128xf32> to vector<256x128xf32>
    %6 = arith.mulf %4, %5 : vector<256x128xf32>
    %c0_5 = arith.constant 0 : index
    %c0_6 = arith.constant 0 : index
    %7 = vector.load %arg5[%c0_5, %c0_6] : memref<1x128xf32, #tpu.memory_space<vmem>>, vector<1x128xf32>
    %8 = vector.broadcast %7 : vector<1x128xf32> to vector<256x128xf32>
    %9 = arith.addf %6, %8 : vector<256x128xf32>
    %cst = arith.constant 0.000000e+00 : f32
    %10 = vector.broadcast %cst : f32 to vector<256x128xf32>
    %11 = arith.maximumf %9, %10 : vector<256x128xf32>
    %12 = arith.truncf %11 : vector<256x128xf32> to vector<256x128xbf16>
    %c0_7 = arith.constant 0 : index
    %c0_8 = arith.constant 0 : index
    %13 = vector.load %arg6[%c0_7, %c0_8] : memref<128x128xbf16, #tpu.memory_space<vmem>>, vector<128x128xbf16>
    %cst_9 = arith.constant dense<0.000000e+00> : vector<256x128xf32>
    %14 = tpu.matmul %12, %13, %cst_9 {dimension_numbers = #tpu.dot_dimension_numbers<[1], [0], [0], [1], [0, 0, 1, 1], [], []>} : vector<256x128xbf16>, vector<128x128xbf16>, vector<256x128xf32> -> vector<256x128xf32>
    %c0_10 = arith.constant 0 : index
    %c0_11 = arith.constant 0 : index
    %15 = vector.load %arg7[%c0_10, %c0_11] : memref<1x128xf32, #tpu.memory_space<vmem>>, vector<1x128xf32>
    %16 = vector.broadcast %15 : vector<1x128xf32> to vector<256x128xf32>
    %17 = arith.addf %14, %16 : vector<256x128xf32>
    %cst_12 = arith.constant 0.000000e+00 : f32
    %18 = vector.broadcast %cst_12 : f32 to vector<256x128xf32>
    %19 = arith.cmpf oge, %17, %18 : vector<256x128xf32>
    %20 = vector.broadcast %0 : f32 to vector<256x128xf32>
    %21 = arith.mulf %17, %20 : vector<256x128xf32>
    %22 = arith.select %19, %17, %21 : vector<256x128xi1>, vector<256x128xf32>
    %23 = tpu.iota {dimensions = array<i32: 1>} : vector<256x128xi32>
    %c64_i32 = arith.constant 64 : i32
    %24 = vector.broadcast %c64_i32 : i32 to vector<256x128xi32>
    %25 = arith.cmpi slt, %23, %24 : vector<256x128xi32>
    %c0_13 = arith.constant 0 : index
    %c0_14 = arith.constant 0 : index
    %26 = vector.load %arg8[%c0_13, %c0_14] : memref<1x128xf32, #tpu.memory_space<vmem>>, vector<1x128xf32>
    %c0_15 = arith.constant 0 : index
    %c0_16 = arith.constant 0 : index
    %27 = vector.load %arg9[%c0_15, %c0_16] : memref<1x128xf32, #tpu.memory_space<vmem>>, vector<1x128xf32>
    %cst_17 = arith.constant dense<0.000000e+00> : vector<256xf32>
    %28 = vector.multi_reduction <add>, %22, %cst_17 [1] : vector<256x128xf32> to vector<256xf32>
    %29 = vector.shape_cast %28 : vector<256xf32> to vector<256x1xf32>
    %cst_18 = arith.constant 1.562500e-02 : f32
    %30 = vector.broadcast %cst_18 : f32 to vector<256x1xf32>
    %31 = arith.mulf %29, %30 : vector<256x1xf32>
    %32 = vector.broadcast %31 : vector<256x1xf32> to vector<256x128xf32>
    %33 = arith.subf %22, %32 : vector<256x128xf32>
    %cst_19 = arith.constant 0.000000e+00 : f32
    %34 = vector.broadcast %cst_19 : f32 to vector<256x128xf32>
    %35 = arith.select %25, %33, %34 : vector<256x128xi1>, vector<256x128xf32>
    %36 = arith.mulf %35, %35 : vector<256x128xf32>
    %cst_20 = arith.constant dense<0.000000e+00> : vector<256xf32>
    %37 = vector.multi_reduction <add>, %36, %cst_20 [1] : vector<256x128xf32> to vector<256xf32>
    %38 = vector.shape_cast %37 : vector<256xf32> to vector<256x1xf32>
    %cst_21 = arith.constant 1.562500e-02 : f32
    %39 = vector.broadcast %cst_21 : f32 to vector<256x1xf32>
    %40 = arith.mulf %38, %39 : vector<256x1xf32>
    %cst_22 = arith.constant 9.99999974E-6 : f32
    %41 = vector.broadcast %cst_22 : f32 to vector<256x1xf32>
    %42 = arith.addf %40, %41 : vector<256x1xf32>
    %43 = math.rsqrt %42 : vector<256x1xf32>
    %44 = vector.broadcast %43 : vector<256x1xf32> to vector<256x128xf32>
    %45 = arith.mulf %35, %44 : vector<256x128xf32>
    %46 = vector.broadcast %26 : vector<1x128xf32> to vector<256x128xf32>
    %47 = arith.mulf %45, %46 : vector<256x128xf32>
    %48 = vector.broadcast %27 : vector<1x128xf32> to vector<256x128xf32>
    %49 = arith.addf %47, %48 : vector<256x128xf32>
    %50 = tpu.iota {dimensions = array<i32: 0>} : vector<256x1xi32>
    %c32_i32 = arith.constant 32 : i32
    %c0_i32 = arith.constant 0 : i32
    %51 = arith.cmpi eq, %c32_i32, %c0_i32 : i32
    %c1_i32 = arith.constant 1 : i32
    %52 = arith.select %51, %c1_i32, %c32_i32 : i32
    %53 = vector.broadcast %52 : i32 to vector<256x1xi32>
    %54 = arith.remsi %50, %53 : vector<256x1xi32>
    %c0_i32_23 = arith.constant 0 : i32
    %55 = vector.broadcast %c0_i32_23 : i32 to vector<256x1xi32>
    %56 = arith.cmpi ne, %54, %55 : vector<256x1xi32>
    %c0_i32_24 = arith.constant 0 : i32
    %57 = vector.broadcast %c0_i32_24 : i32 to vector<256x1xi32>
    %58 = arith.cmpi slt, %54, %57 : vector<256x1xi32>
    %c0_i32_25 = arith.constant 0 : i32
    %59 = arith.cmpi slt, %52, %c0_i32_25 : i32
    %60 = vector.broadcast %59 : i1 to vector<256x1xi1>
    %61 = vector.broadcast %60 : vector<256x1xi1> to vector<256x1xi1>
    %62 = arith.xori %58, %61 : vector<256x1xi1>
    %63 = arith.andi %62, %56 : vector<256x1xi1>
    %64 = vector.broadcast %52 : i32 to vector<256x1xi32>
    %65 = arith.addi %54, %64 : vector<256x1xi32>
    %66 = arith.select %63, %65, %54 : vector<256x1xi1>, vector<256x1xi32>
    %c0_i32_26 = arith.constant 0 : i32
    %67 = vector.broadcast %c0_i32_26 : i32 to vector<256x1xi32>
    %68 = arith.cmpi eq, %66, %67 : vector<256x1xi32>
    %c31_i32 = arith.constant 31 : i32
    %69 = vector.broadcast %c31_i32 : i32 to vector<256x1xi32>
    %70 = arith.cmpi eq, %66, %69 : vector<256x1xi32>
    %c1_i32_27 = arith.constant 1 : i32
    %71 = tpu.dynamic_rotate %49 by %c1_i32_27 dim 0 : vector<256x128xf32>, i32 -> vector<256x128xf32>
    %cst_28 = arith.constant 0.000000e+00 : f32
    %72 = vector.shape_cast %68 : vector<256x1xi1> to vector<256x1xi1>
    %73 = vector.broadcast %72 : vector<256x1xi1> to vector<256x128xi1>
    %74 = vector.broadcast %cst_28 : f32 to vector<256x128xf32>
    %75 = arith.select %73, %74, %71 : vector<256x128xi1>, vector<256x128xf32>
    %c255_i32 = arith.constant 255 : i32
    %76 = tpu.dynamic_rotate %49 by %c255_i32 dim 0 : vector<256x128xf32>, i32 -> vector<256x128xf32>
    %cst_29 = arith.constant 0.000000e+00 : f32
    %77 = vector.shape_cast %70 : vector<256x1xi1> to vector<256x1xi1>
    %78 = vector.broadcast %77 : vector<256x1xi1> to vector<256x128xi1>
    %79 = vector.broadcast %cst_29 : f32 to vector<256x128xf32>
    %80 = arith.select %78, %79, %76 : vector<256x128xi1>, vector<256x128xf32>
    %c0_30 = arith.constant 0 : index
    %c0_31 = arith.constant 0 : index
    %81 = vector.load %arg10[%c0_30, %c0_31] : memref<3x128xf32, #tpu.memory_space<vmem>>, vector<3x128xf32>
    %82 = vector.extract_strided_slice %81 {offsets = [0, 0], sizes = [1, 128], strides = [1, 1]} : vector<3x128xf32> to vector<1x128xf32>
    %83 = vector.broadcast %82 : vector<1x128xf32> to vector<256x128xf32>
    %84 = arith.mulf %75, %83 : vector<256x128xf32>
    %85 = vector.extract_strided_slice %81 {offsets = [1, 0], sizes = [1, 128], strides = [1, 1]} : vector<3x128xf32> to vector<1x128xf32>
    %86 = vector.broadcast %85 : vector<1x128xf32> to vector<256x128xf32>
    %87 = arith.mulf %49, %86 : vector<256x128xf32>
    %88 = arith.addf %84, %87 : vector<256x128xf32>
    %89 = vector.extract_strided_slice %81 {offsets = [2, 0], sizes = [1, 128], strides = [1, 1]} : vector<3x128xf32> to vector<1x128xf32>
    %90 = vector.broadcast %89 : vector<1x128xf32> to vector<256x128xf32>
    %91 = arith.mulf %80, %90 : vector<256x128xf32>
    %92 = arith.addf %88, %91 : vector<256x128xf32>
    %c0_32 = arith.constant 0 : index
    %c0_33 = arith.constant 0 : index
    %93 = vector.load %arg11[%c0_32, %c0_33] : memref<1x128xf32, #tpu.memory_space<vmem>>, vector<1x128xf32>
    %94 = vector.broadcast %93 : vector<1x128xf32> to vector<256x128xf32>
    %95 = arith.addf %92, %94 : vector<256x128xf32>
    %cst_34 = arith.constant 0.000000e+00 : f32
    %96 = vector.broadcast %cst_34 : f32 to vector<256x128xf32>
    %97 = arith.cmpf oge, %95, %96 : vector<256x128xf32>
    %98 = vector.broadcast %1 : f32 to vector<256x128xf32>
    %99 = arith.mulf %95, %98 : vector<256x128xf32>
    %100 = arith.select %97, %95, %99 : vector<256x128xi1>, vector<256x128xf32>
    %c0_35 = arith.constant 0 : index
    %c0_36 = arith.constant 0 : index
    %101 = vector.load %arg12[%c0_35, %c0_36] : memref<1x128xf32, #tpu.memory_space<vmem>>, vector<1x128xf32>
    %c0_37 = arith.constant 0 : index
    %c0_38 = arith.constant 0 : index
    %102 = vector.load %arg13[%c0_37, %c0_38] : memref<1x128xf32, #tpu.memory_space<vmem>>, vector<1x128xf32>
    %cst_39 = arith.constant dense<0.000000e+00> : vector<256xf32>
    %103 = vector.multi_reduction <add>, %100, %cst_39 [1] : vector<256x128xf32> to vector<256xf32>
    %104 = vector.shape_cast %103 : vector<256xf32> to vector<256x1xf32>
    %cst_40 = arith.constant 1.562500e-02 : f32
    %105 = vector.broadcast %cst_40 : f32 to vector<256x1xf32>
    %106 = arith.mulf %104, %105 : vector<256x1xf32>
    %107 = vector.broadcast %106 : vector<256x1xf32> to vector<256x128xf32>
    %108 = arith.subf %100, %107 : vector<256x128xf32>
    %cst_41 = arith.constant 0.000000e+00 : f32
    %109 = vector.broadcast %cst_41 : f32 to vector<256x128xf32>
    %110 = arith.select %25, %108, %109 : vector<256x128xi1>, vector<256x128xf32>
    %111 = arith.mulf %110, %110 : vector<256x128xf32>
    %cst_42 = arith.constant dense<0.000000e+00> : vector<256xf32>
    %112 = vector.multi_reduction <add>, %111, %cst_42 [1] : vector<256x128xf32> to vector<256xf32>
    %113 = vector.shape_cast %112 : vector<256xf32> to vector<256x1xf32>
    %cst_43 = arith.constant 1.562500e-02 : f32
    %114 = vector.broadcast %cst_43 : f32 to vector<256x1xf32>
    %115 = arith.mulf %113, %114 : vector<256x1xf32>
    %cst_44 = arith.constant 9.99999974E-6 : f32
    %116 = vector.broadcast %cst_44 : f32 to vector<256x1xf32>
    %117 = arith.addf %115, %116 : vector<256x1xf32>
    %118 = math.rsqrt %117 : vector<256x1xf32>
    %119 = vector.broadcast %118 : vector<256x1xf32> to vector<256x128xf32>
    %120 = arith.mulf %110, %119 : vector<256x128xf32>
    %121 = vector.broadcast %101 : vector<1x128xf32> to vector<256x128xf32>
    %122 = arith.mulf %120, %121 : vector<256x128xf32>
    %123 = vector.broadcast %102 : vector<1x128xf32> to vector<256x128xf32>
    %124 = arith.addf %122, %123 : vector<256x128xf32>
    %125 = arith.truncf %124 : vector<256x128xf32> to vector<256x128xbf16>
    %c0_45 = arith.constant 0 : index
    %c0_46 = arith.constant 0 : index
    %126 = vector.load %arg14[%c0_45, %c0_46] : memref<128x128xbf16, #tpu.memory_space<vmem>>, vector<128x128xbf16>
    %cst_47 = arith.constant dense<0.000000e+00> : vector<256x128xf32>
    %127 = tpu.matmul %125, %126, %cst_47 {dimension_numbers = #tpu.dot_dimension_numbers<[1], [0], [0], [1], [0, 0, 1, 1], [], []>} : vector<256x128xbf16>, vector<128x128xbf16>, vector<256x128xf32> -> vector<256x128xf32>
    %128 = arith.addf %11, %127 : vector<256x128xf32>
    %c0_48 = arith.constant 0 : index
    %c0_49 = arith.constant 0 : index
    %129 = vector.load %arg15[%c0_48, %c0_49] : memref<1x128xf32, #tpu.memory_space<vmem>>, vector<1x128xf32>
    %130 = vector.broadcast %129 : vector<1x128xf32> to vector<256x128xf32>
    %131 = arith.addf %128, %130 : vector<256x128xf32>
    %132 = vector.extract_strided_slice %131 {offsets = [0, 0], sizes = [256, 32], strides = [1, 1]} : vector<256x128xf32> to vector<256x32xf32>
    %c0_50 = arith.constant 0 : index
    %c0_51 = arith.constant 0 : index
    %133 = vector.load %arg16[%c0_50, %c0_51] : memref<256x32xf32, #tpu.memory_space<vmem>>, vector<256x32xf32>
    tpu.vector_store %arg16[%c0_50, %c0_51], %132 {strides = array<i32>} : memref<256x32xf32, #tpu.memory_space<vmem>>, vector<256x32xf32>,
    return
  }
  func.func @transform_0(%arg0: i32) -> (i32, i32) {
    %c0_i32 = arith.constant 0 : i32
    %c0_i32_0 = arith.constant 0 : i32
    return %arg0, %c0_i32 : i32, i32
  }
  func.func @transform_1(%arg0: i32) -> i32 {
    %c0_i32 = arith.constant 0 : i32
    %c0_i32_0 = arith.constant 0 : i32
    return %c0_i32 : i32
  }
  func.func @transform_2(%arg0: i32) -> i32 {
    %c0_i32 = arith.constant 0 : i32
    %c0_i32_0 = arith.constant 0 : i32
    return %c0_i32 : i32
  }
  func.func @transform_3(%arg0: i32) -> (i32, i32) {
    %c0_i32 = arith.constant 0 : i32
    %c0_i32_0 = arith.constant 0 : i32
    %c0_i32_1 = arith.constant 0 : i32
    return %c0_i32, %c0_i32_0 : i32, i32
  }
  func.func @transform_4(%arg0: i32) -> (i32, i32) {
    %c0_i32 = arith.constant 0 : i32
    %c0_i32_0 = arith.constant 0 : i32
    %c0_i32_1 = arith.constant 0 : i32
    return %c0_i32, %c0_i32_0 : i32, i32
  }
  func.func @transform_5(%arg0: i32) -> (i32, i32) {
    %c0_i32 = arith.constant 0 : i32
    %c0_i32_0 = arith.constant 0 : i32
    %c0_i32_1 = arith.constant 0 : i32
    return %c0_i32, %c0_i32_0 : i32, i32
  }
  func.func @transform_6(%arg0: i32) -> (i32, i32) {
    %c0_i32 = arith.constant 0 : i32
    %c0_i32_0 = arith.constant 0 : i32
    %c0_i32_1 = arith.constant 0 : i32
    return %c0_i32, %c0_i32_0 : i32, i32
  }
  func.func @transform_7(%arg0: i32) -> (i32, i32) {
    %c0_i32 = arith.constant 0 : i32
    %c0_i32_0 = arith.constant 0 : i32
    %c0_i32_1 = arith.constant 0 : i32
    return %c0_i32, %c0_i32_0 : i32, i32
  }
  func.func @transform_8(%arg0: i32) -> (i32, i32) {
    %c0_i32 = arith.constant 0 : i32
    %c0_i32_0 = arith.constant 0 : i32
    %c0_i32_1 = arith.constant 0 : i32
    return %c0_i32, %c0_i32_0 : i32, i32
  }
  func.func @transform_9(%arg0: i32) -> (i32, i32) {
    %c0_i32 = arith.constant 0 : i32
    %c0_i32_0 = arith.constant 0 : i32
    %c0_i32_1 = arith.constant 0 : i32
    return %c0_i32, %c0_i32_0 : i32, i32
  }
  func.func @transform_10(%arg0: i32) -> (i32, i32) {
    %c0_i32 = arith.constant 0 : i32
    %c0_i32_0 = arith.constant 0 : i32
    %c0_i32_1 = arith.constant 0 : i32
    return %c0_i32, %c0_i32_0 : i32, i32
  }
  func.func @transform_11(%arg0: i32) -> (i32, i32) {
    %c0_i32 = arith.constant 0 : i32
    %c0_i32_0 = arith.constant 0 : i32
    %c0_i32_1 = arith.constant 0 : i32
    return %c0_i32, %c0_i32_0 : i32, i32
  }
  func.func @transform_12(%arg0: i32) -> (i32, i32) {
    %c0_i32 = arith.constant 0 : i32
    %c0_i32_0 = arith.constant 0 : i32
    %c0_i32_1 = arith.constant 0 : i32
    return %c0_i32, %c0_i32_0 : i32, i32
  }
  func.func @transform_13(%arg0: i32) -> (i32, i32) {
    %c0_i32 = arith.constant 0 : i32
    %c0_i32_0 = arith.constant 0 : i32
    %c0_i32_1 = arith.constant 0 : i32
    return %c0_i32, %c0_i32_0 : i32, i32
  }
  func.func @transform_14(%arg0: i32) -> (i32, i32) {
    %c0_i32 = arith.constant 0 : i32
    %c0_i32_0 = arith.constant 0 : i32
    %c0_i32_1 = arith.constant 0 : i32
    return %c0_i32, %c0_i32_0 : i32, i32
  }
  func.func @transform_15(%arg0: i32) -> (i32, i32) {
    %c0_i32 = arith.constant 0 : i32
    %c0_i32_0 = arith.constant 0 : i32
    return %arg0, %c0_i32 : i32, i32
  }
}

</mosaic_0001>

<bundles_post_ra>
// kernel: tpu_custom_call.1
= control target key start
LH: loop header
LB: loop body
LE: loop exit
PB: predicated region body
PF: predicated region fallthrough
CT: control target
= control target key end

     0   :  { %s4343_s22 = smov 0   ;;  %s7538_s0 = inlined_call_operand.vmem [shape: f32[512,1], index: 0, kind: input, shape index: {}]   ;;  %s7539_s1 = inlined_call_operand.<no memory space> [shape: f32[1], index: 1, kind: input, shape index: {}]   ;;  %s7540_s2 = inlined_call_operand.<no memory space> [shape: f32[1], index: 2, kind: input, shape index: {}]   ;;  %s7541_s3 = inlined_call_operand.vmem [shape: f32[1,128], index: 3, kind: input, shape index: {}]   ;;  %s7542_s4 = inlined_call_operand.vmem [shape: f32[1,128], index: 4, kind: input, shape index: {}]   ;;  %s7543_s5 = inlined_call_operand.vmem [shape: bf16[128,128], index: 5, kind: input, shape index: {}]   ;;  %s7544_s6 = inlined_call_operand.vmem [shape: f32[1,128], index: 6, kind: input, shape index: {}]   ;;  %s7545_s7 = inlined_call_operand.vmem [shape: f32[1,128], index: 7, kind: input, shape index: {}]   ;;  %s7546_s8 = inlined_call_operand.vmem [shape: f32[1,128], index: 8, kind: input, shape index: {}]   ;;  %s7547_s9 = inlined_call_operand.vmem [shape: f32[3,128], index: 9, kind: input, shape index: {}]   ;;  %s7548_s10 = inlined_call_operand.vmem [shape: f32[1,128], index: 10, kind: input, shape index: {}]   ;;  %s7549_s11 = inlined_call_operand.vmem [shape: f32[1,128], index: 11, kind: input, shape index: {}]   ;;  %s7550_s12 = inlined_call_operand.vmem [shape: f32[1,128], index: 12, kind: input, shape index: {}]   ;;  %s7551_s13 = inlined_call_operand.vmem [shape: bf16[128,128], index: 13, kind: input, shape index: {}]   ;;  %s7552_s14 = inlined_call_operand.vmem [shape: f32[1,128], index: 14, kind: input, shape index: {}]   ;;  %s7553_s15 = inlined_call_operand.vmem [shape: f32[512,32], index: 15, kind: output, shape index: {}]  }
   0x1   :  { %20 = sst [smem:[#allocation2]] %s7539_s1 }
   0x2   :  { %21 = sst [smem:[#allocation3]] %s7540_s2 }
   0x3 LB: > { %s3985_s23 = sadd.s32 4294967295, %s4254_s22   ;;  %p3989_p0 = scmp.ge.s32.totalorder %s4254_s22, 1  ;;  %s4254_s22 = sphi %s4343_s22, %s27_s22  }
   0x4   : > { %p440_p1 = scmp.lt.s32.totalorder %s4254_s22, 3 }
   0x6   : > { %p441_p2 = pnand %p3989_p0, %p440_p1 }
   0x8   : > { %444 = sbr.rel (%p441_p2) target bundleno = 1326 (0x52e), region = 80 }
   0xd   : > { %s3990_s1 = sshll.u32 %s3985_s23, 5  ;;  %v4256_v0 = vmov 0   ;;  %v4067_v28 = vld [vmem:[%s7543_s5 + $0x38] sm:$0xff]  ;;  %v4066_v31 = vld [vmem:[%s7543_s5 + $0x30] sm:$0xff]  ;;  %v4065_v33 = vld [vmem:[%s7543_s5 + $0x28] sm:$0xff]  ;;  %s500_s18 = sld [smem:[#allocation2]] }
   0xe   : > { %4103 = vset.pattern.permute.xlu2 %v4256_v0  ;;  %4102 = vset.pattern.permute.xlu1 %v4256_v0  ;;  %p489_p3 = scmp.lt.s32.totalorder %s3990_s1, 63  ;;  %v4064_v35 = vld [vmem:[%s7543_s5 + $0x20] sm:$0xff]  ;;  %v4063_v37 = vld [vmem:[%s7543_s5 + $0x18] sm:$0xff]  ;;  %v4062_v38 = vld [vmem:[%s7543_s5 + $0x10] sm:$0xff]  ;;  %s5284_s28 = sld [smem:[#allocation3]] }
   0xf   : > { %4101 = vset.pattern.permute.xlu0 %v4256_v0  ;;  %882 = vmatpush.bf16.msra.mxu0 %v4067_v28  ;;  %v4061_v39 = vld [vmem:[%s7543_s5 + $0x8] sm:$0xff]  ;;  %v4060_v40 = vld [vmem:[%s7543_s5] sm:$0xff] }
  0x10   : > { %s7924_s1 = smov (!%p489_p3, %s3990_s1), 63  ;;  %4076 = vmatpush.bf16.msra.mxu2 %v4067_v28  ;;  %v4420_v42 = vld [vmem:[%s7541_s3] ss:$0 sm:$0xff] }
  0x11   : > { %s3991_s2 = sshll.u32 %s7924_s1, 3  ;;  %v4425_v44 = vld [vmem:[%s7542_s4] ss:$0 sm:$0xff] }
  0x12   : > { %s4359_s26 = scalar_lea.vmem %s7538_s0, %s3991_s2  ;;  %s7207_s23 = scalar_lea.vmem %s7553_s15, %s3991_s2 }
  0x13   : > { %v518_v1 = vld [vmem:[%s4359_s26 + $0x80] sm:$0xff]  ;;  %v504_v2 = vld [vmem:[%s4359_s26 + $0x10] sm:$0xff]  ;;  %v519_v4 = vld [vmem:[%s4359_s26 + $0x88] sm:$0xff]  ;;  %883 = vmatpush.bf16.msra.mxu0 %v4066_v31 }
  0x14   : > { %v502_v3 = vld [vmem:[%s4359_s26] sm:$0xff]  ;;  %617 = vperm.xlu1 %4102, %v518_v1   ;;  %547 = vperm.xlu2 %4103, %v504_v2   ;;  %v505_v5 = vld [vmem:[%s4359_s26 + $0x18] sm:$0xff]  ;;  %v503_v6 = vld [vmem:[%s4359_s26 + $0x8] sm:$0xff] }
  0x15   : > { %537 = vperm.xlu0 %4101, %v502_v3   ;;  %v521_v7 = vld [vmem:[%s4359_s26 + $0x98] sm:$0xff]  ;;  %v506_v8 = vld [vmem:[%s4359_s26 + $0x20] sm:$0xff]  ;;  %v520_v9 = vld [vmem:[%s4359_s26 + $0x90] sm:$0xff]  ;;  %4077 = vmatpush.bf16.msra.mxu2 %v4066_v31 }
  0x16   : > { %v522_v10 = vld [vmem:[%s4359_s26 + $0xa0] sm:$0xff]  ;;  %v523_v11 = vld [vmem:[%s4359_s26 + $0xa8] sm:$0xff]  ;;  %v509_v13 = vld [vmem:[%s4359_s26 + $0x38] sm:$0xff] }
  0x17   : > { %v507_v12 = vld [vmem:[%s4359_s26 + $0x28] sm:$0xff]  ;;  %v524_v14 = vld [vmem:[%s4359_s26 + $0xb0] sm:$0xff]  ;;  %v510_v16 = vld [vmem:[%s4359_s26 + $0x40] sm:$0xff]  ;;  %884 = vmatpush.bf16.msra.mxu0 %v4065_v33 }
  0x18   : > { %v508_v15 = vld [vmem:[%s4359_s26 + $0x30] sm:$0xff]  ;;  %v511_v17 = vld [vmem:[%s4359_s26 + $0x48] sm:$0xff]  ;;  %v525_v18 = vld [vmem:[%s4359_s26 + $0xb8] sm:$0xff] }
  0x19   : > { %v527_v19 = vld [vmem:[%s4359_s26 + $0xc8] sm:$0xff]  ;;  %v512_v20 = vld [vmem:[%s4359_s26 + $0x50] sm:$0xff]  ;;  %v526_v21 = vld [vmem:[%s4359_s26 + $0xc0] sm:$0xff]  ;;  %4078 = vmatpush.bf16.msra.mxu2 %v4065_v33 }
  0x1a   : > { %v528_v22 = vld [vmem:[%s4359_s26 + $0xd0] sm:$0xff]  ;;  %v529_v23 = vld [vmem:[%s4359_s26 + $0xd8] sm:$0xff]  ;;  %v515_v25 = vld [vmem:[%s4359_s26 + $0x68] sm:$0xff] }
  0x1b   : > { %v513_v24 = vld [vmem:[%s4359_s26 + $0x58] sm:$0xff]  ;;  %v530_v26 = vld [vmem:[%s4359_s26 + $0xe0] sm:$0xff]  ;;  %v516_v29 = vld [vmem:[%s4359_s26 + $0x70] sm:$0xff]  ;;  %885 = vmatpush.bf16.msra.mxu0 %v4064_v35 }
  0x1c   : > { %622 = vperm.xlu1 %4102, %v519_v4   ;;  %552 = vperm.xlu2 %4103, %v505_v5   ;;  %v514_v27 = vld [vmem:[%s4359_s26 + $0x60] sm:$0xff]  ;;  %v517_v30 = vld [vmem:[%s4359_s26 + $0x78] sm:$0xff]  ;;  %v531_v32 = vld [vmem:[%s4359_s26 + $0xe8] sm:$0xff] }
  0x1d   : > { %542 = vperm.xlu0 %4101, %v503_v6   ;;  %v533_v34 = vld [vmem:[%s4359_s26 + $0xf8] sm:$0xff]  ;;  %v532_v36 = vld [vmem:[%s4359_s26 + $0xf0] sm:$0xff]  ;;  %4079 = vmatpush.bf16.msra.mxu2 %v4064_v35 }
  0x1f   : > { %886 = vmatpush.bf16.msra.mxu0 %v4063_v37 }
  0x21   : > { %4080 = vmatpush.bf16.msra.mxu2 %v4063_v37 }
  0x23   : > { %887 = vmatpush.bf16.msra.mxu0 %v4062_v38 }
  0x24   : > { %632 = vperm.xlu1 %4102, %v521_v7   ;;  %557 = vperm.xlu2 %4103, %v506_v8  }
  0x25   : > { %627 = vperm.xlu0 %4101, %v520_v9   ;;  %4081 = vmatpush.bf16.msra.mxu2 %v4062_v38 }
  0x27   : > { %888 = vmatpush.bf16.msra.mxu0 %v4061_v39 }
  0x29   : > { %4082 = vmatpush.bf16.msra.mxu2 %v4061_v39 }
  0x2b   : > { %889 = vmatpush.bf16.msra.mxu0 %v4060_v40 }
  0x2c   : > { %637 = vperm.xlu1 %4102, %v522_v10   ;;  %642 = vperm.xlu2 %4103, %v523_v11  }
  0x2d   : > { %562 = vperm.xlu0 %4101, %v507_v12   ;;  %4083 = vmatpush.bf16.msra.mxu2 %v4060_v40 }
  0x34   : > { %572 = vperm.xlu1 %4102, %v509_v13   ;;  %647 = vperm.xlu2 %4103, %v524_v14  }
  0x35   : > { %567 = vperm.xlu0 %4101, %v508_v15  }
  0x3c   : > { %577 = vperm.xlu1 %4102, %v510_v16   ;;  %582 = vperm.xlu2 %4103, %v511_v17  }
  0x3d   : > { %652 = vperm.xlu0 %4101, %v525_v18  }
  0x44   : > { %662 = vperm.xlu1 %4102, %v527_v19   ;;  %587 = vperm.xlu2 %4103, %v512_v20  }
  0x45   : > { %657 = vperm.xlu0 %4101, %v526_v21  }
  0x4c   : > { %667 = vperm.xlu1 %4102, %v528_v22   ;;  %672 = vperm.xlu2 %4103, %v529_v23  }
  0x4d   : > { %592 = vperm.xlu0 %4101, %v513_v24  }
  0x54   : > { %602 = vperm.xlu1 %4102, %v515_v25   ;;  %677 = vperm.xlu2 %4103, %v530_v26  }
  0x55   : > { %597 = vperm.xlu0 %4101, %v514_v27  }
  0x5c   : > { %607 = vperm.xlu1 %4102, %v516_v29   ;;  %612 = vperm.xlu2 %4103, %v517_v30  }
  0x5d   : > { %682 = vperm.xlu0 %4101, %v531_v32  }
  0x64   : > { %692 = vperm.xlu1 %4102, %v533_v34  }
  0x65   : > { %687 = vperm.xlu0 %4101, %v532_v36  }
  0x6e   : > { %v548_v46 = vpop.permute.xlu2 %547 }
  0x6f   : > { %v700_v3 = vmul.f32 %v4420_v42, %v548_v46 }
  0x71   : > { %v4466_v7 = vadd.f32 %v4425_v44, %v700_v3 }
  0x73   : > { %7673 = vst [vmem:[#allocation10_spill] sm:$0xff] %v4466_v7  ;;  %v7579_v13 = vmax.f32 %v4466_v7, 0.0 }
  0x76   : > { %v553_v61 = vpop.permute.xlu2 %552 }
  0x77   : > { %v701_v4 = vmul.f32 %v4420_v42, %v553_v61 }
  0x79   : > { %v4469_v8 = vadd.f32 %v4425_v44, %v701_v4 }
  0x7b   : > { %7674 = vst [vmem:[#allocation11_spill] sm:$0xff] %v4469_v8  ;;  %v7577_v14 = vmax.f32 %v4469_v8, 0.0 }
  0x7d   : > { %v799_v17 = vpack.c.bf16 %v7577_v14, %v7579_v13 }
  0x7e   : > { %v558_v9 = vpop.permute.xlu2 %557 }
  0x7f   : > { %v702_v22 = vmul.f32 %v4420_v42, %v558_v9 }
  0x81   : > { %v4497_v27 = vadd.f32 %v4425_v44, %v702_v22 }
  0x83   : > { %7678 = vst [vmem:[#allocation15_spill] sm:$0xff] %v4497_v27  ;;  %v7575_v32 = vmax.f32 %v4497_v27, 0.0 }
  0x86   : > { %v618_v41 = vpop.permute.xlu1 %617  ;;  %v643_v19 = vpop.permute.xlu2 %642 }
  0x87   : > { %v538_v43 = vpop.permute.xlu0 %537  ;;  %v714_v45 = vmul.f32 %v4420_v42, %v618_v41  ;;  %v719_v21 = vmul.f32 %v4420_v42, %v643_v19 }
  0x88   : > { %v698_v47 = vmul.f32 %v4420_v42, %v538_v43 }
  0x89   : > { %v4430_v49 = vadd.f32 %v4425_v44, %v714_v45  ;;  %v4494_v26 = vadd.f32 %v4425_v44, %v719_v21 }
  0x8a   : > { %v4434_v52 = vadd.f32 %v4425_v44, %v698_v47 }
  0x8b   : > { %7667 = vst [vmem:[#allocation4_spill] sm:$0xff] %v4430_v49  ;;  %v7585_v56 = vmax.f32 %v4430_v49, 0.0  ;;  %v7576_v31 = vmax.f32 %v4494_v26, 0.0 }
  0x8c   : > { %7668 = vst [vmem:[#allocation5_spill] sm:$0xff] %v4434_v52  ;;  %v7582_v58 = vmax.f32 %v4434_v52, 0.0 }
  0x8d   : > { %7677 = vst [vmem:[#allocation14_spill] sm:$0xff] %v4494_v26 }
  0x8e   : > { %v623_v48 = vpop.permute.xlu1 %622  ;;  %v648_v37 = vpop.permute.xlu2 %647 }
  0x8f   : > { %v715_v50 = vmul.f32 %v4420_v42, %v623_v48  ;;  %v543_v51 = vpop.permute.xlu0 %542  ;;  %v720_v40 = vmul.f32 %v4420_v42, %v648_v37 }
  0x90   : > { %v699_v53 = vmul.f32 %v4420_v42, %v543_v51 }
  0x91   : > { %v4438_v54 = vadd.f32 %v4425_v44, %v715_v50  ;;  %v4525_v47 = vadd.f32 %v4425_v44, %v720_v40 }
  0x92   : > { %v4441_v55 = vadd.f32 %v4425_v44, %v699_v53 }
  0x93   : > { %7669 = vst [vmem:[#allocation6_spill] sm:$0xff] %v4438_v54  ;;  %v7584_v57 = vmax.f32 %v4438_v54, 0.0  ;;  %v7574_v53 = vmax.f32 %v4525_v47, 0.0 }
  0x94   : > { %7670 = vst [vmem:[#allocation7_spill] sm:$0xff] %v4441_v55  ;;  %v7580_v59 = vmax.f32 %v4441_v55, 0.0 }
  0x95   : > { %v806_v60 = vpack.c.bf16 %v7584_v57, %v7585_v56  ;;  %7682 = vst [vmem:[#allocation19_spill] sm:$0xff] %v4525_v47 }
  0x96   : > { %v633_v62 = vpop.permute.xlu1 %632  ;;  %v798_v63 = vpack.c.bf16 %v7580_v59, %v7582_v58 }
  0x97   : > { %v628_v0 = vpop.permute.xlu0 %627  ;;  %930 = vmatmul.bf16.vlgmr.msra.gmra.mxu2 %v806_v60  ;;  %v717_v1 = vmul.f32 %v4420_v42, %v633_v62  ;;  %v583_v60 = vpop.permute.xlu2 %582 }
  0x98   : > { %890 = vmatmul.bf16.vlgmr.msra.gmra.mxu0 %v798_v63  ;;  %v716_v2 = vmul.f32 %v4420_v42, %v628_v0  ;;  %v707_v4 = vmul.f32 %v4420_v42, %v583_v60 }
  0x99   : > { %v4460_v5 = vadd.f32 %v4425_v44, %v717_v1 }
  0x9a   : > { %v4463_v6 = vadd.f32 %v4425_v44, %v716_v2 }
  0x9b   : > { %7671 = vst [vmem:[#allocation8_spill] sm:$0xff] %v4460_v5  ;;  %v7581_v11 = vmax.f32 %v4460_v5, 0.0 }
  0x9c   : > { %7672 = vst [vmem:[#allocation9_spill] sm:$0xff] %v4463_v6  ;;  %v7583_v10 = vmax.f32 %v4463_v6, 0.0 }
  0x9e   : > { %v807_v15 = vpack.c.bf16 %v7581_v11, %v7583_v10  ;;  %v638_v16 = vpop.permute.xlu1 %637 }
  0x9f   : > { %v563_v12 = vpop.permute.xlu0 %562  ;;  %v718_v18 = vmul.f32 %v4420_v42, %v638_v16 }
  0xa0   : > { %v703_v20 = vmul.f32 %v4420_v42, %v563_v12 }
  0xa1   : > { %v4488_v24 = vadd.f32 %v4425_v44, %v718_v18 }
  0xa2   : > { %v4491_v25 = vadd.f32 %v4425_v44, %v703_v20 }
  0xa3   : > { %7675 = vst [vmem:[#allocation12_spill] sm:$0xff] %v4488_v24  ;;  %v7578_v28 = vmax.f32 %v4488_v24, 0.0 }
  0xa4   : > { %7676 = vst [vmem:[#allocation13_spill] sm:$0xff] %v4491_v25  ;;  %v7573_v30 = vmax.f32 %v4491_v25, 0.0 }
  0xa5   : > { %v808_v33 = vpack.c.bf16 %v7576_v31, %v7578_v28 }
  0xa6   : > { %v573_v29 = vpop.permute.xlu1 %572  ;;  %v800_v35 = vpack.c.bf16 %v7573_v30, %v7575_v32 }
  0xa7   : > { %935 = vmatmul.bf16.gmra.mxu2 %v807_v15  ;;  %v568_v23 = vpop.permute.xlu0 %567  ;;  %v705_v38 = vmul.f32 %v4420_v42, %v573_v29  ;;  %v588_v15 = vpop.permute.xlu2 %587 }
  0xa8   : > { %895 = vmatmul.bf16.gmra.mxu0 %v799_v17  ;;  %v704_v39 = vmul.f32 %v4420_v42, %v568_v23  ;;  %v4553_v17 = vadd.f32 %v4425_v44, %v707_v4 }
  0xa9   : > { %v4519_v45 = vadd.f32 %v4425_v44, %v705_v38  ;;  %v708_v38 = vmul.f32 %v4420_v42, %v588_v15 }
  0xaa   : > { %v4522_v46 = vadd.f32 %v4425_v44, %v704_v39  ;;  %7686 = vst [vmem:[#allocation23_spill] sm:$0xff] %v4553_v17  ;;  %v7560_v22 = vmax.f32 %v4553_v17, 0.0 }
  0xab   : > { %7680 = vst [vmem:[#allocation17_spill] sm:$0xff] %v4519_v45  ;;  %v7569_v50 = vmax.f32 %v4519_v45, 0.0 }
  0xac   : > { %7681 = vst [vmem:[#allocation18_spill] sm:$0xff] %v4522_v46  ;;  %v7571_v51 = vmax.f32 %v4522_v46, 0.0 }
  0xae   : > { %v578_v41 = vpop.permute.xlu1 %577  ;;  %v801_v0 = vpack.c.bf16 %v7569_v50, %v7571_v51 }
  0xaf   : > { %v653_v34 = vpop.permute.xlu0 %652  ;;  %v706_v3 = vmul.f32 %v4420_v42, %v578_v41 }
  0xb0   : > { %v721_v36 = vmul.f32 %v4420_v42, %v653_v34  ;;  %v673_v34 = vpop.permute.xlu2 %672 }
  0xb1   : > { %v4550_v16 = vadd.f32 %v4425_v44, %v706_v3  ;;  %v725_v37 = vmul.f32 %v4420_v42, %v673_v34 }
  0xb2   : > { %v4516_v43 = vadd.f32 %v4425_v44, %v721_v36 }
  0xb3   : > { %7685 = vst [vmem:[#allocation22_spill] sm:$0xff] %v4550_v16  ;;  %v7567_v20 = vmax.f32 %v4550_v16, 0.0  ;;  %v4578_v60 = vadd.f32 %v4425_v44, %v725_v37 }
  0xb4   : > { %7679 = vst [vmem:[#allocation16_spill] sm:$0xff] %v4516_v43  ;;  %v7572_v48 = vmax.f32 %v4516_v43, 0.0 }
  0xb5   : > { %7689 = vst [vmem:[#allocation26_spill] sm:$0xff] %v4578_v60 }
  0xb6   : > { %v809_v61 = vpack.c.bf16 %v7572_v48, %v7574_v53  ;;  %v663_v62 = vpop.permute.xlu1 %662 }
  0xb7   : > { %940 = vmatmul.bf16.gmra.mxu2 %v808_v33  ;;  %v658_v63 = vpop.permute.xlu0 %657  ;;  %v723_v1 = vmul.f32 %v4420_v42, %v663_v62  ;;  %v802_v33 = vpack.c.bf16 %v7560_v22, %v7567_v20 }
  0xb8   : > { %900 = vmatmul.bf16.gmra.mxu0 %v800_v35  ;;  %v722_v2 = vmul.f32 %v4420_v42, %v658_v63 }
  0xb9   : > { %v4544_v9 = vadd.f32 %v4425_v44, %v723_v1  ;;  %v7555_v1 = vmax.f32 %v4578_v60, 0.0 }
  0xba   : > { %v4547_v12 = vadd.f32 %v4425_v44, %v722_v2 }
  0xbb   : > { %7683 = vst [vmem:[#allocation20_spill] sm:$0xff] %v4544_v9  ;;  %v7568_v18 = vmax.f32 %v4544_v9, 0.0 }
  0xbc   : > { %7684 = vst [vmem:[#allocation21_spill] sm:$0xff] %v4547_v12  ;;  %v7570_v19 = vmax.f32 %v4547_v12, 0.0 }
  0xbe   : > { %v810_v23 = vpack.c.bf16 %v7568_v18, %v7570_v19  ;;  %v668_v29 = vpop.permute.xlu1 %667 }
  0xbf   : > { %v593_v21 = vpop.permute.xlu0 %592  ;;  %v724_v35 = vmul.f32 %v4420_v42, %v668_v29 }
  0xc0   : > { %v709_v36 = vmul.f32 %v4420_v42, %v593_v21  ;;  %v678_v21 = vpop.permute.xlu2 %677 }
  0xc1   : > { %v4572_v40 = vadd.f32 %v4425_v44, %v724_v35  ;;  %v726_v34 = vmul.f32 %v4420_v42, %v678_v21 }
  0xc2   : > { %v4575_v41 = vadd.f32 %v4425_v44, %v709_v36 }
  0xc3   : > { %7687 = vst [vmem:[#allocation24_spill] sm:$0xff] %v4572_v40  ;;  %v7557_v62 = vmax.f32 %v4572_v40, 0.0 }
  0xc4   : > { %7688 = vst [vmem:[#allocation25_spill] sm:$0xff] %v4575_v41  ;;  %v7554_v63 = vmax.f32 %v4575_v41, 0.0 }
  0xc5   : > { %v811_v3 = vpack.c.bf16 %v7555_v1, %v7557_v62 }
  0xc7   : > { %945 = vmatmul.bf16.gmra.mxu2 %v809_v61  ;;  %v598_v39 = vpop.permute.xlu0 %597  ;;  %v4581_v61 = vadd.f32 %v4425_v44, %v708_v38 }
  0xc8   : > { %905 = vmatmul.bf16.gmra.mxu0 %v801_v0  ;;  %v603_v0 = vpop.permute.xlu1 %602 }
  0xc9   : > { %7690 = vst [vmem:[#allocation27_spill] sm:$0xff] %v4581_v61  ;;  %v7556_v2 = vmax.f32 %v4581_v61, 0.0  ;;  %v711_v29 = vmul.f32 %v4420_v42, %v603_v0 }
  0xcb   : > { %v803_v15 = vpack.c.bf16 %v7554_v63, %v7556_v2  ;;  %v4603_v37 = vadd.f32 %v4425_v44, %v711_v29 }
  0xcd   : > { %7692 = vst [vmem:[#allocation29_spill] sm:$0xff] %v4603_v37  ;;  %v7565_v0 = vmax.f32 %v4603_v37, 0.0 }
  0xcf   : > { %v683_v4 = vpop.permute.xlu0 %682 }
  0xd0   : > { %v608_v35 = vpop.permute.xlu1 %607 }
  0xd1   : > { %v712_v2 = vmul.f32 %v4420_v42, %v608_v35 }
  0xd3   : > { %v4634_v22 = vadd.f32 %v4425_v44, %v712_v2  ;;  %v4656_v2 = vstv %s500_s18 }
  0xd5   : > { %7697 = vst [vmem:[#allocation34_spill] sm:$0xff] %v4634_v22  ;;  %v7564_v35 = vmax.f32 %v4634_v22, 0.0 }
  0xd7   : > { %950 = vmatmul.bf16.gmra.mxu2 %v810_v23  ;;  %v727_v23 = vmul.f32 %v4420_v42, %v683_v4  ;;  %v688_v29 = vpop.permute.xlu0 %687 }
  0xd8   : > { %910 = vmatmul.bf16.gmra.mxu0 %v802_v33  ;;  %v710_v33 = vmul.f32 %v4420_v42, %v598_v39  ;;  %v728_v1 = vmul.f32 %v4420_v42, %v688_v29 }
  0xd9   : > { %v4600_v36 = vadd.f32 %v4425_v44, %v727_v23  ;;  %v693_v23 = vpop.permute.xlu1 %692 }
  0xda   : > { %v4606_v38 = vadd.f32 %v4425_v44, %v710_v33  ;;  %v729_v63 = vmul.f32 %v4420_v42, %v693_v23 }
  0xdb   : > { %7691 = vst [vmem:[#allocation28_spill] sm:$0xff] %v4600_v36  ;;  %v7558_v4 = vmax.f32 %v4600_v36, 0.0 }
  0xdc   : > { %7693 = vst [vmem:[#allocation30_spill] sm:$0xff] %v4606_v38  ;;  %v7566_v39 = vmax.f32 %v4606_v38, 0.0 }
  0xde   : > { %v804_v33 = vpack.c.bf16 %v7565_v0, %v7566_v39 }
  0xe7   : > { %955 = vmatmul.bf16.gmra.mxu2 %v811_v3  ;;  %v4609_v3 = vadd.f32 %v4425_v44, %v726_v34  ;;  %v613_v34 = vpop.permute.xlu2 %612 }
  0xe8   : > { %915 = vmatmul.bf16.gmra.mxu0 %v803_v15  ;;  %v713_v62 = vmul.f32 %v4420_v42, %v613_v34 }
  0xe9   : > { %7694 = vst [vmem:[#allocation31_spill] sm:$0xff] %v4609_v3  ;;  %v7559_v15 = vmax.f32 %v4609_v3, 0.0 }
  0xeb   : > { %v812_v21 = vpack.c.bf16 %v7558_v4, %v7559_v15  ;;  %v4628_v4 = vadd.f32 %v4425_v44, %v729_v63  ;;  %v4631_v15 = vadd.f32 %v4425_v44, %v728_v1 }
  0xed   : > { %7695 = vst [vmem:[#allocation32_spill] sm:$0xff] %v4628_v4  ;;  %v7561_v23 = vmax.f32 %v4628_v4, 0.0  ;;  %v7562_v29 = vmax.f32 %v4631_v15, 0.0 }
  0xee   : > { %7696 = vst [vmem:[#allocation33_spill] sm:$0xff] %v4631_v15 }
  0xef   : > { %v813_v63 = vpack.c.bf16 %v7561_v23, %v7562_v29 }
  0xf7   : > { %960 = vmatmul.bf16.gmra.mxu2 %v812_v21  ;;  %v4637_v21 = vadd.f32 %v4425_v44, %v713_v62  ;;  %v4654_v44 = vld [vmem:[%s7544_s6] ss:$0 sm:$0xff] }
  0xf8   : > { %920 = vmatmul.bf16.gmra.mxu0 %v804_v33 }
  0xf9   : > { %7698 = vst [vmem:[#allocation35_spill] sm:$0xff] %v4637_v21  ;;  %v7563_v42 = vmax.f32 %v4637_v21, 0.0 }
  0xfb   : > { %v805_v1 = vpack.c.bf16 %v7563_v42, %v7564_v35 }
 0x107   : > { %965 = vmatmul.bf16.gmra.mxu2 %v813_v63 }
 0x108   : > { %925 = vmatmul.bf16.gmra.mxu0 %v805_v1 }
 0x115   : > { %v891_v62 = vpop.f32.mrf.mxu0 }
 0x116   : > { %v892_v33 = vadd.f32 %v4654_v44, %v891_v62 }
 0x118   : > { %vm971_vm0 = vcmp.ge.f32.partialorder %v892_v33, 0.0  ;;  %v1004_v34 = vmul.f32 %v4656_v2, %v892_v33 }
 0x11a   : > { %v931_v23 = vpop.f32.mrf.mxu2  ;;  %v4660_v29 = vsel %vm971_vm0, %v892_v33, %v1004_v34 }
 0x11b   : > { %v932_v63 = vadd.f32 %v4654_v44, %v931_v23  ;;  %1073 = vadd.xlane.f32.xlu2 %v4660_v29 }
 0x11d   : > { %v893_v1 = vpop.f32.mrf.mxu0  ;;  %vm987_vm1 = vcmp.ge.f32.partialorder %v932_v63, 0.0  ;;  %v1020_v42 = vmul.f32 %v4656_v2, %v932_v63 }
 0x11e   : > { %v894_v35 = vadd.f32 %v4654_v44, %v893_v1 }
 0x11f   : > { %v4666_v0 = vsel %vm987_vm1, %v932_v63, %v1020_v42 }
 0x120   : > { %1105 = vadd.xlane.f32.xlu0 %v4666_v0  ;;  %vm972_vm2 = vcmp.ge.f32.partialorder %v894_v35, 0.0  ;;  %v1005_v62 = vmul.f32 %v4656_v2, %v894_v35 }
 0x122   : > { %v933_v39 = vpop.f32.mrf.mxu2  ;;  %v4670_v33 = vsel %vm972_vm2, %v894_v35, %v1005_v62 }
 0x123   : > { %v934_v23 = vadd.f32 %v4654_v44, %v933_v39  ;;  %1075 = vadd.xlane.f32.xlu1 %v4670_v33 }
 0x125   : > { %v896_v34 = vpop.f32.mrf.mxu0  ;;  %v1021_v18 = vmul.f32 %v4656_v2, %v934_v23  ;;  %vm988_vm3 = vcmp.ge.f32.partialorder %v934_v23, 0.0 }
 0x126   : > { %v897_v20 = vadd.f32 %v4654_v44, %v896_v34 }
 0x127   : > { %v4677_v63 = vsel %vm988_vm3, %v934_v23, %v1021_v18 }
 0x128   : > { %vm973_vm4 = vcmp.ge.f32.partialorder %v897_v20, 0.0  ;;  %v1006_v42 = vmul.f32 %v4656_v2, %v897_v20 }
 0x12a   : > { %v4679_v1 = vsel %vm973_vm4, %v897_v20, %v1006_v42  ;;  %v936_v50 = vpop.f32.mrf.mxu2 }
 0x12b   : > { %1107 = vadd.xlane.f32.xlu1 %v4677_v63  ;;  %1077 = vadd.xlane.f32.xlu2 %v4679_v1  ;;  %v937_v39 = vadd.f32 %v4654_v44, %v936_v50 }
 0x12d   : > { %v898_v35 = vpop.f32.mrf.mxu0  ;;  %v1022_v62 = vmul.f32 %v4656_v2, %v937_v39  ;;  %vm989_vm5 = vcmp.ge.f32.partialorder %v937_v39, 0.0 }
 0x12e   : > { %v899_v34 = vadd.f32 %v4654_v44, %v898_v35 }
 0x12f   : > { %v4686_v51 = vsel %vm989_vm5, %v937_v39, %v1022_v62 }
 0x130   : > { %v1007_v42 = vmul.f32 %v4656_v2, %v899_v34  ;;  %vm974_vm7 = vcmp.ge.f32.partialorder %v899_v34, 0.0 }
 0x132   : > { %v938_v19 = vpop.f32.mrf.mxu2  ;;  %v4696_v39 = vsel %vm974_vm7, %v899_v34, %v1007_v42 }
 0x133   : > { %v939_v18 = vadd.f32 %v4654_v44, %v938_v19  ;;  %1109 = vadd.xlane.f32.xlu2 %v4686_v51 }
 0x135   : > { %v901_v20 = vpop.f32.mrf.mxu0  ;;  %vm990_vm6 = vcmp.ge.f32.partialorder %v939_v18, 0.0  ;;  %v1023_v23 = vmul.f32 %v4656_v2, %v939_v18 }
 0x136   : > { %v902_v50 = vadd.f32 %v4654_v44, %v901_v20 }
 0x137   : > { %v4693_v48 = vsel %vm990_vm6, %v939_v18, %v1023_v23 }
 0x138   : > { %1111 = vadd.xlane.f32.xlu0 %v4693_v48  ;;  %v1008_v62 = vmul.f32 %v4656_v2, %v902_v50  ;;  %vm975_vm8 = vcmp.ge.f32.partialorder %v902_v50, 0.0 }
 0x13a   : > { %v941_v35 = vpop.f32.mrf.mxu2  ;;  %v4705_v23 = vsel %vm975_vm8, %v902_v50, %v1008_v62 }
 0x13b   : > { %v942_v19 = vadd.f32 %v4654_v44, %v941_v35  ;;  %1079 = vadd.xlane.f32.xlu2 %v4696_v39 }
 0x13d   : > { %v903_v30 = vpop.f32.mrf.mxu0  ;;  %vm991_vm9 = vcmp.ge.f32.partialorder %v942_v19, 0.0  ;;  %v1024_v53 = vmul.f32 %v4656_v2, %v942_v19 }
 0x13e   : > { %v904_v18 = vadd.f32 %v4654_v44, %v903_v30 }
 0x13f   : > { %v4703_v20 = vsel %vm991_vm9, %v942_v19, %v1024_v53 }
 0x140   : > { %1113 = vadd.xlane.f32.xlu1 %v4703_v20  ;;  %1081 = vadd.xlane.f32.xlu0 %v4705_v23  ;;  %v1009_v35 = vmul.f32 %v4656_v2, %v904_v18  ;;  %vm976_vm10 = vcmp.ge.f32.partialorder %v904_v18, 0.0 }
 0x142   : > { %v943_v34 = vpop.f32.mrf.mxu2  ;;  %v4715_v50 = vsel %vm976_vm10, %v904_v18, %v1009_v35 }
 0x143   : > { %v944_v42 = vadd.f32 %v4654_v44, %v943_v34 }
 0x145   : > { %v906_v32 = vpop.f32.mrf.mxu0  ;;  %vm992_vm11 = vcmp.ge.f32.partialorder %v944_v42, 0.0  ;;  %v1025_v31 = vmul.f32 %v4656_v2, %v944_v42 }
 0x146   : > { %v907_v30 = vadd.f32 %v4654_v44, %v906_v32 }
 0x147   : > { %v4713_v53 = vsel %vm992_vm11, %v944_v42, %v1025_v31 }
 0x148   : > { %1115 = vadd.xlane.f32.xlu1 %v4713_v53  ;;  %1083 = vadd.xlane.f32.xlu0 %v4715_v50  ;;  %v1010_v34 = vmul.f32 %v4656_v2, %v907_v30  ;;  %vm977_vm12 = vcmp.ge.f32.partialorder %v907_v30, 0.0 }
 0x14a   : > { %v946_v19 = vpop.f32.mrf.mxu2  ;;  %v4723_v31 = vsel %vm977_vm12, %v907_v30, %v1010_v34 }
 0x14b   : > { %v947_v62 = vadd.f32 %v4654_v44, %v946_v19 }
 0x14d   : > { %v908_v14 = vpop.f32.mrf.mxu0  ;;  %vm993_vm13 = vcmp.ge.f32.partialorder %v947_v62, 0.0  ;;  %v1026_v28 = vmul.f32 %v4656_v2, %v947_v62 }
 0x14e   : > { %v909_v32 = vadd.f32 %v4654_v44, %v908_v14 }
 0x14f   : > { %v4725_v18 = vsel %vm993_vm13, %v947_v62, %v1026_v28 }
 0x150   : > { %1085 = vadd.xlane.f32.xlu1 %v4723_v31  ;;  %1117 = vadd.xlane.f32.xlu2 %v4725_v18  ;;  %v1011_v35 = vmul.f32 %v4656_v2, %v909_v32  ;;  %vm978_vm14 = vcmp.ge.f32.partialorder %v909_v32, 0.0 }
 0x152   : > { %v948_v42 = vpop.f32.mrf.mxu2  ;;  %v4732_v11 = vsel %vm978_vm14, %v909_v32, %v1011_v35 }
 0x153   : > { %v949_v59 = vadd.f32 %v4654_v44, %v948_v42 }
 0x155   : > { %v911_v19 = vpop.f32.mrf.mxu0  ;;  %v1027_v34 = vmul.f32 %v4656_v2, %v949_v59  ;;  %vm994_vm0 = vcmp.ge.f32.partialorder %v949_v59, 0.0 }
 0x156   : > { %v912_v13 = vadd.f32 %v4654_v44, %v911_v19 }
 0x157   : > { %v4743_v35 = vsel %vm994_vm0, %v949_v59, %v1027_v34 }
 0x158   : > { %1087 = vadd.xlane.f32.xlu2 %v4732_v11  ;;  %vm979_vm15 = vcmp.ge.f32.partialorder %v912_v13, 0.0  ;;  %v1012_v14 = vmul.f32 %v4656_v2, %v912_v13 }
 0x15a   : > { %v4736_v28 = vsel %vm979_vm15, %v912_v13, %v1012_v14  ;;  %v951_v30 = vpop.f32.mrf.mxu2 }
 0x15b   : > { %1089 = vadd.xlane.f32.xlu0 %v4736_v28  ;;  %v952_v62 = vadd.f32 %v4654_v44, %v951_v30 }
 0x15d   : > { %v913_v19 = vpop.f32.mrf.mxu0  ;;  %v1028_v32 = vmul.f32 %v4656_v2, %v952_v62  ;;  %vm995_vm1 = vcmp.ge.f32.partialorder %v952_v62, 0.0 }
 0x15e   : > { %v914_v42 = vadd.f32 %v4654_v44, %v913_v19 }
 0x15f   : > { %v4749_v30 = vsel %vm995_vm1, %v952_v62, %v1028_v32  ;;  %v7597_v32 = vlaneseq }
 0x160   : > { %1119 = vadd.xlane.f32.xlu2 %v4743_v35  ;;  %vm980_vm2 = vcmp.ge.f32.partialorder %v914_v42, 0.0  ;;  %v1013_v13 = vmul.f32 %v4656_v2, %v914_v42 }
 0x161   : > { %v4767_v36 = vand.u32 127, %v7597_v32 }
 0x162   : > { %v4747_v14 = vsel %vm980_vm2, %v914_v42, %v1013_v13  ;;  %v953_v58 = vpop.f32.mrf.mxu2 }
 0x163   : > { %1091 = vadd.xlane.f32.xlu1 %v4747_v14  ;;  %1121 = vadd.xlane.f32.xlu0 %v4749_v30  ;;  %vm1070_vm4 = vcmp.lt.s32.totalorder %v4767_v36, 64  ;;  %v954_v40 = vadd.f32 %v4654_v44, %v953_v58 }
 0x165   : > { %v916_v19 = vpop.f32.mrf.mxu0  ;;  %vm996_vm6 = vcmp.ge.f32.partialorder %v954_v40, 0.0 }
 0x16a   : > { %v956_v10 = vpop.f32.mrf.mxu2 }
 0x16d   : > { %v4753_v57 = vpop.f32.mrf.mxu0 }
 0x172   : > { %v958_v59 = vpop.f32.mrf.mxu2 }
 0x173   : > { %v959_v16 = vadd.f32 %v4654_v44, %v958_v59 }
 0x175   : > { %v4755_v34 = vpop.f32.mrf.mxu0  ;;  %v1031_v59 = vmul.f32 %v4656_v2, %v959_v16  ;;  %vm998_vm9 = vcmp.ge.f32.partialorder %v959_v16, 0.0 }
 0x17a   : > { %v961_v56 = vpop.f32.mrf.mxu2 }
 0x17d   : > { %v4757_v21 = vpop.f32.mrf.mxu0 }
 0x182   : > { %v4759_v4 = vpop.f32.mrf.mxu2 }
 0x185   : > { %v4761_v42 = vpop.f32.mrf.mxu0 }
 0x18a   : > { %v4763_v62 = vpop.f32.mrf.mxu2 }
 0x18d   : > { %v928_v13 = vpop.f32.mrf.mxu0 }
 0x18e   : > { %v929_v22 = vadd.f32 %v4654_v44, %v928_v13  ;;  %v1074_v15 = vpop.xlane.xlu2 %1073 }
 0x18f   : > { %v1137_v37 = vmul.f32 0.015625, %v1074_v15 }
 0x190   : > { %vm986_vm3 = vcmp.ge.f32.partialorder %v929_v22, 0.0  ;;  %v1019_v38 = vmul.f32 %v4656_v2, %v929_v22 }
 0x191   : > { %v1169_v3 = vsub.f32 %v4660_v29, %v1137_v37  ;;  %v957_v29 = vadd.f32 %v4654_v44, %v956_v10 }
 0x192   : > { %v4771_v41 = vsel %vm986_vm3, %v929_v22, %v1019_v38  ;;  %v968_v60 = vpop.f32.mrf.mxu2 }
 0x193   : > { %1103 = vadd.xlane.f32.xlu2 %v4771_v41  ;;  %v969_v61 = vadd.f32 %v4654_v44, %v968_v60  ;;  %v4779_v32 = vsel %vm1070_vm4, %v1169_v3, 0.0  ;;  %v1029_v3 = vmul.f32 %v4656_v2, %v954_v40  ;;  %vm997_vm7 = vcmp.ge.f32.partialorder %v957_v29, 0.0  ;;  %v1106_v45 = vpop.xlane.xlu0 %1105 }
 0x194   : > { %v1233_v60 = vmul.f32 %v4779_v32, %v4779_v32 }
 0x195   : > { %vm1002_vm5 = vcmp.ge.f32.partialorder %v969_v61, 0.0  ;;  %v1035_v15 = vmul.f32 %v4656_v2, %v969_v61  ;;  %v4798_v10 = vsel %vm996_vm6, %v954_v40, %v1029_v3 }
 0x196   : > { %v1076_v13 = vpop.xlane.xlu1 %1075 }
 0x197   : > { %v1138_v37 = vmul.f32 0.015625, %v1076_v13  ;;  %v4782_v22 = vsel %vm1002_vm5, %v969_v61, %v1035_v15  ;;  %v917_v13 = vadd.f32 %v4654_v44, %v916_v19 }
 0x198   : > { %1135 = vadd.xlane.f32.xlu0 %v4782_v22 }
 0x199   : > { %v1170_v38 = vsub.f32 %v4670_v33, %v1138_v37  ;;  %v1030_v33 = vmul.f32 %v4656_v2, %v957_v29  ;;  %v1014_v40 = vmul.f32 %v4656_v2, %v917_v13  ;;  %vm981_vm8 = vcmp.ge.f32.partialorder %v917_v13, 0.0 }
 0x19b   : > { %1265 = vadd.xlane.f32.xlu2 %v1233_v60  ;;  %v4791_v17 = vsel %vm1070_vm4, %v1170_v38, 0.0  ;;  %v4803_v9 = vsel %vm997_vm7, %v957_v29, %v1030_v33  ;;  %v962_v29 = vadd.f32 %v4654_v44, %v961_v56 }
 0x19c   : > { %v1234_v58 = vmul.f32 %v4791_v17, %v4791_v17 }
 0x19d   : > { %vm999_vm10 = vcmp.ge.f32.partialorder %v962_v29, 0.0 }
 0x19e   : > { %v1108_v61 = vpop.xlane.xlu1 %1107  ;;  %v1078_v15 = vpop.xlane.xlu2 %1077  ;;  %1267 = vadd.xlane.f32.xlu1 %v1234_v58 }
 0x19f   : > { %v1154_v37 = vmul.f32 0.015625, %v1108_v61  ;;  %v1139_v60 = vmul.f32 0.015625, %v1078_v15  ;;  %v4816_v61 = vsel %vm981_vm8, %v917_v13, %v1014_v40 }
 0x1a0   : > { %1123 = vadd.xlane.f32.xlu0 %v4798_v10 }
 0x1a1   : > { %v1186_v38 = vsub.f32 %v4677_v63, %v1154_v37  ;;  %v1171_v63 = vsub.f32 %v4679_v1, %v1139_v60  ;;  %v4823_v37 = vsel %vm998_vm9, %v959_v16, %v1031_v59  ;;  %v1032_v60 = vmul.f32 %v4656_v2, %v962_v29 }
 0x1a3   : > { %1125 = vadd.xlane.f32.xlu2 %v4803_v9  ;;  %v4808_v58 = vsel %vm1070_vm4, %v1186_v38, 0.0  ;;  %v4821_v33 = vsel %vm1070_vm4, %v1171_v63, 0.0  ;;  %v1153_v38 = vmul.f32 0.015625, %v1106_v45  ;;  %v4832_v16 = vsel %vm999_vm10, %v962_v29, %v1032_v60 }
 0x1a4   : > { %v1250_v19 = vmul.f32 %v4808_v58, %v4808_v58  ;;  %v1235_v56 = vmul.f32 %v4821_v33, %v4821_v33 }
 0x1a5   : > { %v1185_v63 = vsub.f32 %v4666_v0, %v1153_v38 }
 0x1a6   : > { %v1110_v3 = vpop.xlane.xlu2 %1109  ;;  %1299 = vadd.xlane.f32.xlu1 %v1250_v19 }
 0x1a7   : > { %v1155_v15 = vmul.f32 0.015625, %v1110_v3  ;;  %v4847_v29 = vsel %vm1070_vm4, %v1185_v63, 0.0 }
 0x1a8   : > { %1093 = vadd.xlane.f32.xlu0 %v4816_v61 }
 0x1a9   : > { %v1187_v13 = vsub.f32 %v4686_v51, %v1155_v15 }
 0x1ab   : > { %1127 = vadd.xlane.f32.xlu2 %v4823_v37  ;;  %v1112_v1 = vpop.xlane.xlu0 %1111  ;;  %v4843_v51 = vsel %vm1070_vm4, %v1187_v13, 0.0  ;;  %v1249_v13 = vmul.f32 %v4847_v29, %v4847_v29 }
 0x1ac   : > { %v1156_v19 = vmul.f32 0.015625, %v1112_v1  ;;  %v1251_v60 = vmul.f32 %v4843_v51, %v4843_v51 }
 0x1ae   : > { %v1188_v40 = vsub.f32 %v4693_v48, %v1156_v19  ;;  %1269 = vadd.xlane.f32.xlu1 %v1235_v56  ;;  %v1080_v45 = vpop.xlane.xlu2 %1079 }
 0x1af   : > { %v1140_v48 = vmul.f32 0.015625, %v1080_v45 }
 0x1b0   : > { %1129 = vadd.xlane.f32.xlu0 %v4832_v16  ;;  %v4837_v3 = vsel %vm1070_vm4, %v1188_v40, 0.0 }
 0x1b1   : > { %v1252_v59 = vmul.f32 %v4837_v3, %v4837_v3  ;;  %v1172_v40 = vsub.f32 %v4696_v39, %v1140_v48 }
 0x1b3   : > { %v1114_v15 = vpop.xlane.xlu1 %1113  ;;  %1303 = vadd.xlane.f32.xlu2 %v1252_v59  ;;  %v1082_v0 = vpop.xlane.xlu0 %1081 }
 0x1b4   : > { %v1157_v38 = vmul.f32 0.015625, %v1114_v15  ;;  %v1141_v1 = vmul.f32 0.015625, %v1082_v0 }
 0x1b6   : > { %v1189_v19 = vsub.f32 %v4703_v20, %v1157_v38  ;;  %v1173_v56 = vsub.f32 %v4705_v23, %v1141_v1  ;;  %1301 = vadd.xlane.f32.xlu1 %v1251_v60  ;;  %v4868_v23 = vsel %vm1070_vm4, %v1172_v40, 0.0  ;;  %v922_v40 = vadd.f32 %v4654_v44, %v4755_v34 }
 0x1b7   : > { %v1236_v0 = vmul.f32 %v4868_v23, %v4868_v23 }
 0x1b8   : > { %1297 = vadd.xlane.f32.xlu0 %v1249_v13  ;;  %v4858_v63 = vsel %vm1070_vm4, %v1173_v56, 0.0  ;;  %v4864_v59 = vsel %vm1070_vm4, %v1189_v19, 0.0  ;;  %vm983_vm11 = vcmp.ge.f32.partialorder %v922_v40, 0.0 }
 0x1b9   : > { %v1237_v45 = vmul.f32 %v4858_v63, %v4858_v63  ;;  %v1253_v39 = vmul.f32 %v4864_v59, %v4864_v59 }
 0x1bb   : > { %v1116_v20 = vpop.xlane.xlu1 %1115  ;;  %1273 = vadd.xlane.f32.xlu2 %v1237_v45  ;;  %v1016_v45 = vmul.f32 %v4656_v2, %v922_v40 }
 0x1bc   : > { %v1158_v15 = vmul.f32 0.015625, %v1116_v20  ;;  %v964_v20 = vadd.f32 %v4654_v44, %v4759_v4 }
 0x1be   : > { %v1190_v48 = vsub.f32 %v4713_v53, %v1158_v15  ;;  %1305 = vadd.xlane.f32.xlu1 %v1253_v39  ;;  %v4893_v15 = vsel %vm983_vm11, %v922_v40, %v1016_v45  ;;  %vm1000_vm12 = vcmp.ge.f32.partialorder %v964_v20, 0.0 }
 0x1c0   : > { %1271 = vadd.xlane.f32.xlu0 %v1236_v0  ;;  %v4877_v38 = vsel %vm1070_vm4, %v1190_v48, 0.0  ;;  %v1033_v48 = vmul.f32 %v4656_v2, %v964_v20 }
 0x1c1   : > { %v1254_v19 = vmul.f32 %v4877_v38, %v4877_v38 }
 0x1c3   : > { %v1118_v1 = vpop.xlane.xlu2 %1117  ;;  %v1086_v34 = vpop.xlane.xlu1 %1085 }
 0x1c4   : > { %v1159_v60 = vmul.f32 0.015625, %v1118_v1  ;;  %v4898_v1 = vsel %vm1000_vm12, %v964_v20, %v1033_v48  ;;  %v1084_v20 = vpop.xlane.xlu0 %1083 }
 0x1c5   : > { %v1142_v12 = vmul.f32 0.015625, %v1084_v20 }
 0x1c6   : > { %v1191_v56 = vsub.f32 %v4725_v18, %v1159_v60  ;;  %1307 = vadd.xlane.f32.xlu1 %v1254_v19  ;;  %v927_v19 = vadd.f32 %v4654_v44, %v4761_v42 }
 0x1c7   : > { %v1174_v46 = vsub.f32 %v4715_v50, %v1142_v12  ;;  %v919_v12 = vadd.f32 %v4654_v44, %v4753_v57  ;;  %v924_v57 = vadd.f32 %v4654_v44, %v4757_v21 }
 0x1c8   : > { %v4884_v53 = vsel %vm1070_vm4, %v1191_v56, 0.0  ;;  %vm985_vm13 = vcmp.ge.f32.partialorder %v927_v19, 0.0 }
 0x1c9   : > { %v1255_v13 = vmul.f32 %v4884_v53, %v4884_v53  ;;  %vm982_vm14 = vcmp.ge.f32.partialorder %v919_v12, 0.0  ;;  %v1017_v27 = vmul.f32 %v4656_v2, %v924_v57  ;;  %vm984_vm15 = vcmp.ge.f32.partialorder %v924_v57, 0.0 }
 0x1cb   : > { %v1088_v18 = vpop.xlane.xlu2 %1087 }
 0x1cc   : > { %v1144_v39 = vmul.f32 0.015625, %v1088_v18 }
 0x1ce   : > { %1309 = vadd.xlane.f32.xlu1 %v1255_v13  ;;  %v1176_v0 = vsub.f32 %v4732_v11, %v1144_v39  ;;  %v1018_v11 = vmul.f32 %v4656_v2, %v927_v19  ;;  %v1090_v39 = vpop.xlane.xlu0 %1089 }
 0x1d0   : > { %v4903_v60 = vsel %vm1070_vm4, %v1176_v0, 0.0  ;;  %v4911_v45 = vsel %vm985_vm13, %v927_v19, %v1018_v11 }
 0x1d1   : > { %v1240_v4 = vmul.f32 %v4903_v60, %v4903_v60 }
 0x1d3   : > { %v1120_v48 = vpop.xlane.xlu2 %1119 }
 0x1d6   : > { %1097 = vadd.xlane.f32.xlu1 %v4893_v15  ;;  %v1092_v56 = vpop.xlane.xlu1 %1091  ;;  %v1122_v0 = vpop.xlane.xlu0 %1121 }
 0x1d7   : > { %v1146_v13 = vmul.f32 0.015625, %v1092_v56 }
 0x1d9   : > { %v1178_v40 = vsub.f32 %v4747_v14, %v1146_v13 }
 0x1db   : > { %v4916_v18 = vsel %vm1070_vm4, %v1178_v40, 0.0 }
 0x1dc   : > { %7699 = vst [vmem:[#allocation36_spill] sm:$0xff] %v4916_v18  ;;  %v1242_v42 = vmul.f32 %v4916_v18, %v4916_v18 }
 0x1de   : > { %1131 = vadd.xlane.f32.xlu1 %v4898_v1 }
 0x1e6   : > { %1279 = vadd.xlane.f32.xlu1 %v1240_v4 }
 0x1ee   : > { %1101 = vadd.xlane.f32.xlu1 %v4911_v45 }
 0x1f6   : > { %1283 = vadd.xlane.f32.xlu1 %v1242_v42 }
 0x206   : > { %v1104_v4 = vpop.xlane.xlu2 %1103 }
 0x207   : > { %v1152_v56 = vmul.f32 0.015625, %v1104_v4 }
 0x209   : > { %v1184_v14 = vsub.f32 %v4771_v41, %v1152_v56  ;;  %v1143_v41 = vmul.f32 0.015625, %v1086_v34 }
 0x20b   : > { %v1136_v19 = vpop.xlane.xlu0 %1135  ;;  %v4923_v13 = vsel %vm1070_vm4, %v1184_v14, 0.0  ;;  %v1175_v34 = vsub.f32 %v4723_v31, %v1143_v41 }
 0x20c   : > { %v1168_v11 = vmul.f32 0.015625, %v1136_v19  ;;  %v1248_v40 = vmul.f32 %v4923_v13, %v4923_v13  ;;  %v4937_v19 = vsel %vm1070_vm4, %v1174_v46, 0.0  ;;  %v1015_v46 = vmul.f32 %v4656_v2, %v919_v12 }
 0x20e   : > { %v1200_v42 = vsub.f32 %v4782_v22, %v1168_v11  ;;  %v1266_v43 = vpop.xlane.xlu2 %1265  ;;  %1295 = vadd.xlane.f32.xlu2 %v1248_v40  ;;  %v1160_v11 = vmul.f32 0.015625, %v1120_v48  ;;  %v4955_v47 = vsel %vm982_vm14, %v919_v12, %v1015_v46 }
 0x20f   : > { %v1329_v25 = vmul.f32 0.015625, %v1266_v43 }
 0x210   : > { %v4931_v20 = vsel %vm1070_vm4, %v1200_v42, 0.0  ;;  %v1161_v42 = vmul.f32 0.015625, %v1122_v0  ;;  %v1192_v31 = vsub.f32 %v4743_v35, %v1160_v11  ;;  %v967_v35 = vadd.f32 %v4654_v44, %v4763_v62 }
 0x211   : > { %v1361_v4 = vadd.f32 1e-05, %v1329_v25  ;;  %v1268_v56 = vpop.xlane.xlu1 %1267  ;;  %v1264_v14 = vmul.f32 %v4931_v20, %v4931_v20  ;;  %v1238_v25 = vmul.f32 %v4937_v19, %v4937_v19  ;;  %v1145_v11 = vmul.f32 0.015625, %v1090_v39 }
 0x212   : > { %v1330_v50 = vmul.f32 0.015625, %v1268_v56  ;;  %v1193_v0 = vsub.f32 %v4749_v30, %v1161_v42  ;;  %v4972_v30 = vsel %vm1070_vm4, %v1192_v31, 0.0  ;;  %v4978_v62 = vsel %vm984_vm15, %v924_v57, %v1017_v27 }
 0x213   : > { %4113 = vrsqrt.f32 %v1361_v4  ;;  %1327 = vadd.xlane.f32.xlu0 %v1264_v14  ;;  %v1124_v43 = vpop.xlane.xlu0 %1123  ;;  %vm1001_vm1 = vcmp.ge.f32.partialorder %v967_v35, 0.0  ;;  %v1177_v31 = vsub.f32 %v4736_v28, %v1145_v11  ;;  %vm1399_vm2 = vweird.f32 %v1361_v4 }
 0x214   : > { %v4941_v22 = vadd.f32 1e-05, %v1330_v50  ;;  %v4952_v50 = vsel %vm1070_vm4, %v1175_v34, 0.0  ;;  %v4976_v44 = vsel %vm1070_vm4, %v1193_v0, 0.0  ;;  %v4987_v0 = vld [vmem:[%s7545_s7] ss:$0 sm:$0xff] }
 0x215   : > { %v1239_v34 = vmul.f32 %v4952_v50, %v4952_v50  ;;  %v1162_v57 = vmul.f32 0.015625, %v1124_v43 }
 0x216   : > { %4115 = vrsqrt.f32 %v4941_v22  ;;  %v1126_v40 = vpop.xlane.xlu2 %1125  ;;  %1275 = vadd.xlane.f32.xlu2 %v1238_v25  ;;  %vm1409_vm6 = vweird.f32 %v4941_v22 }
 0x217   : > { %v1163_v7 = vmul.f32 0.015625, %v1126_v40  ;;  %v7700_v40 = vlaneseq }
 0x219   : > { %v4114_v56 = vpop.eup %4113  ;;  %v1300_v14 = vpop.xlane.xlu1 %1299 }
 0x21a   : > { %v1394_v48 = vmul.f32 %v4114_v56, %v1361_v4  ;;  %v1346_v41 = vmul.f32 0.015625, %v1300_v14  ;;  %vm1400_vm0 = vweird.f32 %v4114_v56 }
 0x21b   : > { %1095 = vadd.xlane.f32.xlu0 %v4955_v47  ;;  %v1094_v25 = vpop.xlane.xlu0 %1093  ;;  %vm1401_vm3 = vmor %vm1399_vm2, %vm1400_vm0 }
 0x21c   : > { %v4116_v21 = vpop.eup %4115  ;;  %v1395_v26 = vmul.f32 %v4114_v56, %v1394_v48  ;;  %v4960_v8 = vadd.f32 1e-05, %v1346_v41  ;;  %v1256_v41 = vmul.f32 %v4972_v30, %v4972_v30  ;;  %v1147_v55 = vmul.f32 0.015625, %v1094_v25 }
 0x21d   : > { %v1404_v12 = vmul.f32 %v4116_v21, %v4941_v22  ;;  %vm1410_vm5 = vweird.f32 %v4116_v21 }
 0x21e   : > { %v1396_v46 = vmul.f32 0.5, %v1395_v26  ;;  %4117 = vrsqrt.f32 %v4960_v8  ;;  %v4968_v14 = vpop.xlane.xlu2 %1127  ;;  %1277 = vadd.xlane.f32.xlu2 %v1239_v34  ;;  %v1034_v34 = vmul.f32 %v4656_v2, %v967_v35  ;;  %vm1411_vm7 = vmor %vm1409_vm6, %vm1410_vm5  ;;  %vm1569_vm9 = vweird.f32 %v4960_v8 }
 0x21f   : > { %v1405_v42 = vmul.f32 %v4116_v21, %v1404_v12 }
 0x220   : > { %v1397_v48 = vsub.f32 1.5, %v1396_v46 }
 0x221   : > { %v1406_v39 = vmul.f32 0.5, %v1405_v42  ;;  %v1270_v26 = vpop.xlane.xlu1 %1269  ;;  %v1257_v42 = vmul.f32 %v4976_v44, %v4976_v44 }
 0x222   : > { %v1398_v24 = vmul.f32 %v4114_v56, %v1397_v48  ;;  %v1331_v12 = vmul.f32 0.015625, %v1270_v26 }
 0x223   : > { %v1407_v27 = vsub.f32 1.5, %v1406_v39  ;;  %1311 = vadd.xlane.f32.xlu0 %v1256_v41  ;;  %v1130_v46 = vpop.xlane.xlu0 %1129  ;;  %v5002_v39 = vld [vmem:[%s7546_s8] ss:$0 sm:$0xff] }
 0x224   : > { %v4991_v2 = vpop.eup %4117  ;;  %v1402_v28 = vsel %vm1401_vm3, %v4114_v56, %v1398_v24  ;;  %v4994_v4 = vadd.f32 1e-05, %v1331_v12  ;;  %v1165_v11 = vmul.f32 0.015625, %v1130_v46  ;;  %v5012_v56 = vshrl.u32 %v7700_v40, 7 }
 0x225   : > { %v1713_v48 = vmul.f32 %v1402_v28, %v4779_v32  ;;  %v1408_v26 = vmul.f32 %v4116_v21, %v1407_v27  ;;  %v1564_v43 = vmul.f32 %v4991_v2, %v4960_v8  ;;  %v5009_v32 = vsel %vm1070_vm4, %v1177_v31, 0.0  ;;  %v2618_v31 = vld [vmem:[%s7547_s9] sm:$0x7] }
 0x226   : > { %4119 = vrsqrt.f32 %v4994_v4  ;;  %v1197_v24 = vsub.f32 %v4832_v16, %v1165_v11  ;;  %1313 = vadd.xlane.f32.xlu2 %v1257_v42  ;;  %v1304_v22 = vpop.xlane.xlu2 %1303  ;;  %v1194_v27 = vsub.f32 %v4798_v10, %v1162_v57  ;;  %v5018_v16 = vsel %vm1001_vm1, %v967_v35, %v1034_v34 }
 0x227   : > { %v1748_v41 = vmul.f32 %v4987_v0, %v1713_v48  ;;  %v1412_v12 = vsel %vm1411_vm7, %v4116_v21, %v1408_v26  ;;  %v1348_v46 = vmul.f32 0.015625, %v1304_v22  ;;  %v1195_v11 = vsub.f32 %v4803_v9, %v1163_v7 }
 0x228   : > { %v1714_v28 = vmul.f32 %v1412_v12, %v4791_v17  ;;  %v5022_v42 = vsel %vm1070_vm4, %v1197_v24, 0.0  ;;  %v1565_v21 = vmul.f32 %v4991_v2, %v1564_v43  ;;  %v1241_v48 = vmul.f32 %v5009_v32, %v5009_v32 }
 0x229   : > { %7701 = vst [vmem:[#allocation37_spill] sm:$0xff] %v5022_v42  ;;  %v5029_v10 = vadd.f32 1e-05, %v1348_v46  ;;  %v1302_v57 = vpop.xlane.xlu1 %1301  ;;  %v1261_v17 = vmul.f32 %v5022_v42, %v5022_v42  ;;  %v5034_v25 = vadd.f32 %v5002_v39, %v1748_v41  ;;  %v5043_v9 = vsel %vm1070_vm4, %v1194_v27, 0.0 }
 0x22a   : > { %v1749_v35 = vmul.f32 %v4987_v0, %v1714_v28  ;;  %v1347_v34 = vmul.f32 0.015625, %v1302_v57  ;;  %vm2328_vm8 = vcmp.lt.s32.totalorder %v5012_v56, 1  ;;  %v5046_v26 = vperm.slane %v2618_v31, 1 }
 0x22b   : > { %4121 = vrsqrt.f32 %v5029_v10  ;;  %1133 = vadd.xlane.f32.xlu0 %v5018_v16  ;;  %1321 = vadd.xlane.f32.xlu1 %v1261_v17  ;;  %v1298_v7 = vpop.xlane.xlu0 %1297  ;;  %v1179_v22 = vsub.f32 %v4816_v61, %v1147_v55  ;;  %v1566_v12 = vmul.f32 0.5, %v1565_v21  ;;  %v5055_v46 = vmul.f32 0.015625, %v4968_v14 }
 0x22c   : > { %v4120_v43 = vpop.eup %4119  ;;  %v5049_v24 = vadd.f32 %v5002_v39, %v1749_v35  ;;  %v5052_v40 = vadd.f32 1e-05, %v1347_v34  ;;  %v1345_v41 = vmul.f32 0.015625, %v1298_v7  ;;  %v5060_v28 = vsel %vm1070_vm4, %v1195_v11, 0.0 }
 0x22d   : > { %v1414_v27 = vmul.f32 %v4120_v43, %v4994_v4  ;;  %v7619_v21 = vrot.slane %v5034_v25, 7  ;;  %v5068_v35 = vperm.slane %v2618_v31, 0  ;;  %v5070_v34 = vperm.slane %v2618_v31, 2 }
 0x22e   : > { %4123 = vrsqrt.f32 %v5052_v40  ;;  %v5063_v57 = vadd.f32 1e-05, %v1345_v41  ;;  %1099 = vadd.xlane.f32.xlu2 %v4978_v62  ;;  %v1274_v55 = vpop.xlane.xlu2 %1273  ;;  %v7620_v61 = vrot.slane %v5049_v24, 7  ;;  %v1258_v11 = vmul.f32 %v5043_v9, %v5043_v9 }
 0x22f   : > { %v1415_v17 = vmul.f32 %v4120_v43, %v1414_v27  ;;  %v1333_v14 = vmul.f32 0.015625, %v1274_v55  ;;  %v5077_v7 = vsel %vm1070_vm4, %v1179_v22, 0.0  ;;  %v1259_v52 = vmul.f32 %v5060_v28, %v5060_v28 }
 0x230   : > { %4125 = vrsqrt.f32 %v5063_v57  ;;  %7702 = vst [vmem:[#allocation38_spill] sm:$0xff] %v5077_v7  ;;  %v2359_v41 = vsel %vm2328_vm8, %v7619_v21, %v7620_v61  ;;  %v1567_v22 = vsub.f32 1.5, %v1566_v12  ;;  %v1196_v6 = vsub.f32 %v4823_v37, %v5055_v46 }
 0x231   : > { %v5085_v27 = vpop.eup %4121  ;;  %v1416_v31 = vmul.f32 0.5, %v1415_v17  ;;  %v5088_v55 = vadd.f32 1e-05, %v1333_v14  ;;  %v1306_v5 = vpop.xlane.xlu1 %1305  ;;  %vm1420_vm10 = vweird.f32 %v4120_v43  ;;  %v1243_v14 = vmul.f32 %v5077_v7, %v5077_v7 }
 0x232   : > { %v1584_v54 = vmul.f32 %v5085_v27, %v5029_v10  ;;  %v1349_v49 = vmul.f32 0.015625, %v1306_v5  ;;  %vm1570_vm11 = vweird.f32 %v4991_v2  ;;  %vm1419_vm12 = vweird.f32 %v4994_v4 }
 0x233   : > { %v1417_v21 = vsub.f32 1.5, %v1416_v31  ;;  %4127 = vrsqrt.f32 %v5088_v55  ;;  %1281 = vadd.xlane.f32.xlu0 %v1241_v48  ;;  %v1272_v17 = vpop.xlane.xlu0 %1271  ;;  %v2621_v48 = vmul.f32 %v5068_v35, %v2359_v41  ;;  %v1568_v7 = vmul.f32 %v4991_v2, %v1567_v22  ;;  %vm1421_vm13 = vmor %vm1419_vm12, %vm1420_vm10 }
 0x234   : > { %v5099_v61 = vpop.eup %4123  ;;  %v1585_v12 = vmul.f32 %v5085_v27, %v1584_v54  ;;  %v5103_v37 = vadd.f32 1e-05, %v1349_v49  ;;  %v1332_v46 = vmul.f32 0.015625, %v1272_v17  ;;  %v2654_v41 = vmul.f32 %v5046_v26, %v5049_v24  ;;  %vm5130_vm15 = vmor %vm1569_vm9, %vm1570_vm11 }
 0x235   : > { %v1418_v42 = vmul.f32 %v4120_v43, %v1417_v21  ;;  %v1574_v5 = vmul.f32 %v5099_v61, %v5052_v40  ;;  %vm1590_vm14 = vweird.f32 %v5085_v27  ;;  %vm1589_vm0 = vweird.f32 %v5029_v10 }
 0x236   : > { %v5109_v31 = vpop.eup %4125  ;;  %v1586_v18 = vmul.f32 0.5, %v1585_v12  ;;  %4129 = vrsqrt.f32 %v5103_v37  ;;  %v5114_v49 = vadd.f32 1e-05, %v1332_v46  ;;  %1315 = vadd.xlane.f32.xlu2 %v1258_v11  ;;  %vm5148_vm1 = vmor %vm1589_vm0, %vm1590_vm14  ;;  %vm1580_vm2 = vweird.f32 %v5099_v61 }
 0x237   : > { %v1422_v54 = vsel %vm1421_vm13, %v4120_v43, %v1418_v42  ;;  %v1575_v4 = vmul.f32 %v5099_v61, %v1574_v5  ;;  %v1554_v21 = vmul.f32 %v5109_v31, %v5063_v57  ;;  %v1572_v5 = vsel %vm5130_vm15, %v4991_v2, %v1568_v7 }
 0x238   : > { %v1715_v17 = vmul.f32 %v1422_v54, %v4821_v33  ;;  %v1587_v22 = vsub.f32 1.5, %v1586_v18  ;;  %4131 = vrsqrt.f32 %v5114_v49  ;;  %v5137_v33 = vsel %vm1070_vm4, %v1196_v6, 0.0 }
 0x239   : > { %v5124_v12 = vpop.eup %4127  ;;  %v1576_v43 = vmul.f32 0.5, %v1575_v4  ;;  %v1555_v11 = vmul.f32 %v5109_v31, %v1554_v21  ;;  %v1308_v46 = vpop.xlane.xlu1 %1307  ;;  %7705 = vst [vmem:[#allocation39_spill] sm:$0xff] %v5137_v33  ;;  %v5139_v18 = vadd.f32 %v2654_v41, %v2621_v48  ;;  %vm1579_vm3 = vweird.f32 %v5052_v40 }
 0x23a   : > { %v1588_v8 = vmul.f32 %v5085_v27, %v1587_v22  ;;  %v1434_v54 = vmul.f32 %v5124_v12, %v5088_v55  ;;  %v1350_v48 = vmul.f32 0.015625, %v1308_v46  ;;  %v1750_v2 = vmul.f32 %v4987_v0, %v1715_v17  ;;  %vm1581_vm5 = vmor %vm1579_vm3, %vm1580_vm2 }
 0x23b   : > { %v1577_v21 = vsub.f32 1.5, %v1576_v43  ;;  %v1556_v6 = vmul.f32 0.5, %v1555_v11  ;;  %1317 = vadd.xlane.f32.xlu0 %v1259_v52  ;;  %v1260_v7 = vmul.f32 %v5137_v33, %v5137_v33  ;;  %v1730_v17 = vmul.f32 %v1572_v5, %v4808_v58 }
 0x23c   : > { %v4130_v41 = vpop.eup %4129  ;;  %v1592_v10 = vsel %vm5148_vm1, %v5085_v27, %v1588_v8  ;;  %v1435_v43 = vmul.f32 %v5124_v12, %v1434_v54  ;;  %vm1559_vm6 = vweird.f32 %v5063_v57  ;;  %v5169_v40 = vadd.f32 1e-05, %v1350_v48 }
 0x23d   : > { %v1578_v22 = vmul.f32 %v5099_v61, %v1577_v21  ;;  %v1557_v42 = vsub.f32 1.5, %v1556_v6  ;;  %v1594_v11 = vmul.f32 %v4130_v41, %v5103_v37  ;;  %v1835_v27 = vadd.s32 152, %v5012_v56 }
 0x23e   : > { %v5163_v52 = vpop.eup %4131  ;;  %1285 = vadd.xlane.f32.xlu2 %v1243_v14  ;;  %v1732_v46 = vmul.f32 %v1592_v10, %v4837_v3  ;;  %vm1560_vm7 = vweird.f32 %v5109_v31  ;;  %v5176_v4 = vadd.f32 %v5002_v39, %v1750_v2  ;;  %v1436_v14 = vmul.f32 0.5, %v1435_v43 }
 0x23f   : > { %v1582_v8 = vsel %vm1581_vm5, %v5099_v61, %v1578_v22  ;;  %v1595_v54 = vmul.f32 %v4130_v41, %v1594_v11  ;;  %v1558_v5 = vmul.f32 %v5109_v31, %v1557_v42  ;;  %v1424_v21 = vmul.f32 %v5163_v52, %v5114_v49  ;;  %vm5193_vm10 = vmor %vm1559_vm6, %vm1560_vm7 }
 0x240   : > { %v1731_v58 = vmul.f32 %v1582_v8, %v4843_v51  ;;  %4133 = vrsqrt.f32 %v5169_v40  ;;  %v7624_v61 = vrot.slane %v5049_v24, 1  ;;  %v1765_v48 = vmul.f32 %v4987_v0, %v1730_v17 }
 0x241   : > { %v1596_v6 = vmul.f32 0.5, %v1595_v54  ;;  %v1310_v3 = vpop.xlane.xlu1 %1309  ;;  %vm1599_vm9 = vweird.f32 %v5103_v37  ;;  %v1425_v51 = vmul.f32 %v5163_v52, %v1424_v21  ;;  %v1767_v2 = vmul.f32 %v4987_v0, %v1732_v46 }
 0x242   : > { %v1766_v10 = vmul.f32 %v4987_v0, %v1731_v58  ;;  %vm1600_vm11 = vweird.f32 %v4130_v41  ;;  %v1351_v43 = vmul.f32 0.015625, %v1310_v3  ;;  %v1562_v11 = vsel %vm5193_vm10, %v5109_v31, %v1558_v5 }
 0x243   : > { %v1597_v42 = vsub.f32 1.5, %v1596_v6  ;;  %1319 = vadd.xlane.f32.xlu0 %v1260_v7  ;;  %v1426_v17 = vmul.f32 0.5, %v1425_v51  ;;  %v7625_v8 = vrot.slane %v5176_v4, 7  ;;  %vm2489_vm12 = vcmp.lt.s32.totalorder %v5012_v56, 7  ;;  %vm1601_vm13 = vmor %vm1599_vm9, %vm1600_vm11 }
 0x244   : > { %v1985_v46 = vand.u32 31, %v1835_v27  ;;  %v5203_v57 = vadd.f32 %v5002_v39, %v1766_v10  ;;  %v1437_v54 = vsub.f32 1.5, %v1436_v14  ;;  %v5205_v21 = vadd.f32 1e-05, %v1351_v43 }
 0x245   : > { %v1598_v58 = vmul.f32 %v4130_v41, %v1597_v42  ;;  %v5208_v6 = vadd.f32 %v5002_v39, %v1765_v48  ;;  %v1427_v31 = vsub.f32 1.5, %v1426_v17  ;;  %vm1429_vm14 = vweird.f32 %v5114_v49 }
 0x246   : > { %vm1430_vm15 = vweird.f32 %v5163_v52  ;;  %v4134_v7 = vpop.eup %4133  ;;  %v5215_v27 = vadd.f32 %v5002_v39, %v1767_v2  ;;  %v1729_v5 = vmul.f32 %v1562_v11, %v4847_v29  ;;  %4135 = vrsqrt.f32 %v5205_v21 }
 0x247   : > { %v1602_v14 = vsel %vm1601_vm13, %v4130_v41, %v1598_v58  ;;  %v1428_v48 = vmul.f32 %v5163_v52, %v1427_v31  ;;  %v1604_v37 = vmul.f32 %v4134_v7, %v5169_v40  ;;  %v7710_v49 = vrot.slane %v5049_v24, 7  ;;  %vm1431_vm0 = vmor %vm1429_vm14, %vm1430_vm15 }
 0x248   : > { %v1733_v3 = vmul.f32 %v1602_v14, %v4864_v59  ;;  %v5229_v51 = vmul.f32 %v5124_v12, %v1437_v54  ;;  %v2459_v41 = vrot.slane %v5176_v4, 1  ;;  %vm5232_vm1 = vcmp.eq.s32.totalorder %v1985_v46, 31 }
 0x249   : > { %v2358_v10 = vsel %vm2328_vm8, %v7710_v49, %v7625_v8  ;;  %v1098_v29 = vpop.xlane.xlu1 %1097  ;;  %v2314_v2 = vrot.slane %v5203_v57, 7  ;;  %v1432_v42 = vsel %vm1431_vm0, %v5163_v52, %v1428_v48  ;;  %v1605_v43 = vmul.f32 %v4134_v7, %v1604_v37 }
 0x24a   : > { %v1768_v22 = vmul.f32 %v4987_v0, %v1733_v3  ;;  %v1149_v11 = vmul.f32 0.015625, %v1098_v29  ;;  %v1764_v17 = vmul.f32 %v4987_v0, %v1729_v5  ;;  %vm1440_vm2 = vweird.f32 %v5124_v12 }
 0x24b   : > { %v1716_v54 = vmul.f32 %v1432_v42, %v4868_v23  ;;  %vm1609_vm3 = vweird.f32 %v5169_v40  ;;  %v2622_v46 = vmul.f32 %v5068_v35, %v2358_v10  ;;  %v1606_v31 = vmul.f32 0.5, %v1605_v43 }
 0x24c   : > { %v5245_v58 = vadd.f32 %v5002_v39, %v1768_v22  ;;  %v1181_v14 = vsub.f32 %v4893_v15, %v1149_v11  ;;  %v7626_v52 = vrot.slane %v5215_v27, 7  ;;  %v4136_v3 = vpop.eup %4135  ;;  %vm1439_vm5 = vweird.f32 %v5088_v55 }
 0x24d   : > { %v1751_v5 = vmul.f32 %v4987_v0, %v1716_v54  ;;  %vm1610_vm6 = vweird.f32 %v4134_v7  ;;  %v2655_v23 = vmul.f32 %v5046_v26, %v5176_v4  ;;  %v2519_v48 = vsel %vm2489_vm12, %v7624_v61, %v2459_v41  ;;  %vm5308_vm11 = vmor %vm1439_vm5, %vm1440_vm2 }
 0x24e   : > { %v1607_v37 = vsub.f32 1.5, %v1606_v31  ;;  %v1614_v49 = vmul.f32 %v4136_v3, %v5205_v21  ;;  %v5260_v15 = vsel %vm1070_vm4, %v1181_v14, 0.0  ;;  %v2341_v10 = vsel %vm2328_vm8, %v2314_v2, %v7626_v52  ;;  %vm1611_vm9 = vmor %vm1609_vm3, %vm1610_vm6 }
 0x24f   : > { %7713 = vst [vmem:[#allocation40_spill] sm:$0xff] %v5260_v15  ;;  %v5267_v29 = vadd.f32 %v5002_v39, %v1751_v5  ;;  %v1245_v22 = vmul.f32 %v5260_v15, %v5260_v15  ;;  %v2476_v42 = vrot.slane %v5215_v27, 1  ;;  %v2477_v43 = vrot.slane %v5245_v58, 1 }
 0x250   : > { %v1608_v11 = vmul.f32 %v4134_v7, %v1607_v37  ;;  %v1615_v54 = vmul.f32 %v4136_v3, %v1614_v49  ;;  %vm1619_vm7 = vweird.f32 %v5205_v21  ;;  %v2719_v31 = vmul.f32 %v5070_v34, %v2519_v48 }
 0x251   : > { %v1132_v14 = vpop.xlane.xlu1 %1131  ;;  %1289 = vadd.xlane.f32.xlu2 %v1245_v22  ;;  %v2460_v5 = vrot.slane %v5267_v29, 1  ;;  %v2687_v61 = vadd.f32 %v2655_v23, %v2622_v46  ;;  %v2501_v8 = vsel %vm2489_vm12, %v2476_v42, %v2477_v43  ;;  %v2639_v37 = vmul.f32 %v5068_v35, %v2341_v10 }
 0x252   : > { %v1612_v49 = vsel %vm1611_vm9, %v4134_v7, %v1608_v11  ;;  %v1616_v52 = vmul.f32 0.5, %v1615_v54  ;;  %v1166_v15 = vmul.f32 0.015625, %v1132_v14  ;;  %v2605_v40 = vsel %vm5232_vm1, 0.0, %v2501_v8 }
 0x253   : > { %v1734_v48 = vmul.f32 %v1612_v49, %v4877_v38  ;;  %vm1620_vm10 = vweird.f32 %v4136_v3  ;;  %v2518_v46 = vsel %vm2489_vm12, %v2459_v41, %v2460_v5  ;;  %v5294_v23 = vadd.f32 %v2719_v31, %v5139_v18 }
 0x254   : > { %v1617_v10 = vsub.f32 1.5, %v1616_v52  ;;  %v1198_v7 = vsub.f32 %v4898_v1, %v1166_v15  ;;  %v2720_v22 = vmul.f32 %v5070_v34, %v2518_v46  ;;  %v2313_v11 = vrot.slane %v5208_v6, 7  ;;  %v5319_v15 = vld [vmem:[%s7548_s10] ss:$0 sm:$0xff]  ;;  %vm1621_vm13 = vmor %vm1619_vm7, %vm1620_vm10 }
 0x255   : > { %v1769_v8 = vmul.f32 %v4987_v0, %v1734_v48  ;;  %v2672_v38 = vmul.f32 %v5046_v26, %v5215_v27  ;;  %v2737_v59 = vmul.f32 %v5070_v34, %v2605_v40  ;;  %v2475_v54 = vrot.slane %v5203_v57, 1 }
 0x256   : > { %v1618_v1 = vmul.f32 %v4136_v3, %v1617_v10  ;;  %v5314_v41 = vsel %vm1070_vm4, %v1198_v7, 0.0  ;;  %v2752_v52 = vadd.f32 %v2720_v22, %v2687_v61  ;;  %v2342_v31 = vsel %vm2328_vm8, %v2313_v11, %v2314_v2 }
 0x257   : > { %7716 = vst [vmem:[#allocation41_spill] sm:$0xff] %v5314_v41  ;;  %v5324_v55 = vadd.f32 %v5002_v39, %v1764_v17  ;;  %v1442_v14 = vsel %vm5308_vm11, %v5124_v12, %v5229_v51  ;;  %v1262_v61 = vmul.f32 %v5314_v41, %v5314_v41  ;;  %v2704_v49 = vadd.f32 %v2672_v38, %v2639_v37 }
 0x258   : > { %v5336_v40 = vadd.f32 %v5002_v39, %v1769_v8  ;;  %v1622_v2 = vsel %vm1621_vm13, %v4136_v3, %v1618_v1  ;;  %v2788_v17 = vadd.f32 %v5319_v15, %v2752_v52  ;;  %v2502_v48 = vsel %vm2489_vm12, %v2475_v54, %v2476_v42 }
 0x259   : > { %7717 = vst [vmem:[#allocation42_spill] sm:$0xff] %v5324_v55  ;;  %v1735_v46 = vmul.f32 %v1622_v2, %v4884_v53  ;;  %1323 = vadd.xlane.f32.xlu2 %v1262_v61  ;;  %v2638_v12 = vmul.f32 %v5068_v35, %v2342_v31  ;;  %v5344_v21 = vstv %s5284_s28  ;;  %v2769_v51 = vadd.f32 %v2737_v59, %v2704_v49 }
 0x25a   : > { %v2474_v10 = vrot.slane %v5208_v6, 1  ;;  %v1717_v37 = vmul.f32 %v1442_v14, %v4858_v63  ;;  %v7633_v3 = vrot.slane %v5324_v55, 7  ;;  %v2671_v22 = vmul.f32 %v5046_v26, %v5203_v57 }
 0x25b   : > { %v1770_v7 = vmul.f32 %v4987_v0, %v1735_v46  ;;  %vm2820_vm14 = vcmp.ge.f32.partialorder %v2788_v17, 0.0  ;;  %v2853_v53 = vmul.f32 %v5344_v21, %v2788_v17  ;;  %v2316_v42 = vrot.slane %v5245_v58, 7 }
 0x25c   : > { %v2317_v8 = vrot.slane %v5336_v40, 7  ;;  %v2703_v59 = vadd.f32 %v2671_v22, %v2638_v12  ;;  %v2736_v63 = vmul.f32 %v5070_v34, %v2502_v48  ;;  %v2478_v18 = vrot.slane %v5336_v40, 1 }
 0x25d   : > { %v5356_v38 = vadd.f32 %v5002_v39, %v1770_v7  ;;  %v2805_v1 = vadd.f32 %v5319_v15, %v2769_v51  ;;  %v2674_v52 = vmul.f32 %v5046_v26, %v5336_v40  ;;  %v1836_v31 = vadd.s32 160, %v5012_v56 }
 0x25e   : > { %v2339_v57 = vsel %vm2328_vm8, %v2316_v42, %v2317_v8  ;;  %v5366_v14 = vadd.f32 %v2736_v63, %v2703_v59  ;;  %v7718_v2 = vrot.slane %v5215_v27, 7  ;;  %v5375_v46 = vsel %vm2820_vm14, %v2788_v17, %v2853_v53 }
 0x25f   : > { %v7629_v61 = vrot.slane %v5356_v38, 1  ;;  %v2641_v49 = vmul.f32 %v5068_v35, %v2339_v57  ;;  %7719 = vst [vmem:[#allocation43_spill] sm:$0xff] %v5375_v46  ;;  %v1992_v12 = vand.u32 31, %v1836_v31  ;;  %v2500_v40 = vsel %vm2489_vm12, %v2477_v43, %v2478_v18 }
 0x260   : > { %v2340_v48 = vsel %vm2328_vm8, %v7718_v2, %v2316_v42  ;;  %v2343_v51 = vsel %vm2328_vm8, %v7633_v3, %v2313_v11  ;;  %v1752_v7 = vmul.f32 %v4987_v0, %v1717_v37  ;;  %v2503_v43 = vsel %vm2489_vm12, %v2474_v10, %v2475_v54 }
 0x261   : > { %2921 = vadd.xlane.f32.xlu2 %v5375_v46  ;;  %v2499_v27 = vsel %vm2489_vm12, %v2478_v18, %v7629_v61  ;;  %v2706_v17 = vadd.f32 %v2674_v52, %v2641_v49  ;;  %vm2252_vm15 = vcmp.eq.s32.totalorder %v1992_v12, 0  ;;  %v2870_v11 = vmul.f32 %v5344_v21, %v2805_v1 }
 0x262   : > { %v2739_v22 = vmul.f32 %v5070_v34, %v2499_v27  ;;  %v2445_v53 = vsel %vm2252_vm15, 0.0, %v2340_v48  ;;  %v2673_v37 = vmul.f32 %v5046_v26, %v5245_v58  ;;  %v2637_v42 = vmul.f32 %v5068_v35, %v2343_v51 }
 0x263   : > { %v2640_v63 = vmul.f32 %v5068_v35, %v2445_v53  ;;  %v2738_v18 = vmul.f32 %v5070_v34, %v2500_v40  ;;  %v2670_v57 = vmul.f32 %v5046_v26, %v5208_v6  ;;  %v5407_v52 = vadd.f32 %v5002_v39, %v1752_v7 }
 0x264   : > { %v5400_v59 = vadd.f32 %v2739_v22, %v2706_v17  ;;  %vm2837_vm0 = vcmp.ge.f32.partialorder %v2805_v1, 0.0  ;;  %v2735_v49 = vmul.f32 %v5070_v34, %v2503_v43  ;;  %v1819_v58 = vadd.s32 24, %v5012_v56 }
 0x265   : > { %v2705_v54 = vadd.f32 %v2673_v37, %v2640_v63  ;;  %v2702_v31 = vadd.f32 %v2670_v57, %v2637_v42  ;;  %v5411_v2 = vsel %vm2837_vm0, %v2805_v1, %v2870_v11  ;;  %v7630_v51 = vrot.slane %v5267_v29, 7 }
 0x266   : > { %7720 = vst [vmem:[#allocation44_spill] sm:$0xff] %v5411_v2  ;;  %v1873_v40 = vand.u32 31, %v1819_v58  ;;  %v7628_v7 = vrot.slane %v5407_v52, 1  ;;  %v7721_v27 = vrot.slane %v5176_v4, 7  ;;  %v2656_v11 = vmul.f32 %v5046_v26, %v5267_v29 }
 0x267   : > { %v5413_v48 = vadd.f32 %v2738_v18, %v2705_v54  ;;  %v5415_v12 = vadd.f32 %v2735_v49, %v2702_v31  ;;  %v7632_v4 = vrot.slane %v5356_v38, 7  ;;  %v2675_v18 = vmul.f32 %v5046_v26, %v5356_v38  ;;  %v1280_v54 = vpop.xlane.xlu1 %1279 }
 0x268   : > { %vm2267_vm1 = vcmp.eq.s32.totalorder %v1873_v40, 31  ;;  %v2357_v1 = vsel %vm2328_vm8, %v7721_v27, %v7630_v51  ;;  %v2517_v17 = vsel %vm2489_vm12, %v2460_v5, %v7628_v7  ;;  %v1336_v31 = vmul.f32 0.015625, %v1280_v54 }
 0x269   : > { %2955 = vadd.xlane.f32.xlu2 %v5411_v2  ;;  %v2589_v22 = vsel %vm2267_vm1, 0.0, %v2517_v17  ;;  %v2623_v43 = vmul.f32 %v5068_v35, %v2357_v1  ;;  %v2338_v42 = vsel %vm2328_vm8, %v2317_v8, %v7632_v4  ;;  %v2787_v51 = vadd.f32 %v5319_v15, %v5294_v23 }
 0x26a   : > { %v2721_v53 = vmul.f32 %v5070_v34, %v2589_v22  ;;  %v2642_v5 = vmul.f32 %v5068_v35, %v2338_v42  ;;  %v5448_v27 = vadd.f32 1e-05, %v1336_v31  ;;  %v7631_v42 = vrot.slane %v5324_v55, 1 }
 0x26b   : > { %v2688_v37 = vadd.f32 %v2656_v11, %v2623_v43  ;;  %vm2819_vm6 = vcmp.ge.f32.partialorder %v2787_v51, 0.0 }
 0x26c   : > { %v5446_v57 = vadd.f32 %v2675_v18, %v2642_v5 }
 0x26d   : > { %v5441_v63 = vadd.f32 %v2721_v53, %v2688_v37 }
 0x26f   : > { %v1102_v11 = vpop.xlane.xlu1 %1101 }
 0x281   : > { %v1296_v49 = vpop.xlane.xlu2 %1295 }
 0x282   : > { %v1344_v58 = vmul.f32 0.015625, %v1296_v49  ;;  %v1151_v49 = vmul.f32 0.015625, %v1102_v11 }
 0x284   : > { %v1376_v40 = vadd.f32 1e-05, %v1344_v58 }
 0x286   : > { %4137 = vrsqrt.f32 %v1376_v40  ;;  %v1328_v1 = vpop.xlane.xlu0 %1327  ;;  %vm1549_vm3 = vweird.f32 %v1376_v40 }
 0x287   : > { %4139 = vrsqrt.f32 %v5448_v27  ;;  %v1360_v54 = vmul.f32 0.015625, %v1328_v1  ;;  %v2504_v1 = vsel %vm2489_vm12, %v7631_v42, %v2474_v10  ;;  %v2804_v10 = vadd.f32 %v5319_v15, %v5366_v14 }
 0x288   : > { %v5508_v3 = vmul.f32 %v5070_v34, %v2504_v1 }
 0x289   : > { %v1276_v8 = vpop.xlane.xlu2 %1275  ;;  %v5468_v11 = vadd.f32 1e-05, %v1360_v54  ;;  %vm2836_vm7 = vcmp.ge.f32.partialorder %v2804_v10, 0.0 }
 0x28a   : > { %v1334_v17 = vmul.f32 0.015625, %v1276_v8 }
 0x28c   : > { %v4138_v22 = vpop.eup %4137  ;;  %v5451_v43 = vadd.f32 1e-05, %v1334_v17 }
 0x28d   : > { %v1544_v53 = vmul.f32 %v4138_v22, %v1376_v40  ;;  %v5455_v5 = vpop.eup %4139  ;;  %vm1550_vm2 = vweird.f32 %v4138_v22 }
 0x28e   : > { %4141 = vrsqrt.f32 %v5451_v43  ;;  %v1096_v37 = vpop.xlane.xlu0 %1095  ;;  %v1464_v17 = vmul.f32 %v5455_v5, %v5448_v27  ;;  %vm1551_vm5 = vmor %vm1549_vm3, %vm1550_vm2  ;;  %vm1449_vm11 = vweird.f32 %v5451_v43  ;;  %vm1470_vm15 = vweird.f32 %v5455_v5 }
 0x28f   : > { %v1545_v18 = vmul.f32 %v4138_v22, %v1544_v53  ;;  %v1148_v31 = vmul.f32 0.015625, %v1096_v37  ;;  %vm1469_vm3 = vweird.f32 %v5448_v27 }
 0x291   : > { %v1546_v58 = vmul.f32 0.5, %v1545_v18  ;;  %v1180_v7 = vsub.f32 %v4955_v47, %v1148_v31  ;;  %v1278_v8 = vpop.xlane.xlu2 %1277  ;;  %v1183_v18 = vsub.f32 %v4911_v45, %v1151_v49 }
 0x292   : > { %v1335_v61 = vmul.f32 0.015625, %v1278_v8 }
 0x293   : > { %v1547_v53 = vsub.f32 1.5, %v1546_v58  ;;  %v5472_v47 = vsel %vm1070_vm4, %v1180_v7, 0.0  ;;  %v1832_v7 = vadd.s32 128, %v5012_v56  ;;  %v1465_v58 = vmul.f32 %v5455_v5, %v1464_v17 }
 0x294   : > { %7722 = vst [vmem:[#allocation45_spill] sm:$0xff] %v5472_v47  ;;  %v5474_v37 = vpop.eup %4141  ;;  %v5477_v23 = vadd.f32 1e-05, %v1335_v61  ;;  %v1244_v6 = vmul.f32 %v5472_v47, %v5472_v47  ;;  %v2852_v61 = vmul.f32 %v5344_v21, %v2787_v51  ;;  %v2869_v17 = vmul.f32 %v5344_v21, %v2804_v10 }
 0x295   : > { %v1548_v31 = vmul.f32 %v4138_v22, %v1547_v53  ;;  %v1444_v54 = vmul.f32 %v5474_v37, %v5451_v43  ;;  %v5494_v53 = vmul.f32 %v5046_v26, %v5324_v55  ;;  %v1466_v47 = vmul.f32 0.5, %v1465_v58 }
 0x296   : > { %4143 = vrsqrt.f32 %v5477_v23  ;;  %1287 = vadd.xlane.f32.xlu1 %v1244_v6  ;;  %v1312_v45 = vpop.xlane.xlu0 %1311  ;;  %v5525_v1 = vsel %vm2836_vm7, %v2804_v10, %v2869_v17  ;;  %vm1450_vm10 = vweird.f32 %v5474_v37  ;;  %vm1459_vm1 = vweird.f32 %v5477_v23 }
 0x297   : > { %v1552_v49 = vsel %vm1551_vm5, %v4138_v22, %v1548_v31  ;;  %4145 = vrsqrt.f32 %v5468_v11  ;;  %v1445_v14 = vmul.f32 %v5474_v37, %v1444_v54  ;;  %v1352_v40 = vmul.f32 0.015625, %v1312_v45  ;;  %v1284_v54 = vpop.xlane.xlu1 %1283  ;;  %vm5564_vm13 = vmor %vm1449_vm11, %vm1450_vm10 }
 0x298   : > { %v1728_v8 = vmul.f32 %v1552_v49, %v4923_v13  ;;  %v5501_v22 = vsel %vm1070_vm4, %v1183_v18, 0.0  ;;  %v1964_v31 = vand.u32 31, %v1832_v7  ;;  %v5505_v49 = vsel %vm2819_vm6, %v2787_v51, %v2852_v61 }
 0x299   : > { %v1446_v6 = vmul.f32 0.5, %v1445_v14  ;;  %v5497_v42 = vadd.f32 1e-05, %v1352_v40  ;;  %v1314_v4 = vpop.xlane.xlu2 %1313  ;;  %7723 = vst [vmem:[#allocation46_spill] sm:$0xff] %v5501_v22  ;;  %v5513_v40 = vadd.f32 %v5319_v15, %v5400_v59  ;;  %v1247_v51 = vmul.f32 %v5501_v22, %v5501_v22 }
 0x29a   : > { %v1763_v45 = vmul.f32 %v4987_v0, %v1728_v8  ;;  %v1353_v13 = vmul.f32 0.015625, %v1314_v4  ;;  %7724 = vst [vmem:[#allocation47_spill] sm:$0xff] %v5505_v49  ;;  %v1338_v61 = vmul.f32 0.015625, %v1284_v54  ;;  %vm5531_vm9 = vcmp.eq.s32.totalorder %v1964_v31, 0 }
 0x29b   : > { %v1447_v14 = vsub.f32 1.5, %v1446_v6  ;;  %4147 = vrsqrt.f32 %v5497_v42  ;;  %v5537_v6 = vadd.f32 %v5319_v15, %v5413_v48  ;;  %v1467_v54 = vsub.f32 1.5, %v1466_v47 }
 0x29c   : > { %v5515_v18 = vpop.eup %4143  ;;  %v5518_v7 = vadd.f32 %v5002_v39, %v1763_v45  ;;  %v5520_v4 = vadd.f32 1e-05, %v1353_v13  ;;  %v5546_v13 = vmul.f32 %v5344_v21, %v5513_v40  ;;  %v5560_v41 = vadd.f32 1e-05, %v1338_v61 }
 0x29d   : > { %v5527_v58 = vpop.eup %4145  ;;  %v1454_v59 = vmul.f32 %v5515_v18, %v5477_v23  ;;  %v1448_v45 = vmul.f32 %v5474_v37, %v1447_v14  ;;  %v5585_v8 = vmul.f32 %v5455_v5, %v1467_v54  ;;  %vm1460_vm14 = vweird.f32 %v5515_v18 }
 0x29e   : > { %7725 = vst [vmem:[#allocation48_spill] sm:$0xff] %v5518_v7  ;;  %4149 = vrsqrt.f32 %v5520_v4  ;;  %1293 = vadd.xlane.f32.xlu1 %v1247_v51  ;;  %v1134_v10 = vpop.xlane.xlu0 %1133  ;;  %v7639_v17 = vrot.slane %v5518_v7, 7  ;;  %v1704_v14 = vmul.f32 %v5527_v58, %v5468_v11  ;;  %v7728_v51 = vrot.slane %v5324_v55, 7  ;;  %vm1461_vm5 = vmor %vm1459_vm1, %vm1460_vm14 }
 0x29f   : > { %v1455_v31 = vmul.f32 %v5515_v18, %v1454_v59  ;;  %v1167_v22 = vmul.f32 0.015625, %v1134_v10  ;;  %v5572_v55 = vadd.f32 %v5319_v15, %v5415_v12  ;;  %v1452_v61 = vsel %vm5564_vm13, %v5474_v37, %v1448_v45 }
 0x2a0   : > { %v2344_v47 = vsel %vm2328_vm8, %v7639_v17, %v7728_v51  ;;  %v1705_v37 = vmul.f32 %v5527_v58, %v1704_v14  ;;  %vm2839_vm0 = vcmp.ge.f32.partialorder %v5513_v40, 0.0  ;;  %vm2838_vm2 = vcmp.ge.f32.partialorder %v5537_v6, 0.0 }
 0x2a1   : > { %v5558_v59 = vpop.eup %4147  ;;  %v1456_v33 = vmul.f32 0.5, %v1455_v31  ;;  %v1100_v43 = vpop.xlane.xlu2 %1099  ;;  %v2441_v10 = vsel %vm5531_vm9, 0.0, %v2344_v47  ;;  %v1199_v17 = vsub.f32 %v5018_v16, %v1167_v22  ;;  %v5582_v31 = vmul.f32 %v5344_v21, %v5537_v6 }
 0x2a2   : > { %v1624_v51 = vmul.f32 %v5558_v59, %v5497_v42  ;;  %v1150_v12 = vmul.f32 0.015625, %v1100_v43  ;;  %v2636_v22 = vmul.f32 %v5068_v35, %v2441_v10  ;;  %vm2835_vm6 = vcmp.ge.f32.partialorder %v5572_v55, 0.0 }
 0x2a3   : > { %v1457_v47 = vsub.f32 1.5, %v1456_v33  ;;  %v5595_v16 = vsel %vm1070_vm4, %v1199_v17, 0.0  ;;  %v1718_v33 = vmul.f32 %v1452_v61, %v4937_v19  ;;  %v2868_v23 = vmul.f32 %v5344_v21, %v5572_v55 }
 0x2a4   : > { %v5588_v7 = vpop.eup %4149  ;;  %v1625_v45 = vmul.f32 %v5558_v59, %v1624_v51  ;;  %7731 = vst [vmem:[#allocation49_spill] sm:$0xff] %v5595_v16  ;;  %v1263_v19 = vmul.f32 %v5595_v16, %v5595_v16  ;;  %v2701_v43 = vadd.f32 %v5494_v53, %v2636_v22  ;;  %v1182_v51 = vsub.f32 %v4978_v62, %v1150_v12 }
 0x2a5   : > { %v1458_v54 = vmul.f32 %v5515_v18, %v1457_v47  ;;  %v1634_v48 = vmul.f32 %v5588_v7, %v5520_v4  ;;  %vm1630_vm7 = vweird.f32 %v5558_v59  ;;  %v1706_v22 = vmul.f32 0.5, %v1705_v37 }
 0x2a6   : > { %v1626_v17 = vmul.f32 0.5, %v1625_v45  ;;  %2919 = vadd.xlane.f32.xlu1 %v5505_v49  ;;  %v1282_v14 = vpop.xlane.xlu0 %1281  ;;  %1325 = vadd.xlane.f32.xlu0 %v1263_v19  ;;  %v2766_v53 = vadd.f32 %v5508_v3, %v2701_v43  ;;  %v1753_v16 = vmul.f32 %v4987_v0, %v1718_v33  ;;  %vm1629_vm9 = vweird.f32 %v5497_v42 }
 0x2a7   : > { %v1462_v10 = vsel %vm1461_vm5, %v5515_v18, %v1458_v54  ;;  %v1635_v61 = vmul.f32 %v5588_v7, %v1634_v48  ;;  %v1337_v47 = vmul.f32 0.015625, %v1282_v14  ;;  %vm1640_vm10 = vweird.f32 %v5588_v7  ;;  %vm1631_vm11 = vmor %vm1629_vm9, %vm1630_vm7 }
 0x2a8   : > { %v1719_v45 = vmul.f32 %v1462_v10, %v4952_v50  ;;  %v1627_v49 = vsub.f32 1.5, %v1626_v17  ;;  %v5631_v12 = vsel %vm1070_vm4, %v1182_v51, 0.0  ;;  %vm1639_vm13 = vweird.f32 %v5520_v4  ;;  %vm5661_vm5 = vmor %vm1469_vm3, %vm1470_vm15 }
 0x2a9   : > { %v1636_v2 = vmul.f32 0.5, %v1635_v61  ;;  %v5622_v46 = vadd.f32 1e-05, %v1337_v47  ;;  %v1316_v18 = vpop.xlane.xlu2 %1315  ;;  %v5638_v42 = vadd.f32 %v5002_v39, %v1753_v16  ;;  %vm5649_vm14 = vmor %vm1639_vm13, %vm1640_vm10  ;;  %v1707_v17 = vsub.f32 1.5, %v1706_v22 }
 0x2aa   : > { %v1754_v54 = vmul.f32 %v4987_v0, %v1719_v45  ;;  %v1628_v62 = vmul.f32 %v5558_v59, %v1627_v49  ;;  %v1354_v3 = vmul.f32 0.015625, %v1316_v18  ;;  %v2802_v0 = vadd.f32 %v5319_v15, %v2766_v53 }
 0x2ab   : > { %v1637_v50 = vsub.f32 1.5, %v1636_v2  ;;  %4151 = vrsqrt.f32 %v5622_v46  ;;  %v5673_v14 = vsel %vm2839_vm0, %v5513_v40, %v5546_v13  ;;  %v1472_v27 = vsel %vm5661_vm5, %v5455_v5, %v5585_v8 }
 0x2ac   : > { %4153 = vrsqrt.f32 %v5560_v41  ;;  %v1632_v37 = vsel %vm1631_vm11, %v5558_v59, %v1628_v62  ;;  %v5641_v2 = vadd.f32 %v5002_v39, %v1754_v54  ;;  %v5644_v33 = vadd.f32 1e-05, %v1354_v3 }
 0x2ad   : > { %v1638_v49 = vmul.f32 %v5588_v7, %v1637_v50  ;;  %v1736_v48 = vmul.f32 %v1632_v37, %v4972_v30  ;;  %vm2834_vm1 = vcmp.ge.f32.partialorder %v2802_v0, 0.0  ;;  %v2867_v4 = vmul.f32 %v5344_v21, %v2802_v0 }
 0x2ae   : > { %2953 = vadd.xlane.f32.xlu1 %v5525_v1  ;;  %v1246_v39 = vmul.f32 %v5631_v12, %v5631_v12  ;;  %v1318_v16 = vpop.xlane.xlu0 %1317  ;;  %4155 = vrsqrt.f32 %v5644_v33  ;;  %v5694_v5 = vsel %vm2835_vm6, %v5572_v55, %v2868_v23  ;;  %v2301_v13 = vrot.slane %v5638_v42, 7 }
 0x2af   : > { %v1642_v19 = vsel %vm5649_vm14, %v5588_v7, %v1638_v49  ;;  %v5679_v43 = vsel %vm2834_vm1, %v2802_v0, %v2867_v4  ;;  %v1355_v10 = vmul.f32 0.015625, %v1318_v16  ;;  %v5685_v7 = vsel %vm2838_vm2, %v5537_v6, %v5582_v31  ;;  %v5704_v6 = vld [vmem:[%s7545_s7] ss:$0 sm:$0xff] }
 0x2b0   : > { %1291 = vadd.xlane.f32.xlu0 %v1246_v39  ;;  %v1737_v40 = vmul.f32 %v1642_v19, %v4976_v44  ;;  %2949 = vadd.xlane.f32.xlu2 %v5679_v43  ;;  %v2463_v8 = vrot.slane %v5641_v2, 1  ;;  %vm1710_vm15 = vweird.f32 %v5527_v58  ;;  %v1771_v44 = vmul.f32 %v5704_v6, %v1736_v48 }
 0x2b1   : > { %v5687_v61 = vpop.eup %4151  ;;  %v2789_v55 = vadd.f32 %v5319_v15, %v5441_v63  ;;  %v1708_v23 = vmul.f32 %v5527_v58, %v1707_v17  ;;  %v5712_v47 = vadd.f32 1e-05, %v1355_v10  ;;  %v7736_v45 = vrot.slane %v5407_v52, 7  ;;  %v1286_v37 = vpop.xlane.xlu2 %1285 }
 0x2b2   : > { %v5698_v51 = vpop.eup %4153  ;;  %v1474_v31 = vmul.f32 %v5687_v61, %v5622_v46  ;;  %v2462_v22 = vrot.slane %v5638_v42, 1  ;;  %v1720_v18 = vmul.f32 %v1472_v27, %v4903_v60  ;;  %v7646_v63 = vrot.slane %v5034_v25, 1 }
 0x2b3   : > { %v2355_v53 = vsel %vm2328_vm8, %v7736_v45, %v2301_v13  ;;  %vm1709_vm0 = vweird.f32 %v5468_v11  ;;  %v1772_v3 = vmul.f32 %v5704_v6, %v1737_v40  ;;  %4157 = vrsqrt.f32 %v5712_v47  ;;  %v5747_v11 = vld [vmem:[%s7546_s8] ss:$0 sm:$0xff] }
 0x2b4   : > { %v1475_v54 = vmul.f32 %v5687_v61, %v1474_v31  ;;  %v2625_v62 = vmul.f32 %v5068_v35, %v2355_v53  ;;  %v5725_v50 = vpop.eup %4155  ;;  %v2515_v60 = vsel %vm2489_vm12, %v2462_v22, %v2463_v8  ;;  %v1484_v0 = vmul.f32 %v5698_v51, %v5560_v41  ;;  %vm5740_vm2 = vmor %vm1709_vm0, %vm1710_vm15 }
 0x2b5   : > { %v5750_v48 = vadd.f32 %v5747_v11, %v1771_v44  ;;  %v2658_v59 = vmul.f32 %v5046_v26, %v5638_v42  ;;  %v5757_v4 = vmul.f32 %v5046_v26, %v5034_v25  ;;  %v1712_v39 = vsel %vm5740_vm2, %v5527_v58, %v1708_v23 }
 0x2b6   : > { %2957 = vadd.xlane.f32.xlu1 %v5685_v7  ;;  %v1644_v16 = vmul.f32 %v5725_v50, %v5644_v33  ;;  %v2854_v30 = vmul.f32 %v5344_v21, %v2789_v55  ;;  %v1820_v17 = vadd.s32 32, %v5012_v56  ;;  %v1476_v19 = vmul.f32 0.5, %v1475_v54 }
 0x2b7   : > { %v1339_v27 = vmul.f32 0.015625, %v1286_v37  ;;  %v2690_v10 = vadd.f32 %v2658_v59, %v2625_v62  ;;  %v2723_v40 = vmul.f32 %v5070_v34, %v2515_v60  ;;  %v1755_v44 = vmul.f32 %v5704_v6, %v1720_v18 }
 0x2b8   : > { %2951 = vadd.xlane.f32.xlu0 %v5694_v5  ;;  %v5770_v31 = vadd.f32 %v5747_v11, %v1772_v3  ;;  %2959 = vadd.xlane.f32.xlu2 %v5673_v14  ;;  %vm2821_vm3 = vcmp.ge.f32.partialorder %v2789_v55, 0.0  ;;  %v1839_v58 = vadd.s32 184, %v5012_v56  ;;  %v1485_v23 = vmul.f32 %v5698_v51, %v1484_v0 }
 0x2b9   : > { %v1744_v45 = vmul.f32 %v1712_v39, %v4931_v20  ;;  %v2755_v53 = vadd.f32 %v2723_v40, %v2690_v10  ;;  %v2319_v54 = vrot.slane %v5750_v48, 7  ;;  %v5777_v62 = vpop.eup %4157  ;;  %v1645_v37 = vmul.f32 %v5725_v50, %v1644_v16 }
 0x2ba   : > { %v2013_v18 = vand.u32 31, %v1839_v58  ;;  %v7739_v3 = vrot.slane %v5049_v24, 1  ;;  %v1880_v49 = vand.u32 31, %v1820_v17  ;;  %v1477_v59 = vsub.f32 1.5, %v1476_v19 }
 0x2bb   : > { %v1654_v20 = vmul.f32 %v5777_v62, %v5712_v47  ;;  %v5788_v0 = vadd.f32 1e-05, %v1339_v27  ;;  %v5790_v39 = vsel %vm2821_vm3, %v2789_v55, %v2854_v30  ;;  %v2791_v10 = vadd.f32 %v5319_v15, %v2755_v53 }
 0x2bc   : > { %v2520_v60 = vsel %vm2489_vm12, %v7646_v63, %v7739_v3  ;;  %vm5793_vm6 = vcmp.eq.s32.totalorder %v2013_v18, 31  ;;  %v2480_v24 = vrot.slane %v5750_v48, 1  ;;  %v7647_v40 = vrot.slane %v5770_v31, 1 }
 0x2bd   : > { %v1486_v58 = vmul.f32 0.5, %v1485_v23  ;;  %v1779_v17 = vmul.f32 %v5704_v6, %v1744_v45  ;;  %v1655_v19 = vmul.f32 %v5777_v62, %v1654_v20  ;;  %v7742_v55 = vrot.slane %v5356_v38, 7 }
 0x2be   : > { %v1646_v27 = vmul.f32 0.5, %v1645_v37  ;;  %vm2823_vm7 = vcmp.ge.f32.partialorder %v2791_v10, 0.0  ;;  %v2856_v53 = vmul.f32 %v5344_v21, %v2791_v10  ;;  %v2497_v23 = vsel %vm2489_vm12, %v2480_v24, %v7647_v40 }
 0x2bf   : > { %v2337_v30 = vsel %vm2328_vm8, %v7742_v55, %v2319_v54  ;;  %v1478_v45 = vmul.f32 %v5687_v61, %v1477_v59  ;;  %vm1480_vm9 = vweird.f32 %v5687_v61  ;;  %v1656_v18 = vmul.f32 0.5, %v1655_v19 }
 0x2c0   : > { %2923 = vadd.xlane.f32.xlu0 %v5790_v39  ;;  %v2609_v3 = vsel %vm5793_vm6, 0.0, %v2497_v23  ;;  %4159 = vrsqrt.f32 %v5788_v0  ;;  %v5818_v37 = vsel %vm2823_vm7, %v2791_v10, %v2856_v53  ;;  %v2643_v20 = vmul.f32 %v5068_v35, %v2337_v30 }
 0x2c1   : > { %v5822_v55 = vmul.f32 %v5070_v34, %v2520_v60  ;;  %v1487_v63 = vsub.f32 1.5, %v1486_v58  ;;  %vm1479_vm10 = vweird.f32 %v5622_v46  ;;  %2927 = vadd.xlane.f32.xlu1 %v5818_v37  ;;  %vm5826_vm11 = vcmp.eq.s32.totalorder %v1880_v49, 0 }
 0x2c2   : > { %v7745_v16 = vrot.slane %v5407_v52, 7  ;;  %v7746_v19 = vrot.slane %v5267_v29, 7  ;;  %vm1489_vm13 = vweird.f32 %v5560_v41  ;;  %vm5837_vm14 = vmor %vm1479_vm10, %vm1480_vm9  ;;  %v1647_v46 = vsub.f32 1.5, %v1646_v27 }
 0x2c3   : > { %v2676_v49 = vmul.f32 %v5046_v26, %v5750_v48  ;;  %v2741_v58 = vmul.f32 %v5070_v34, %v2609_v3  ;;  %v7749_v30 = vrot.slane %v5356_v38, 1  ;;  %v5849_v53 = vadd.f32 %v5747_v11, %v1779_v17 }
 0x2c4   : > { %v2356_v10 = vsel %vm2328_vm8, %v7746_v19, %v7745_v16  ;;  %v1482_v23 = vsel %vm5837_vm14, %v5687_v61, %v1478_v45  ;;  %v1657_v16 = vsub.f32 1.5, %v1656_v18  ;;  %v5854_v19 = vpop.xlane.xlu2 %1289  ;;  %v5858_v40 = vadd.f32 %v5747_v11, %v1755_v44 }
 0x2c5   : > { %v2498_v29 = vsel %vm2489_vm12, %v7749_v30, %v2480_v24  ;;  %vm1490_vm1 = vweird.f32 %v5698_v51  ;;  %v2708_v38 = vadd.f32 %v2676_v49, %v2643_v20  ;;  %v2657_v24 = vmul.f32 %v5046_v26, %v5407_v52 }
 0x2c6   : > { %v2740_v27 = vmul.f32 %v5070_v34, %v2498_v29  ;;  %v1488_v17 = vmul.f32 %v5698_v51, %v1487_v63  ;;  %v1852_v61 = vand.u32 31, %v5012_v56  ;;  %v2429_v45 = vsel %vm5826_vm11, 0.0, %v2356_v10  ;;  %v5868_v18 = vpop.eup %4159  ;;  %vm5905_vm11 = vmor %vm1489_vm13, %vm1490_vm1 }
 0x2c7   : > { %v1721_v44 = vmul.f32 %v1482_v23, %v5009_v32  ;;  %v1648_v60 = vmul.f32 %v5725_v50, %v1647_v46  ;;  %vm1650_vm5 = vweird.f32 %v5725_v50  ;;  %v2773_v20 = vadd.f32 %v2741_v58, %v2708_v38 }
 0x2c8   : > { %v2772_v3 = vadd.f32 %v2740_v27, %v5446_v57  ;;  %v1658_v49 = vmul.f32 %v5777_v62, %v1657_v16  ;;  %vm1660_vm15 = vweird.f32 %v5777_v62  ;;  %v7648_v63 = vrot.slane %v5849_v53, 7 }
 0x2c9   : > { %vm1649_vm0 = vweird.f32 %v5644_v33  ;;  %vm1659_vm2 = vweird.f32 %v5712_v47  ;;  %v2809_v59 = vadd.f32 %v5319_v15, %v2773_v20  ;;  %v2464_v32 = vrot.slane %v5858_v40, 1 }
 0x2ca   : > { %v2808_v57 = vadd.f32 %v5319_v15, %v2772_v3  ;;  %vm5881_vm3 = vmor %vm1649_vm0, %vm1650_vm5  ;;  %v1494_v46 = vmul.f32 %v5868_v18, %v5788_v0  ;;  %vm5888_vm7 = vcmp.eq.s32.totalorder %v1852_v61, 0  ;;  %v1756_v33 = vmul.f32 %v5704_v6, %v1721_v44 }
 0x2cb   : > { %v1652_v47 = vsel %vm5881_vm3, %v5725_v50, %v1648_v60  ;;  %vm5896_vm9 = vmor %vm1659_vm2, %vm1660_vm15  ;;  %vm2841_vm10 = vcmp.ge.f32.partialorder %v2809_v59, 0.0  ;;  %v2874_v23 = vmul.f32 %v5344_v21, %v2809_v59  ;;  %v7758_v38 = vrot.slane %v5034_v25, 7 }
 0x2cc   : > { %vm2840_vm6 = vcmp.ge.f32.partialorder %v2808_v57, 0.0  ;;  %v2873_v58 = vmul.f32 %v5344_v21, %v2808_v57  ;;  %v1662_v27 = vsel %vm5896_vm9, %v5777_v62, %v1658_v49  ;;  %v2302_v61 = vrot.slane %v5641_v2, 7  ;;  %v5921_v41 = vpop.xlane.xlu2 %1323 }
 0x2cd   : > { %v2360_v3 = vsel %vm2328_vm8, %v7648_v63, %v7758_v38  ;;  %v1492_v44 = vsel %vm5905_vm11, %v5698_v51, %v1488_v17  ;;  %v5926_v60 = vsel %vm2841_vm10, %v2809_v59, %v2874_v23  ;;  %v2624_v20 = vmul.f32 %v5068_v35, %v2429_v45 }
 0x2ce   : > { %v5912_v50 = vsel %vm2840_vm6, %v2808_v57, %v2873_v58  ;;  %v2425_v62 = vsel %vm5888_vm7, 0.0, %v2360_v3  ;;  %v1495_v49 = vmul.f32 %v5868_v18, %v1494_v46  ;;  %2963 = vadd.xlane.f32.xlu2 %v5926_v60  ;;  %v2354_v51 = vsel %vm2328_vm8, %v2301_v13, %v2302_v61  ;;  %v7759_v58 = vld [vmem:[#allocation36_spill] sm:$0xff] }
 0x2cf   : > { %2961 = vadd.xlane.f32.xlu1 %v5912_v50  ;;  %v2620_v57 = vmul.f32 %v5068_v35, %v2425_v62  ;;  %v2514_v17 = vsel %vm2489_vm12, %v2463_v8, %v2464_v32  ;;  %v1738_v45 = vmul.f32 %v1652_v47, %v5043_v9  ;;  %v1739_v59 = vmul.f32 %v1662_v27, %v5060_v28 }
 0x2d0   : > { %v2626_v10 = vmul.f32 %v5068_v35, %v2354_v51  ;;  %v2659_v46 = vmul.f32 %v5046_v26, %v5641_v2  ;;  %v1722_v30 = vmul.f32 %v1492_v44, %v7759_v58  ;;  %v5952_v13 = vadd.f32 %v5747_v11, %v1756_v33 }
 0x2d1   : > { %v2685_v29 = vadd.f32 %v5757_v4, %v2620_v57  ;;  %v7760_v8 = vrot.slane %v5407_v52, 1  ;;  %v2724_v47 = vmul.f32 %v5070_v34, %v2514_v17  ;;  %v2303_v2 = vrot.slane %v5858_v40, 7 }
 0x2d2   : > { %v2691_v28 = vadd.f32 %v2659_v46, %v2626_v10  ;;  %v1496_v16 = vmul.f32 0.5, %v1495_v49  ;;  %v2689_v27 = vadd.f32 %v2657_v24, %v2624_v20  ;;  %v1823_v4 = vadd.s32 56, %v5012_v56 }
 0x2d3   : > { %v2516_v9 = vsel %vm2489_vm12, %v7760_v8, %v2462_v22  ;;  %v2750_v33 = vadd.f32 %v5822_v55, %v2685_v29  ;;  %v1773_v42 = vmul.f32 %v5704_v6, %v1738_v45  ;;  %v1774_v52 = vmul.f32 %v5704_v6, %v1739_v59 }
 0x2d4   : > { %v2722_v23 = vmul.f32 %v5070_v34, %v2516_v9  ;;  %v2756_v38 = vadd.f32 %v2724_v47, %v2691_v28  ;;  %v2353_v22 = vsel %vm2328_vm8, %v2302_v61, %v2303_v2  ;;  %v2922_v62 = vpop.xlane.xlu2 %2921  ;;  %v1901_v49 = vand.u32 31, %v1823_v4  ;;  %v7763_v28 = vld [vmem:[#allocation43_spill] sm:$0xff] }
 0x2d5   : > { %v2786_v3 = vadd.f32 %v5319_v15, %v2750_v33  ;;  %v2465_v55 = vrot.slane %v5952_v13, 1  ;;  %v1757_v24 = vmul.f32 %v5704_v6, %v1722_v30  ;;  %v2983_v57 = vmul.f32 0.015625, %v2922_v62  ;;  %v1320_v33 = vpop.xlane.xlu0 %1319 }
 0x2d6   : > { %v2754_v44 = vadd.f32 %v2722_v23, %v2689_v27  ;;  %v2792_v20 = vadd.f32 %v5319_v15, %v2756_v38  ;;  %v2660_v51 = vmul.f32 %v5046_v26, %v5858_v40  ;;  %vm5979_vm14 = vcmp.eq.s32.totalorder %v1901_v49, 31 }
 0x2d7   : > { %vm2818_vm13 = vcmp.ge.f32.partialorder %v2786_v3, 0.0  ;;  %v2851_v17 = vmul.f32 %v5344_v21, %v2786_v3  ;;  %v2627_v45 = vmul.f32 %v5068_v35, %v2353_v22  ;;  %v5985_v59 = vadd.f32 %v5747_v11, %v1773_v42 }
 0x2d8   : > { %v1497_v10 = vsub.f32 1.5, %v1496_v16  ;;  %vm2824_vm1 = vcmp.ge.f32.partialorder %v2792_v20, 0.0  ;;  %v2857_v46 = vmul.f32 %v5344_v21, %v2792_v20  ;;  %v5989_v58 = vadd.f32 %v5747_v11, %v1774_v52 }
 0x2d9   : > { %v5991_v30 = vsel %vm2818_vm13, %v2786_v3, %v2851_v17  ;;  %v2790_v29 = vadd.f32 %v5319_v15, %v2754_v44  ;;  %v2513_v8 = vsel %vm2489_vm12, %v2464_v32, %v2465_v55  ;;  %v3015_v47 = vsub.f32 %v7763_v28, %v2983_v57 }
 0x2da   : > { %2917 = vadd.xlane.f32.xlu0 %v5991_v30  ;;  %v6001_v9 = vsel %vm2824_vm1, %v2792_v20, %v2857_v46  ;;  %v2593_v23 = vsel %vm5979_vm14, 0.0, %v2513_v8  ;;  %v6007_v16 = vadd.f32 %v5747_v11, %v1757_v24  ;;  %vm1499_vm5 = vweird.f32 %v5788_v0 }
 0x2db   : > { %2929 = vadd.xlane.f32.xlu2 %v6001_v9  ;;  %v2692_v27 = vadd.f32 %v2660_v51, %v2627_v45  ;;  %v2725_v32 = vmul.f32 %v5070_v34, %v2593_v23  ;;  %v1498_v4 = vmul.f32 %v5868_v18, %v1497_v10  ;;  %vm1500_vm15 = vweird.f32 %v5868_v18 }
 0x2dc   : > { %v2320_v42 = vrot.slane %v5770_v31, 7  ;;  %v2321_v52 = vrot.slane %v5985_v59, 7  ;;  %v2855_v38 = vmul.f32 %v5344_v21, %v2790_v29  ;;  %v2482_v3 = vrot.slane %v5985_v59, 1  ;;  %v2956_v62 = vpop.xlane.xlu2 %2955  ;;  %vm1501_vm2 = vmor %vm1499_vm5, %vm1500_vm15 }
 0x2dd   : > { %v2757_v22 = vadd.f32 %v2725_v32, %v2692_v27  ;;  %v2483_v44 = vrot.slane %v5989_v58, 1  ;;  %v1356_v49 = vmul.f32 0.015625, %v1320_v33  ;;  %vm2822_vm0 = vcmp.ge.f32.partialorder %v2790_v29, 0.0  ;;  %v7765_v33 = vld [vmem:[#allocation38_spill] sm:$0xff] }
 0x2de   : > { %v2335_v24 = vsel %vm2328_vm8, %v2320_v42, %v2321_v52  ;;  %v6025_v20 = vsel %vm1070_vm4, %v3015_v47, 0.0  ;;  %v2678_v17 = vmul.f32 %v5046_v26, %v5985_v59  ;;  %v3000_v61 = vmul.f32 0.015625, %v2956_v62 }
 0x2df   : > { %7764 = vst [vmem:[#allocation36_spill] sm:$0xff] %v6025_v20  ;;  %v2495_v57 = vsel %vm2489_vm12, %v2482_v3, %v2483_v44  ;;  %v2645_v51 = vmul.f32 %v5068_v35, %v2335_v24  ;;  %v1502_v45 = vsel %vm1501_vm2, %v5868_v18, %v1498_v4  ;;  %v3079_v46 = vmul.f32 %v6025_v20, %v6025_v20  ;;  %v7766_v4 = vld [vmem:[#allocation44_spill] sm:$0xff] }
 0x2e0   : > { %v2743_v10 = vmul.f32 %v5070_v34, %v2495_v57  ;;  %v6040_v0 = vsel %vm2822_vm0, %v2790_v29, %v2855_v38  ;;  %v2793_v8 = vadd.f32 %v5319_v15, %v2757_v22  ;;  %v1840_v47 = vadd.s32 192, %v5012_v56 }
 0x2e1   : > { %v2710_v28 = vadd.f32 %v2678_v17, %v2645_v51  ;;  %v2466_v23 = vrot.slane %v6007_v16, 1  ;;  %v1723_v27 = vmul.f32 %v1502_v45, %v7765_v33  ;;  %v6047_v32 = vadd.f32 1e-05, %v1356_v49 }
 0x2e2   : > { %2925 = vadd.xlane.f32.xlu0 %v6040_v0  ;;  %v3032_v62 = vsub.f32 %v7766_v4, %v3000_v61  ;;  %v2020_v24 = vand.u32 31, %v1840_v47  ;;  %v2336_v29 = vsel %vm2328_vm8, %v2319_v54, %v2320_v42  ;;  %v1824_v38 = vadd.s32 64, %v5012_v56 }
 0x2e3   : > { %v2775_v18 = vadd.f32 %v2743_v10, %v2710_v28  ;;  %3113 = vadd.xlane.f32.xlu2 %v3079_v46  ;;  %v2304_v22 = vrot.slane %v5952_v13, 7  ;;  %vm2825_vm3 = vcmp.ge.f32.partialorder %v2793_v8, 0.0  ;;  %v2858_v57 = vmul.f32 %v5344_v21, %v2793_v8 }
 0x2e4   : > { %v7767_v51 = vrot.slane %v5770_v31, 1  ;;  %vm2256_vm6 = vcmp.eq.s32.totalorder %v2020_v24, 0  ;;  %v2677_v48 = vmul.f32 %v5046_v26, %v5770_v31  ;;  %v1908_v61 = vand.u32 31, %v1824_v38 }
 0x2e5   : > { %v2811_v49 = vadd.f32 %v5319_v15, %v2775_v18  ;;  %v2352_v54 = vsel %vm2328_vm8, %v2303_v2, %v2304_v22  ;;  %v2449_v45 = vsel %vm2256_vm6, 0.0, %v2336_v29  ;;  %v6071_v15 = vsel %vm1070_vm4, %v3032_v62, 0.0 }
 0x2e6   : > { %v2496_v17 = vsel %vm2489_vm12, %v7767_v51, %v2482_v3  ;;  %v2644_v3 = vmul.f32 %v5068_v35, %v2449_v45  ;;  %vm2240_vm9 = vcmp.eq.s32.totalorder %v1908_v61, 0  ;;  %v3096_v31 = vmul.f32 %v6071_v15, %v6071_v15 }
 0x2e7   : > { %vm2843_vm7 = vcmp.ge.f32.partialorder %v2811_v49, 0.0  ;;  %v2876_v42 = vmul.f32 %v5344_v21, %v2811_v49  ;;  %v2742_v10 = vmul.f32 %v5070_v34, %v2496_v17  ;;  %v6078_v40 = vsel %vm2825_vm3, %v2793_v8, %v2858_v57 }
 0x2e8   : > { %v2433_v46 = vsel %vm2240_vm9, 0.0, %v2352_v54  ;;  %v2512_v28 = vsel %vm2489_vm12, %v2465_v55, %v2466_v23  ;;  %v2709_v47 = vadd.f32 %v2677_v48, %v2644_v3  ;;  %v2661_v18 = vmul.f32 %v5046_v26, %v5952_v13  ;;  %v6097_v55 = vld [vmem:[%s7548_s10] ss:$0 sm:$0xff] }
 0x2e9   : > { %v6080_v2 = vsel %vm2843_vm7, %v2811_v49, %v2876_v42  ;;  %v2628_v33 = vmul.f32 %v5068_v35, %v2433_v46  ;;  %4161 = vrsqrt.f32 %v6047_v32  ;;  %v2726_v62 = vmul.f32 %v5070_v34, %v2512_v28 }
 0x2ea   : > { %2931 = vadd.xlane.f32.xlu0 %v6078_v40  ;;  %2967 = vadd.xlane.f32.xlu1 %v6080_v2  ;;  %v2774_v8 = vadd.f32 %v2742_v10, %v2709_v47  ;;  %v1758_v24 = vmul.f32 %v5704_v6, %v1723_v27  ;;  %v7650_v46 = vrot.slane %v6007_v16, 7  ;;  %vm1669_vm14 = vweird.f32 %v6047_v32 }
 0x2eb   : > { %3147 = vadd.xlane.f32.xlu2 %v3096_v31  ;;  %v2693_v4 = vadd.f32 %v2661_v18, %v2628_v33  ;;  %v1322_v31 = vpop.xlane.xlu1 %1321 }
 0x2ec   : > { %v2810_v29 = vadd.f32 %v6097_v55, %v2774_v8  ;;  %v6103_v51 = vadd.f32 %v5747_v11, %v1758_v24  ;;  %v2351_v47 = vsel %vm2328_vm8, %v2304_v22, %v7650_v46  ;;  %v2662_v8 = vmul.f32 %v5046_v26, %v6007_v16 }
 0x2ed   : > { %v2758_v38 = vadd.f32 %v2726_v62, %v2693_v4  ;;  %v2629_v18 = vmul.f32 %v5068_v35, %v2351_v47  ;;  %v7768_v4 = vld [vmem:[#allocation39_spill] sm:$0xff]  ;;  %v1357_v24 = vmul.f32 0.015625, %v1322_v31  ;;  %v7651_v22 = vrot.slane %v5989_v58, 7 }
 0x2ee   : > { %vm2842_vm10 = vcmp.ge.f32.partialorder %v2810_v29, 0.0  ;;  %v2875_v13 = vmul.f32 %v5344_v21, %v2810_v29  ;;  %v7649_v54 = vrot.slane %v6103_v51, 1 }
 0x2ef   : > { %v2794_v57 = vadd.f32 %v6097_v55, %v2758_v38  ;;  %v4162_v49 = vpop.eup %4161  ;;  %v1358_v38 = vmul.f32 0.015625, %v5921_v41  ;;  %v2679_v41 = vmul.f32 %v5046_v26, %v5989_v58 }
 0x2f0   : > { %v6105_v17 = vsel %vm2842_vm10, %v2810_v29, %v2875_v13  ;;  %v1664_v48 = vmul.f32 %v4162_v49, %v6047_v32  ;;  %v2511_v42 = vsel %vm2489_vm12, %v2466_v23, %v7649_v54  ;;  %vm1670_vm13 = vweird.f32 %v4162_v49 }
 0x2f1   : > { %vm2826_vm11 = vcmp.ge.f32.partialorder %v2794_v57, 0.0  ;;  %v2859_v27 = vmul.f32 %v5344_v21, %v2794_v57  ;;  %vm1671_vm1 = vmor %vm1669_vm14, %vm1670_vm13  ;;  %v2694_v29 = vadd.f32 %v2662_v8, %v2629_v18  ;;  %v2334_v32 = vsel %vm2328_vm8, %v2321_v52, %v7651_v22 }
 0x2f2   : > { %2965 = vadd.xlane.f32.xlu0 %v6105_v17  ;;  %v1665_v45 = vmul.f32 %v4162_v49, %v1664_v48  ;;  %v2646_v48 = vmul.f32 %v5068_v35, %v2334_v32  ;;  %v2727_v59 = vmul.f32 %v5070_v34, %v2511_v42 }
 0x2f3   : > { %v6110_v61 = vsel %vm2826_vm11, %v2794_v57, %v2859_v27  ;;  %v6131_v57 = vadd.f32 1e-05, %v1357_v24 }
 0x2f4   : > { %2933 = vadd.xlane.f32.xlu1 %v6110_v61  ;;  %v1666_v3 = vmul.f32 0.5, %v1665_v45  ;;  %v2759_v52 = vadd.f32 %v2727_v59, %v2694_v29 }
 0x2f5   : > { %4163 = vrsqrt.f32 %v6131_v57  ;;  %vm1679_vm15 = vweird.f32 %v6131_v57 }
 0x2f6   : > { %v1667_v10 = vsub.f32 1.5, %v1666_v3  ;;  %v1341_v3 = vmul.f32 0.015625, %v5854_v19 }
 0x2f8   : > { %v1668_v28 = vmul.f32 %v4162_v49, %v1667_v10  ;;  %v2711_v10 = vadd.f32 %v2679_v41, %v2646_v48  ;;  %v6152_v47 = vadd.f32 1e-05, %v1341_v3 }
 0x2fa   : > { %v1672_v33 = vsel %vm1671_vm1, %v4162_v49, %v1668_v28  ;;  %v6139_v49 = vadd.f32 1e-05, %v1358_v38  ;;  %v7769_v38 = vld [vmem:[#allocation47_spill] sm:$0xff]  ;;  %vm1519_vm11 = vweird.f32 %v6152_v47 }
 0x2fb   : > { %v1740_v62 = vmul.f32 %v1672_v33, %v7768_v4  ;;  %v6162_v18 = vpop.eup %4163 }
 0x2fc   : > { %4165 = vrsqrt.f32 %v6139_v49  ;;  %v1674_v29 = vmul.f32 %v6162_v18, %v6131_v57  ;;  %vm1680_vm5 = vweird.f32 %v6162_v18  ;;  %vm1689_vm3 = vweird.f32 %v6139_v49 }
 0x2fd   : > { %v1775_v13 = vmul.f32 %v5704_v6, %v1740_v62  ;;  %4167 = vrsqrt.f32 %v6152_v47  ;;  %vm6232_vm2 = vmor %vm1679_vm15, %vm1680_vm5 }
 0x2fe   : > { %v1675_v59 = vmul.f32 %v6162_v18, %v1674_v29 }
 0x2ff   : > { %v6145_v45 = vadd.f32 %v5747_v11, %v1775_v13 }
 0x301   : > { %v7652_v28 = vrot.slane %v6145_v45, 1 }
 0x302   : > { %v6165_v4 = vpop.eup %4165 }
 0x303   : > { %v2494_v19 = vsel %vm2489_vm12, %v2483_v44, %v7652_v28  ;;  %v1684_v32 = vmul.f32 %v6165_v4, %v6139_v49  ;;  %vm1690_vm0 = vweird.f32 %v6165_v4 }
 0x304   : > { %vm6249_vm7 = vmor %vm1689_vm3, %vm1690_vm0 }
 0x309   : > { %v1288_v23 = vpop.xlane.xlu1 %1287 }
 0x30a   : > { %v1340_v31 = vmul.f32 0.015625, %v1288_v23  ;;  %v2744_v23 = vmul.f32 %v5070_v34, %v2494_v19 }
 0x30c   : > { %v6154_v33 = vadd.f32 1e-05, %v1340_v31  ;;  %v6168_v24 = vadd.f32 %v2744_v23, %v2711_v10  ;;  %v6186_v10 = vpop.eup %4167 }
 0x30d   : > { %v1514_v29 = vmul.f32 %v6186_v10, %v6152_v47  ;;  %vm1520_vm9 = vweird.f32 %v6186_v10 }
 0x30e   : > { %4169 = vrsqrt.f32 %v6154_v33  ;;  %vm6282_vm14 = vmor %vm1519_vm11, %vm1520_vm9  ;;  %vm1509_vm1 = vweird.f32 %v6154_v33 }
 0x311   : > { %v1294_v27 = vpop.xlane.xlu1 %1293 }
 0x314   : > { %v6188_v19 = vpop.eup %4169 }
 0x315   : > { %v1504_v63 = vmul.f32 %v6188_v19, %v6154_v33  ;;  %vm1510_vm10 = vweird.f32 %v6188_v19 }
 0x316   : > { %vm6288_vm5 = vmor %vm1509_vm1, %vm1510_vm10 }
 0x319   : > { %v2920_v42 = vpop.xlane.xlu1 %2919  ;;  %v1326_v62 = vpop.xlane.xlu0 %1325 }
 0x31a   : > { %v2982_v8 = vmul.f32 0.015625, %v2920_v42  ;;  %v1359_v13 = vmul.f32 0.015625, %v1326_v62  ;;  %v1685_v42 = vmul.f32 %v6165_v4, %v1684_v32  ;;  %v1676_v62 = vmul.f32 0.5, %v1675_v59 }
 0x31b   : > { %v1343_v59 = vmul.f32 0.015625, %v1294_v27 }
 0x31c   : > { %v3014_v44 = vsub.f32 %v7769_v38, %v2982_v8  ;;  %v6176_v48 = vadd.f32 1e-05, %v1359_v13 }
 0x31e   : > { %v6180_v41 = vsel %vm1070_vm4, %v3014_v44, 0.0  ;;  %4171 = vrsqrt.f32 %v6176_v48  ;;  %vm1699_vm15 = vweird.f32 %v6176_v48 }
 0x31f   : > { %7770 = vst [vmem:[#allocation43_spill] sm:$0xff] %v6180_v41  ;;  %v3078_v3 = vmul.f32 %v6180_v41, %v6180_v41 }
 0x321   : > { %v2954_v31 = vpop.xlane.xlu1 %2953  ;;  %3111 = vadd.xlane.f32.xlu1 %v3078_v3  ;;  %v1686_v3 = vmul.f32 0.5, %v1685_v42  ;;  %v1515_v42 = vmul.f32 %v6186_v10, %v1514_v29  ;;  %v2795_v29 = vadd.f32 %v6097_v55, %v2759_v52 }
 0x322   : > { %v2999_v23 = vmul.f32 0.015625, %v2954_v31 }
 0x323   : > { %v1292_v8 = vpop.xlane.xlu0 %1291  ;;  %v2950_v38 = vpop.xlane.xlu2 %2949  ;;  %v1687_v27 = vsub.f32 1.5, %v1686_v3  ;;  %vm2827_vm6 = vcmp.ge.f32.partialorder %v2795_v29, 0.0 }
 0x324   : > { %v3031_v44 = vsub.f32 %v5525_v1, %v2999_v23  ;;  %v1342_v13 = vmul.f32 0.015625, %v1292_v8  ;;  %v2997_v54 = vmul.f32 0.015625, %v2950_v38  ;;  %v6196_v46 = vpop.eup %4171  ;;  %v1677_v23 = vsub.f32 1.5, %v1676_v62 }
 0x325   : > { %v1694_v1 = vmul.f32 %v6196_v46, %v6176_v48  ;;  %v1505_v38 = vmul.f32 %v6188_v19, %v1504_v63  ;;  %vm1700_vm13 = vweird.f32 %v6196_v46 }
 0x326   : > { %v6198_v22 = vadd.f32 1e-05, %v1342_v13  ;;  %v6202_v32 = vsel %vm1070_vm4, %v3031_v44, 0.0  ;;  %v3029_v31 = vsub.f32 %v5679_v43, %v2997_v54  ;;  %v6219_v54 = vadd.f32 1e-05, %v1343_v59 }
 0x327   : > { %7771 = vst [vmem:[#allocation38_spill] sm:$0xff] %v6202_v32  ;;  %v3095_v8 = vmul.f32 %v6202_v32, %v6202_v32  ;;  %v1695_v13 = vmul.f32 %v6196_v46, %v1694_v1  ;;  %v1678_v63 = vmul.f32 %v6162_v18, %v1677_v23  ;;  %v1516_v1 = vmul.f32 0.5, %v1515_v42 }
 0x328   : > { %4173 = vrsqrt.f32 %v6198_v22  ;;  %v6214_v44 = vsel %vm1070_vm4, %v3029_v31, 0.0  ;;  %v1506_v20 = vmul.f32 0.5, %v1505_v38  ;;  %v1688_v59 = vmul.f32 %v6165_v4, %v1687_v27 }
 0x329   : > { %v3093_v43 = vmul.f32 %v6214_v44, %v6214_v44  ;;  %3145 = vadd.xlane.f32.xlu1 %v3095_v8  ;;  %v6221_v62 = vpop.xlane.xlu1 %2957  ;;  %v1696_v32 = vmul.f32 0.5, %v1695_v13  ;;  %4175 = vrsqrt.f32 %v6219_v54  ;;  %v2860_v42 = vmul.f32 %v5344_v21, %v2795_v29 }
 0x32a   : > { %v1682_v38 = vsel %vm6232_vm2, %v6162_v18, %v1678_v63  ;;  %v1517_v27 = vsub.f32 1.5, %v1516_v1  ;;  %v1692_v49 = vsel %vm6249_vm7, %v6165_v4, %v1688_v59  ;;  %v2812_v1 = vadd.f32 %v6097_v55, %v6168_v24  ;;  %vm1701_vm2 = vmor %vm1699_vm15, %vm1700_vm13 }
 0x32b   : > { %v2952_v28 = vpop.xlane.xlu0 %2951  ;;  %v2960_v31 = vpop.xlane.xlu2 %2959  ;;  %3141 = vadd.xlane.f32.xlu2 %v3093_v43  ;;  %v1507_v43 = vsub.f32 1.5, %v1506_v20  ;;  %vm1539_vm10 = vweird.f32 %v6219_v54 }
 0x32c   : > { %v2998_v3 = vmul.f32 0.015625, %v2952_v28  ;;  %v3002_v41 = vmul.f32 0.015625, %v2960_v31  ;;  %v1518_v59 = vmul.f32 %v6186_v10, %v1517_v27  ;;  %vm2844_vm0 = vcmp.ge.f32.partialorder %v2812_v1, 0.0 }
 0x32e   : > { %v6227_v8 = vpop.eup %4173  ;;  %v3030_v52 = vsub.f32 %v5694_v5, %v2998_v3  ;;  %v3034_v28 = vsub.f32 %v5673_v14, %v3002_v41  ;;  %v1697_v41 = vsub.f32 1.5, %v1696_v32  ;;  %v6265_v3 = vsel %vm2827_vm6, %v2795_v29, %v2860_v42 }
 0x32f   : > { %v1524_v57 = vmul.f32 %v6227_v8, %v6198_v22  ;;  %v6272_v32 = vpop.eup %4175  ;;  %v1522_v33 = vsel %vm6282_vm14, %v6186_v10, %v1518_v59  ;;  %v7782_v59 = vld [vmem:[#allocation40_spill] sm:$0xff]  ;;  %vm1530_vm3 = vweird.f32 %v6227_v8  ;;  %vm1529_vm6 = vweird.f32 %v6198_v22 }
 0x330   : > { %v6247_v5 = vsel %vm1070_vm4, %v3030_v52, 0.0  ;;  %v6255_v14 = vsel %vm1070_vm4, %v3034_v28, 0.0  ;;  %v7776_v52 = vld [vmem:[#allocation37_spill] sm:$0xff]  ;;  %v1508_v28 = vmul.f32 %v6188_v19, %v1507_v43  ;;  %v1698_v24 = vmul.f32 %v6196_v46, %v1697_v41  ;;  %vm6338_vm7 = vmor %vm1529_vm6, %vm1530_vm3 }
 0x331   : > { %v3094_v18 = vmul.f32 %v6247_v5, %v6247_v5  ;;  %v3098_v63 = vmul.f32 %v6255_v14, %v6255_v14  ;;  %v1525_v31 = vmul.f32 %v6227_v8, %v1524_v57  ;;  %v1741_v23 = vmul.f32 %v1682_v38, %v7776_v52  ;;  %v7777_v57 = vld [vmem:[#allocation41_spill] sm:$0xff] }
 0x332   : > { %v1742_v29 = vmul.f32 %v1692_v49, %v7777_v57  ;;  %v2877_v43 = vmul.f32 %v5344_v21, %v2812_v1  ;;  %v1534_v47 = vmul.f32 %v6272_v32, %v6219_v54  ;;  %v1725_v57 = vmul.f32 %v1522_v33, %v7782_v59 }
 0x333   : > { %3143 = vadd.xlane.f32.xlu0 %v3094_v18  ;;  %v2924_v20 = vpop.xlane.xlu0 %2923  ;;  %2935 = vadd.xlane.f32.xlu2 %v6265_v3  ;;  %v1526_v27 = vmul.f32 0.5, %v1525_v31  ;;  %v1776_v31 = vmul.f32 %v5704_v6, %v1741_v23  ;;  %v2323_v59 = vrot.slane %v6145_v45, 7  ;;  %vm1540_vm11 = vweird.f32 %v6272_v32 }
 0x334   : > { %3151 = vadd.xlane.f32.xlu1 %v3098_v63  ;;  %v2984_v4 = vmul.f32 0.015625, %v2924_v20  ;;  %v2928_v42 = vpop.xlane.xlu1 %2927  ;;  %v1777_v41 = vmul.f32 %v5704_v6, %v1742_v29  ;;  %v1512_v63 = vsel %vm6288_vm5, %v6188_v19, %v1508_v28  ;;  %v1702_v20 = vsel %vm1701_vm2, %v6196_v46, %v1698_v24  ;;  %v7783_v29 = vld [vmem:[#allocation45_spill] sm:$0xff]  ;;  %vm6423_vm13 = vmor %vm1539_vm10, %vm1540_vm11 }
 0x335   : > { %v2986_v18 = vmul.f32 0.015625, %v2928_v42  ;;  %v1527_v52 = vsub.f32 1.5, %v1526_v27  ;;  %v6313_v10 = vsel %vm2844_vm0, %v2812_v1, %v2877_v43  ;;  %v1724_v19 = vmul.f32 %v1512_v63, %v7783_v29  ;;  %v7784_v46 = vld [vmem:[#allocation49_spill] sm:$0xff] }
 0x336   : > { %v3016_v38 = vsub.f32 %v5790_v39, %v2984_v4  ;;  %v1535_v28 = vmul.f32 %v6272_v32, %v1534_v47  ;;  %v1843_v42 = vadd.s32 216, %v5012_v56  ;;  %v6321_v23 = vadd.f32 %v5747_v11, %v1777_v41 }
 0x337   : > { %v3018_v4 = vsub.f32 %v5818_v37, %v2986_v18  ;;  %v1743_v24 = vmul.f32 %v1702_v20, %v7784_v46  ;;  %v6325_v37 = vadd.f32 %v5747_v11, %v1776_v31  ;;  %v1528_v1 = vmul.f32 %v6227_v8, %v1527_v52 }
 0x338   : > { %v6297_v39 = vsel %vm1070_vm4, %v3016_v38, 0.0  ;;  %v1760_v13 = vmul.f32 %v5704_v6, %v1725_v57  ;;  %v1759_v27 = vmul.f32 %v5704_v6, %v1724_v19  ;;  %v1536_v18 = vmul.f32 0.5, %v1535_v28 }
 0x339   : > { %v3080_v48 = vmul.f32 %v6297_v39, %v6297_v39  ;;  %v6331_v38 = vsel %vm1070_vm4, %v3018_v4, 0.0  ;;  %v2041_v49 = vand.u32 31, %v1843_v42  ;;  %v1778_v47 = vmul.f32 %v5704_v6, %v1743_v24 }
 0x33a   : > { %v7657_v41 = vrot.slane %v6321_v23, 7  ;;  %v7658_v31 = vrot.slane %v6325_v37, 1  ;;  %v1844_v20 = vadd.s32 224, %v5012_v56  ;;  %v1532_v52 = vsel %vm6338_vm7, %v6227_v8, %v1528_v1 }
 0x33b   : > { %3115 = vadd.xlane.f32.xlu0 %v3080_v48  ;;  %2969 = vadd.xlane.f32.xlu2 %v6313_v10  ;;  %v3082_v48 = vmul.f32 %v6331_v38, %v6331_v38  ;;  %v2324_v4 = vrot.slane %v6325_v37, 7  ;;  %v6353_v57 = vadd.f32 %v5747_v11, %v1760_v13  ;;  %v1537_v29 = vsub.f32 1.5, %v1536_v18 }
 0x33c   : > { %vm6355_vm9 = vcmp.eq.s32.totalorder %v2041_v49, 31  ;;  %v7789_v28 = vrot.slane %v6145_v45, 1  ;;  %v6366_v8 = vadd.f32 %v5747_v11, %v1759_v27  ;;  %v6369_v42 = vadd.f32 %v5747_v11, %v1778_v47 }
 0x33d   : > { %v2331_v46 = vsel %vm2328_vm8, %v2324_v4, %v7657_v41  ;;  %v7661_v24 = vrot.slane %v6103_v51, 7  ;;  %v1726_v1 = vmul.f32 %v1532_v52, %v5631_v12  ;;  %v2680_v13 = vmul.f32 %v5046_v26, %v6145_v45 }
 0x33e   : > { %v2048_v18 = vand.u32 31, %v1844_v20  ;;  %v1538_v12 = vmul.f32 %v6272_v32, %v1537_v29  ;;  %v2649_v45 = vmul.f32 %v5068_v35, %v2331_v46  ;;  %v2469_v63 = vrot.slane %v6353_v57, 1 }
 0x33f   : > { %v1827_v20 = vadd.s32 88, %v5012_v56  ;;  %v7659_v52 = vrot.slane %v6366_v8, 1  ;;  %v2682_v29 = vmul.f32 %v5046_v26, %v6321_v23 }
 0x340   : > { %vm6434_vm1 = vcmp.eq.s32.totalorder %v2048_v18, 0 }
 0x341   : > { %v1929_v46 = vand.u32 31, %v1827_v20  ;;  %v2714_v20 = vadd.f32 %v2682_v29, %v2649_v45 }
 0x342   : > { %v2962_v43 = vpop.xlane.xlu1 %2961 }
 0x343   : > { %v3003_v33 = vmul.f32 0.015625, %v2962_v43  ;;  %3119 = vadd.xlane.f32.xlu2 %v3082_v48  ;;  %v7791_v43 = vrot.slane %v5989_v58, 7  ;;  %v7656_v48 = vrot.slane %v6369_v42, 1  ;;  %v2307_v58 = vrot.slane %v6366_v8, 7 }
 0x344   : > { %vm2275_vm14 = vcmp.eq.s32.totalorder %v1929_v46, 31  ;;  %v2308_v46 = vrot.slane %v6353_v57, 7 }
 0x345   : > { %v3035_v22 = vsub.f32 %v5912_v50, %v3003_v33  ;;  %v2493_v50 = vsel %vm2489_vm12, %v7789_v28, %v7658_v31  ;;  %v2333_v49 = vsel %vm2328_vm8, %v7791_v43, %v2323_v59  ;;  %v7660_v33 = vrot.slane %v6321_v23, 1 }
 0x346   : > { %v2613_v47 = vsel %vm6355_vm9, 0.0, %v2493_v50  ;;  %v2647_v28 = vmul.f32 %v5068_v35, %v2333_v49  ;;  %v2664_v31 = vmul.f32 %v5046_v26, %v6366_v8  ;;  %v7798_v43 = vrot.slane %v6007_v16, 7 }
 0x347   : > { %v6383_v27 = vsel %vm1070_vm4, %v3035_v22, 0.0  ;;  %v1761_v22 = vmul.f32 %v5704_v6, %v1726_v1  ;;  %v2491_v50 = vsel %vm2489_vm12, %v7660_v33, %v7656_v48  ;;  %v2349_v6 = vsel %vm2328_vm8, %v7661_v24, %v2307_v58 }
 0x348   : > { %7790 = vst [vmem:[#allocation44_spill] sm:$0xff] %v6383_v27  ;;  %v3099_v19 = vmul.f32 %v6383_v27, %v6383_v27  ;;  %v2509_v1 = vsel %vm2489_vm12, %v7659_v52, %v2469_v63  ;;  %v2747_v48 = vmul.f32 %v5070_v34, %v2491_v50  ;;  %v2631_v41 = vmul.f32 %v5068_v35, %v2349_v6 }
 0x349   : > { %v1542_v52 = vsel %vm6423_vm13, %v6272_v32, %v1538_v12  ;;  %v2597_v29 = vsel %vm2275_vm14, 0.0, %v2509_v1  ;;  %v3001_v6 = vmul.f32 0.015625, %v6221_v62  ;;  %v2745_v27 = vmul.f32 %v5070_v34, %v2613_v47 }
 0x34a   : > { %v2779_v45 = vadd.f32 %v2747_v48, %v2714_v20  ;;  %v2696_v50 = vadd.f32 %v2664_v31, %v2631_v41  ;;  %v2729_v32 = vmul.f32 %v5070_v34, %v2597_v29  ;;  %v2712_v18 = vadd.f32 %v2680_v13, %v2647_v28 }
 0x34b   : > { %3153 = vadd.xlane.f32.xlu2 %v3099_v19  ;;  %v6439_v19 = vadd.f32 %v5747_v11, %v1761_v22  ;;  %v2332_v11 = vsel %vm2328_vm8, %v2323_v59, %v2324_v4  ;;  %v7796_v22 = vld [vmem:[#allocation46_spill] sm:$0xff]  ;;  %v2348_v59 = vsel %vm2328_vm8, %v2307_v58, %v2308_v46  ;;  %v7797_v1 = vrot.slane %v6103_v51, 7 }
 0x34c   : > { %v2815_v12 = vadd.f32 %v6097_v55, %v2779_v45  ;;  %v1727_v48 = vmul.f32 %v1542_v52, %v7796_v22  ;;  %v2761_v62 = vadd.f32 %v2729_v32, %v2696_v50  ;;  %v2777_v58 = vadd.f32 %v2745_v27, %v2712_v18  ;;  %v4244_v45 = vld [vmem:[%s7545_s7] ss:$0 sm:$0xff] }
 0x34d   : > { %v2918_v49 = vpop.xlane.xlu0 %2917  ;;  %v2470_v47 = vrot.slane %v6439_v19, 1  ;;  %v2453_v20 = vsel %vm6434_vm1, 0.0, %v2332_v11  ;;  %v2665_v16 = vmul.f32 %v5046_v26, %v6353_v57  ;;  %v7799_v50 = vrot.slane %v6321_v23, 1 }
 0x34e   : > { %v2981_v33 = vmul.f32 0.015625, %v2918_v49  ;;  %vm2847_vm5 = vcmp.ge.f32.partialorder %v2815_v12, 0.0  ;;  %v2880_v13 = vmul.f32 %v5344_v21, %v2815_v12  ;;  %v7801_v11 = vrot.slane %v6366_v8, 1 }
 0x34f   : > { %v2508_v28 = vsel %vm2489_vm12, %v2469_v63, %v2470_v47  ;;  %v1762_v63 = vmul.f32 %v4244_v45, %v1727_v48  ;;  %v7802_v22 = vrot.slane %v6103_v51, 1 }
 0x350   : > { %v3013_v24 = vsub.f32 %v5991_v30, %v2981_v33  ;;  %v1828_v30 = vadd.s32 96, %v5012_v56  ;;  %v3033_v33 = vsub.f32 %v5685_v7, %v3001_v6  ;;  %v6464_v52 = vsel %vm2847_vm5, %v2815_v12, %v2880_v13 }
 0x351   : > { %v2350_v7 = vsel %vm2328_vm8, %v7798_v43, %v7797_v1  ;;  %v7800_v6 = vrot.slane %v6325_v37, 1  ;;  %v2730_v18 = vmul.f32 %v5070_v34, %v2508_v28  ;;  %v2510_v48 = vsel %vm2489_vm12, %v7802_v22, %v7801_v11  ;;  %v2964_v22 = vpop.xlane.xlu2 %2963 }
 0x352   : > { %v6452_v41 = vsel %vm1070_vm4, %v3013_v24, 0.0  ;;  %v1936_v4 = vand.u32 31, %v1828_v30  ;;  %v6493_v54 = vsel %vm1070_vm4, %v3033_v33, 0.0  ;;  %v2648_v30 = vmul.f32 %v5068_v35, %v2453_v20 }
 0x353   : > { %v3077_v31 = vmul.f32 %v6452_v41, %v6452_v41  ;;  %2975 = vadd.xlane.f32.xlu2 %v6464_v52  ;;  %v2492_v27 = vsel %vm2489_vm12, %v7800_v6, %v7799_v50  ;;  %v2813_v33 = vadd.f32 %v6097_v55, %v2777_v58  ;;  %v2630_v8 = vmul.f32 %v5068_v35, %v2350_v7  ;;  %v7803_v50 = vld [vmem:[#allocation48_spill] sm:$0xff] }
 0x354   : > { %vm2244_vm15 = vcmp.eq.s32.totalorder %v1936_v4, 0  ;;  %v2746_v1 = vmul.f32 %v5070_v34, %v2492_v27  ;;  %v2797_v43 = vadd.f32 %v6097_v55, %v2761_v62  ;;  %v2663_v7 = vmul.f32 %v5046_v26, %v6103_v51 }
 0x355   : > { %3109 = vadd.xlane.f32.xlu0 %v3077_v31  ;;  %v2926_v24 = vpop.xlane.xlu0 %2925  ;;  %v2437_v29 = vsel %vm2244_vm15, 0.0, %v2348_v59  ;;  %v1831_v31 = vadd.s32 120, %v5012_v56  ;;  %v4245_v59 = vld [vmem:[%s7546_s8] ss:$0 sm:$0xff]  ;;  %v2728_v58 = vmul.f32 %v5070_v34, %v2510_v48  ;;  %v7663_v6 = vrot.slane %v7803_v50, 1 }
 0x356   : > { %v2985_v49 = vmul.f32 0.015625, %v2926_v24  ;;  %v2632_v12 = vmul.f32 %v5068_v35, %v2437_v29  ;;  %v6516_v24 = vadd.f32 %v4245_v59, %v1762_v63  ;;  %v2878_v27 = vmul.f32 %v5344_v21, %v2813_v33  ;;  %v7805_v59 = vld [vmem:[#allocation42_spill] sm:$0xff] }
 0x357   : > { %v1957_v62 = vand.u32 31, %v1831_v31  ;;  %v2862_v51 = vmul.f32 %v5344_v21, %v2797_v43  ;;  %vm2845_vm2 = vcmp.ge.f32.partialorder %v2813_v33, 0.0  ;;  %vm2829_vm3 = vcmp.ge.f32.partialorder %v2797_v43, 0.0 }
 0x358   : > { %v3017_v32 = vsub.f32 %v6040_v0, %v2985_v49  ;;  %v2681_v0 = vmul.f32 %v5046_v26, %v6325_v37  ;;  %v2697_v4 = vadd.f32 %v2665_v16, %v2632_v12  ;;  %v3097_v37 = vmul.f32 %v6493_v54, %v6493_v54 }
 0x359   : > { %v2695_v16 = vadd.f32 %v2663_v7, %v2630_v8  ;;  %v2310_v12 = vrot.slane %v6516_v24, 7  ;;  %vm6555_vm6 = vcmp.eq.s32.totalorder %v1957_v62, 31 }
 0x35a   : > { %v6509_v13 = vsel %vm1070_vm4, %v3017_v32, 0.0  ;;  %v2762_v49 = vadd.f32 %v2730_v18, %v2697_v4  ;;  %v2713_v45 = vadd.f32 %v2681_v0, %v2648_v30  ;;  %v7804_v4 = vrot.slane %v7803_v50, 7 }
 0x35b   : > { %v3081_v28 = vmul.f32 %v6509_v13, %v6509_v13  ;;  %v2760_v11 = vadd.f32 %v2728_v58, %v2695_v16  ;;  %v2668_v58 = vmul.f32 %v5046_v26, %v7803_v50 }
 0x35c   : > { %v2798_v29 = vadd.f32 %v6097_v55, %v2762_v49  ;;  %v2778_v32 = vadd.f32 %v2746_v1, %v2713_v45  ;;  %v2345_v8 = vsel %vm2328_vm8, %v2310_v12, %v7804_v4  ;;  %v6552_v1 = vsel %vm2829_vm3, %v2797_v43, %v2862_v51 }
 0x35d   : > { %3149 = vadd.xlane.f32.xlu0 %v3097_v37  ;;  %3117 = vadd.xlane.f32.xlu1 %v3081_v28  ;;  %v2968_v20 = vpop.xlane.xlu1 %2967  ;;  %v2932_v0 = vpop.xlane.xlu0 %2931  ;;  %v7806_v37 = vrot.slane %v7805_v59, 1  ;;  %v6550_v28 = vsel %vm2845_vm2, %v2813_v33, %v2878_v27  ;;  %v2796_v49 = vadd.f32 %v6097_v55, %v2760_v11  ;;  %v2635_v43 = vmul.f32 %v5068_v35, %v2345_v8 }
 0x35e   : > { %v3006_v63 = vmul.f32 0.015625, %v2968_v20  ;;  %vm2830_vm0 = vcmp.ge.f32.partialorder %v2798_v29, 0.0  ;;  %v2863_v18 = vmul.f32 %v5344_v21, %v2798_v29  ;;  %v2814_v31 = vadd.f32 %v6097_v55, %v2778_v32 }
 0x35f   : > { %v2326_v20 = vrot.slane %v6369_v42, 7  ;;  %v1847_v45 = vadd.s32 248, %v5012_v56  ;;  %v7809_v27 = vrot.slane %v6321_v23, 7  ;;  %v2988_v62 = vmul.f32 0.015625, %v2932_v0 }
 0x360   : > { %v3038_v48 = vsub.f32 %v6080_v2, %v3006_v63  ;;  %v6534_v30 = vsel %vm2830_vm0, %v2798_v29, %v2863_v18  ;;  %v2505_v2 = vsel %vm2489_vm12, %v7663_v6, %v7806_v37  ;;  %v2488_v63 = vrot.slane %v5849_v53, 1  ;;  %v2930_v6 = vpop.xlane.xlu2 %2929 }
 0x361   : > { %2941 = vadd.xlane.f32.xlu2 %v6534_v30  ;;  %v3004_v29 = vmul.f32 0.015625, %v2964_v22  ;;  %vm2846_vm7 = vcmp.ge.f32.partialorder %v2814_v31, 0.0  ;;  %v2601_v16 = vsel %vm6555_vm6, 0.0, %v2505_v2  ;;  %v2330_v32 = vsel %vm2328_vm8, %v7809_v27, %v2326_v20 }
 0x362   : > { %v6566_v33 = vsel %vm1070_vm4, %v3038_v48, 0.0  ;;  %v2861_v18 = vmul.f32 %v5344_v21, %v2796_v49  ;;  %v2879_v11 = vmul.f32 %v5344_v21, %v2814_v31  ;;  %v2309_v48 = vrot.slane %v6439_v19, 7 }
 0x363   : > { %vm2828_vm9 = vcmp.ge.f32.partialorder %v2796_v49, 0.0  ;;  %v3102_v22 = vmul.f32 %v6566_v33, %v6566_v33  ;;  %v2650_v8 = vmul.f32 %v5068_v35, %v2330_v32  ;;  %v2700_v59 = vadd.f32 %v2668_v58, %v2635_v43 }
 0x364   : > { %v2069_v23 = vand.u32 31, %v1847_v45  ;;  %v7810_v37 = vrot.slane %v6369_v42, 1  ;;  %v3036_v2 = vsub.f32 %v5926_v60, %v3004_v29  ;;  %v2733_v27 = vmul.f32 %v5070_v34, %v2601_v16 }
 0x365   : > { %2971 = vadd.xlane.f32.xlu0 %v6550_v28  ;;  %2939 = vadd.xlane.f32.xlu1 %v6552_v1  ;;  %v3020_v32 = vsub.f32 %v6078_v40, %v2988_v62  ;;  %v6593_v58 = vsel %vm2828_vm9, %v2796_v49, %v2861_v18  ;;  %v6596_v43 = vsel %vm2846_vm7, %v2814_v31, %v2879_v11  ;;  %v2987_v16 = vmul.f32 0.015625, %v2930_v6 }
 0x366   : > { %v2490_v0 = vsel %vm2489_vm12, %v7810_v37, %v2488_v63  ;;  %v2347_v60 = vsel %vm2328_vm8, %v2308_v46, %v2309_v48  ;;  %v2765_v57 = vadd.f32 %v2733_v27, %v2700_v59  ;;  %v7812_v46 = vrot.slane %v5034_v25, 1 }
 0x367   : > { %v2934_v51 = vpop.xlane.xlu1 %2933  ;;  %v2748_v45 = vmul.f32 %v5070_v34, %v2490_v0  ;;  %v6619_v62 = vsel %vm1070_vm4, %v3036_v2, 0.0  ;;  %vm6621_vm10 = vcmp.eq.s32.totalorder %v2069_v23, 31  ;;  %v2633_v25 = vmul.f32 %v5068_v35, %v2347_v60 }
 0x368   : > { %v2989_v4 = vmul.f32 0.015625, %v2934_v51  ;;  %v2683_v51 = vmul.f32 %v5046_v26, %v6369_v42  ;;  %v7811_v42 = vrot.slane %v5849_v53, 7  ;;  %v2521_v29 = vsel %vm2489_vm12, %v2488_v63, %v7812_v46 }
 0x369   : > { %3159 = vadd.xlane.f32.xlu2 %v3102_v22  ;;  %v2471_v63 = vrot.slane %v6516_v24, 1  ;;  %v2666_v59 = vmul.f32 %v5046_v26, %v6439_v19  ;;  %v2617_v23 = vsel %vm6621_vm10, 0.0, %v2521_v29  ;;  %v2684_v37 = vmul.f32 %v5046_v26, %v5849_v53 }
 0x36a   : > { %v3021_v7 = vsub.f32 %v6110_v61, %v2989_v4  ;;  %v2966_v61 = vpop.xlane.xlu0 %2965  ;;  %v2329_v40 = vsel %vm2328_vm8, %v2326_v20, %v7811_v42  ;;  %v2715_v49 = vadd.f32 %v2683_v51, %v2650_v8  ;;  %v6627_v4 = vsel %vm1070_vm4, %v3020_v32, 0.0 }
 0x36b   : > { %v3005_v11 = vmul.f32 0.015625, %v2966_v61  ;;  %v2651_v22 = vmul.f32 %v5068_v35, %v2329_v40  ;;  %v2801_v8 = vadd.f32 %v6097_v55, %v2765_v57  ;;  %v3019_v0 = vsub.f32 %v6001_v9, %v2987_v16 }
 0x36c   : > { %v6611_v31 = vsel %vm1070_vm4, %v3021_v7, 0.0  ;;  %v2780_v18 = vadd.f32 %v2748_v45, %v2715_v49  ;;  %v3100_v2 = vmul.f32 %v6619_v62, %v6619_v62  ;;  %v3084_v7 = vmul.f32 %v6627_v4, %v6627_v4 }
 0x36d   : > { %2937 = vadd.xlane.f32.xlu0 %v6593_v58  ;;  %2973 = vadd.xlane.f32.xlu1 %v6596_v43  ;;  %v3085_v6 = vmul.f32 %v6611_v31, %v6611_v31  ;;  %v2507_v27 = vsel %vm2489_vm12, %v2470_v47, %v2471_v63  ;;  %v3037_v51 = vsub.f32 %v6105_v17, %v3005_v11  ;;  %v6660_v47 = vsel %vm1070_vm4, %v3019_v0, 0.0 }
 0x36e   : > { %v2698_v32 = vadd.f32 %v2666_v59, %v2633_v25  ;;  %v2716_v60 = vadd.f32 %v2684_v37, %v2651_v22  ;;  %v2346_v53 = vsel %vm2328_vm8, %v2309_v48, %v2310_v12  ;;  %v2866_v9 = vmul.f32 %v5344_v21, %v2801_v8  ;;  %v4073_v37 = vld [vmem:[%s7551_s13 + $0x28] sm:$0xff] }
 0x36f   : > { %v2731_v61 = vmul.f32 %v5070_v34, %v2507_v27  ;;  %v2749_v19 = vmul.f32 %v5070_v34, %v2617_v23  ;;  %vm2833_vm11 = vcmp.ge.f32.partialorder %v2801_v8, 0.0  ;;  %v6664_v17 = vsel %vm1070_vm4, %v3037_v51, 0.0  ;;  %v4072_v27 = vld [vmem:[%s7551_s13 + $0x20] sm:$0xff] }
 0x370   : > { %v2634_v49 = vmul.f32 %v5068_v35, %v2346_v53  ;;  %v6667_v12 = vsel %vm2833_vm11, %v2801_v8, %v2866_v9  ;;  %v2667_v48 = vmul.f32 %v5046_v26, %v6516_v24  ;;  %v3083_v45 = vmul.f32 %v6660_v47, %v6660_v47 }
 0x371   : > { %3125 = vadd.xlane.f32.xlu2 %v3085_v6  ;;  %v2763_v42 = vadd.f32 %v2731_v61, %v2698_v32  ;;  %v2781_v40 = vadd.f32 %v2749_v19, %v2716_v60  ;;  %v3101_v57 = vmul.f32 %v6664_v17, %v6664_v17  ;;  %v7815_v46 = vrot.slane %v7803_v50, 1 }
 0x372   : > { %v2699_v20 = vadd.f32 %v2667_v48, %v2634_v49  ;;  %v2816_v22 = vadd.f32 %v6097_v55, %v2780_v18  ;;  %v3114_v18 = vpop.xlane.xlu2 %3113 }
 0x373   : > { %v2506_v29 = vsel %vm2489_vm12, %v2471_v63, %v7815_v46  ;;  %v2799_v35 = vadd.f32 %v6097_v55, %v2763_v42  ;;  %v2817_v16 = vadd.f32 %v6097_v55, %v2781_v40 }
 0x374   : > { %v2732_v26 = vmul.f32 %v5070_v34, %v2506_v29  ;;  %v2881_v34 = vmul.f32 %v5344_v21, %v2816_v22  ;;  %vm2848_vm12 = vcmp.ge.f32.partialorder %v2816_v22, 0.0 }
 0x375   : > { %3155 = vadd.xlane.f32.xlu0 %v3100_v2  ;;  %3123 = vadd.xlane.f32.xlu1 %v3084_v7  ;;  %v2864_v24 = vmul.f32 %v5344_v21, %v2799_v35  ;;  %v2882_v11 = vmul.f32 %v5344_v21, %v2817_v16  ;;  %vm2831_vm8 = vcmp.ge.f32.partialorder %v2799_v35, 0.0  ;;  %vm2849_vm13 = vcmp.ge.f32.partialorder %v2817_v16, 0.0 }
 0x376   : > { %v2764_v25 = vadd.f32 %v2732_v26, %v2699_v20  ;;  %v6695_v8 = vsel %vm2848_vm12, %v2816_v22, %v2881_v34 }
 0x377   : > { %v6685_v50 = vsel %vm2831_vm8, %v2799_v35, %v2864_v24  ;;  %v6687_v56 = vsel %vm2849_vm13, %v2817_v16, %v2882_v11  ;;  %v3175_v35 = vmul.f32 0.015625, %v3114_v18 }
 0x378   : > { %v2800_v6 = vadd.f32 %v6097_v55, %v2764_v25  ;;  %v4075_v55 = vld [vmem:[%s7551_s13 + $0x38] sm:$0xff] }
 0x379   : > { %2947 = vadd.xlane.f32.xlu2 %v6667_v12  ;;  %4084 = vmatpush.bf16.msra.mxu3 %v4075_v55  ;;  %v6738_v11 = vadd.f32 1e-05, %v3175_v35 }
 0x37a   : > { %v2865_v63 = vmul.f32 %v5344_v21, %v2800_v6  ;;  %vm2832_vm14 = vcmp.ge.f32.partialorder %v2800_v6, 0.0  ;;  %3739 = vmatpush.bf16.msra.mxu1 %v4075_v55  ;;  %v3148_v23 = vpop.xlane.xlu2 %3147  ;;  %v4074_v21 = vld [vmem:[%s7551_s13 + $0x30] sm:$0xff] }
 0x37b   : > { %v3192_v32 = vmul.f32 0.015625, %v3148_v23  ;;  %vm3263_vm12 = vweird.f32 %v6738_v11 }
 0x37c   : > { %v6697_v59 = vsel %vm2832_vm14, %v2800_v6, %v2865_v63 }
 0x37d   : > { %3121 = vadd.xlane.f32.xlu0 %v3083_v45  ;;  %3157 = vadd.xlane.f32.xlu1 %v3101_v57  ;;  %v6718_v40 = vadd.f32 1e-05, %v3192_v32  ;;  %v4071_v45 = vld [vmem:[%s7551_s13 + $0x18] sm:$0xff] }
 0x37e   : > { %4085 = vmatpush.bf16.msra.mxu3 %v4074_v21  ;;  %3740 = vmatpush.bf16.msra.mxu1 %v4074_v21 }
 0x37f   : > { %vm3433_vm7 = vweird.f32 %v6718_v40 }
 0x382   : > { %4086 = vmatpush.bf16.msra.mxu3 %v4073_v37  ;;  %3741 = vmatpush.bf16.msra.mxu1 %v4073_v37 }
 0x385   : > { %2943 = vadd.xlane.f32.xlu0 %v6685_v50  ;;  %2979 = vadd.xlane.f32.xlu1 %v6687_v56 }
 0x386   : > { %4087 = vmatpush.bf16.msra.mxu3 %v4072_v27  ;;  %3742 = vmatpush.bf16.msra.mxu1 %v4072_v27 }
 0x38a   : > { %4088 = vmatpush.bf16.msra.mxu3 %v4071_v45  ;;  %3743 = vmatpush.bf16.msra.mxu1 %v4071_v45 }
 0x38d   : > { %2977 = vadd.xlane.f32.xlu0 %v6695_v8  ;;  %2945 = vadd.xlane.f32.xlu1 %v6697_v59 }
 0x394   : > { %v3112_v0 = vpop.xlane.xlu1 %3111 }
 0x395   : > { %v3174_v6 = vmul.f32 0.015625, %v3112_v0 }
 0x397   : > { %v6755_v21 = vadd.f32 1e-05, %v3174_v6 }
 0x39c   : > { %v3146_v61 = vpop.xlane.xlu1 %3145 }
 0x39d   : > { %v3191_v48 = vmul.f32 0.015625, %v3146_v61 }
 0x39e   : > { %v3142_v2 = vpop.xlane.xlu2 %3141 }
 0x39f   : > { %v3189_v7 = vmul.f32 0.015625, %v3142_v2 }
 0x3a1   : > { %v6713_v51 = vadd.f32 1e-05, %v3189_v7 }
 0x3a3   : > { %4177 = vrsqrt.f32 %v6713_v51  ;;  %vm3403_vm15 = vweird.f32 %v6713_v51 }
 0x3a6   : > { %v3144_v60 = vpop.xlane.xlu0 %3143  ;;  %v2936_v53 = vpop.xlane.xlu2 %2935 }
 0x3a7   : > { %v3190_v9 = vmul.f32 0.015625, %v3144_v60  ;;  %v2990_v19 = vmul.f32 0.015625, %v2936_v53  ;;  %v3152_v37 = vpop.xlane.xlu1 %3151 }
 0x3a8   : > { %v3194_v32 = vmul.f32 0.015625, %v3152_v37 }
 0x3a9   : > { %v6716_v42 = vadd.f32 1e-05, %v3190_v9  ;;  %v3022_v49 = vsub.f32 %v6265_v3, %v2990_v19  ;;  %v6729_v46 = vpop.eup %4177  ;;  %v6734_v3 = vadd.f32 1e-05, %v3191_v48  ;;  %v4070_v9 = vld [vmem:[%s7551_s13 + $0x10] sm:$0xff] }
 0x3aa   : > { %v3398_v20 = vmul.f32 %v6729_v46, %v6713_v51  ;;  %4089 = vmatpush.bf16.msra.mxu3 %v4070_v9  ;;  %3744 = vmatpush.bf16.msra.mxu1 %v4070_v9  ;;  %v6771_v35 = vadd.f32 1e-05, %v3194_v32  ;;  %vm3404_vm1 = vweird.f32 %v6729_v46  ;;  %v4068_v51 = vld [vmem:[%s7551_s13] sm:$0xff] }
 0x3ab   : > { %4179 = vrsqrt.f32 %v6716_v42  ;;  %v6727_v57 = vsel %vm1070_vm4, %v3022_v49, 0.0  ;;  %vm3405_vm0 = vmor %vm3403_vm15, %vm3404_vm1  ;;  %vm3413_vm2 = vweird.f32 %v6716_v42  ;;  %v6798_v9 = vld [vmem:[%s7549_s11] ss:$0 sm:$0xff]  ;;  %vm3423_vm11 = vweird.f32 %v6734_v3 }
 0x3ac   : > { %v3086_v29 = vmul.f32 %v6727_v57, %v6727_v57  ;;  %4181 = vrsqrt.f32 %v6718_v40  ;;  %v3399_v63 = vmul.f32 %v6729_v46, %v3398_v20 }
 0x3ad   : > { %4183 = vrsqrt.f32 %v6734_v3 }
 0x3ae   : > { %v2970_v16 = vpop.xlane.xlu2 %2969  ;;  %3127 = vadd.xlane.f32.xlu0 %v3086_v29  ;;  %4185 = vrsqrt.f32 %v6738_v11  ;;  %v3400_v2 = vmul.f32 0.5, %v3399_v63  ;;  %v3116_v60 = vpop.xlane.xlu0 %3115  ;;  %v4069_v29 = vld [vmem:[%s7551_s13 + $0x8] sm:$0xff] }
 0x3af   : > { %v3007_v26 = vmul.f32 0.015625, %v2970_v16  ;;  %4187 = vrsqrt.f32 %v6755_v21  ;;  %v3176_v45 = vmul.f32 0.015625, %v3116_v60  ;;  %4090 = vmatpush.bf16.msra.mxu3 %v4069_v29  ;;  %3745 = vmatpush.bf16.msra.mxu1 %v4069_v29 }
 0x3b0   : > { %v3401_v19 = vsub.f32 1.5, %v3400_v2  ;;  %4189 = vrsqrt.f32 %v6771_v35 }
 0x3b1   : > { %v4180_v24 = vpop.eup %4179  ;;  %v3039_v22 = vsub.f32 %v6313_v10, %v3007_v26  ;;  %v6781_v63 = vadd.f32 1e-05, %v3176_v45 }
 0x3b2   : > { %v3408_v25 = vmul.f32 %v4180_v24, %v6716_v42  ;;  %v6743_v34 = vpop.eup %4181  ;;  %v3402_v26 = vmul.f32 %v6729_v46, %v3401_v19  ;;  %vm3414_vm5 = vweird.f32 %v4180_v24 }
 0x3b3   : > { %v6748_v55 = vsel %vm1070_vm4, %v3039_v22, 0.0  ;;  %v3428_v10 = vmul.f32 %v6743_v34, %v6718_v40  ;;  %v6757_v27 = vpop.eup %4183  ;;  %vm3415_vm3 = vmor %vm3413_vm2, %vm3414_vm5  ;;  %4191 = vrsqrt.f32 %v6781_v63  ;;  %4091 = vmatpush.bf16.msra.mxu3 %v4068_v51  ;;  %3746 = vmatpush.bf16.msra.mxu1 %v4068_v51  ;;  %vm3434_vm6 = vweird.f32 %v6743_v34 }
 0x3b4   : > { %v3409_v18 = vmul.f32 %v4180_v24, %v3408_v25  ;;  %7816 = vst [vmem:[#allocation39_spill] sm:$0xff] %v6748_v55  ;;  %v3103_v23 = vmul.f32 %v6748_v55, %v6748_v55  ;;  %v6764_v61 = vpop.eup %4185  ;;  %v3418_v49 = vmul.f32 %v6757_v27, %v6734_v3  ;;  %vm6821_vm9 = vmor %vm3433_vm7, %vm3434_vm6  ;;  %vm3424_vm10 = vweird.f32 %v6757_v27 }
 0x3b5   : > { %v3429_v53 = vmul.f32 %v6743_v34, %v3428_v10  ;;  %v3258_v16 = vmul.f32 %v6764_v61, %v6738_v11  ;;  %v6778_v6 = vpop.eup %4187  ;;  %vm3425_vm8 = vmor %vm3423_vm11, %vm3424_vm10  ;;  %vm3264_vm13 = vweird.f32 %v6764_v61  ;;  %vm3253_vm5 = vweird.f32 %v6755_v21 }
 0x3b6   : > { %v3120_v0 = vpop.xlane.xlu2 %3119  ;;  %3161 = vadd.xlane.f32.xlu0 %v3103_v23  ;;  %v3410_v7 = vmul.f32 0.5, %v3409_v18  ;;  %v3419_v25 = vmul.f32 %v6757_v27, %v3418_v49  ;;  %v3248_v37 = vmul.f32 %v6778_v6, %v6755_v21  ;;  %vm3254_vm14 = vweird.f32 %v6778_v6  ;;  %vm6867_vm1 = vmor %vm3263_vm12, %vm3264_vm13 }
 0x3b7   : > { %v3430_v20 = vmul.f32 0.5, %v3429_v53  ;;  %v3259_v23 = vmul.f32 %v6764_v61, %v3258_v16  ;;  %v3178_v60 = vmul.f32 0.015625, %v3120_v0  ;;  %vm6881_vm15 = vmor %vm3253_vm5, %vm3254_vm14  ;;  %vm3453_vm6 = vweird.f32 %v6771_v35 }
 0x3b8   : > { %v3411_v48 = vsub.f32 1.5, %v3410_v7  ;;  %v3420_v2 = vmul.f32 0.5, %v3419_v25  ;;  %v3406_v7 = vsel %vm3405_vm0, %v6729_v46, %v3402_v26  ;;  %v3249_v0 = vmul.f32 %v6778_v6, %v3248_v37 }
 0x3b9   : > { %v3431_v10 = vsub.f32 1.5, %v3430_v20  ;;  %v3573_v42 = vmul.f32 %v3406_v7, %v6214_v44  ;;  %v6807_v44 = vpop.eup %4189  ;;  %v3260_v45 = vmul.f32 0.5, %v3259_v23  ;;  %v6812_v16 = vadd.f32 1e-05, %v3178_v60 }
 0x3ba   : > { %v3412_v22 = vmul.f32 %v4180_v24, %v3411_v48  ;;  %v3421_v29 = vsub.f32 1.5, %v3420_v2  ;;  %v3448_v23 = vmul.f32 %v6807_v44, %v6771_v35  ;;  %v3250_v2 = vmul.f32 0.5, %v3249_v0 }
 0x3bb   : > { %v3608_v49 = vmul.f32 %v6798_v9, %v3573_v42  ;;  %v3261_v7 = vsub.f32 1.5, %v3260_v45  ;;  %vm3454_vm0 = vweird.f32 %v6807_v44  ;;  %vm3273_vm7 = vweird.f32 %v6781_v63 }
 0x3bc   : > { %v3416_v32 = vsel %vm3415_vm3, %v4180_v24, %v3412_v22  ;;  %v6805_v24 = vld [vmem:[%s7550_s12] ss:$0 sm:$0xff]  ;;  %v6819_v22 = vpop.eup %4191  ;;  %v3449_v42 = vmul.f32 %v6807_v44, %v3448_v23 }
 0x3bd   : > { %v3574_v53 = vmul.f32 %v3416_v32, %v6247_v5  ;;  %v3432_v5 = vmul.f32 %v6743_v34, %v3431_v10  ;;  %v3643_v25 = vadd.f32 %v6805_v24, %v3608_v49  ;;  %v3422_v32 = vmul.f32 %v6757_v27, %v3421_v29 }
 0x3be   : > { %v3154_v18 = vpop.xlane.xlu2 %3153  ;;  %v3268_v60 = vmul.f32 %v6819_v22, %v6781_v63  ;;  %v3450_v23 = vmul.f32 0.5, %v3449_v42  ;;  %vm3274_vm2 = vweird.f32 %v6819_v22 }
 0x3bf   : > { %v3609_v46 = vmul.f32 %v6798_v9, %v3574_v53  ;;  %v3436_v40 = vsel %vm6821_vm9, %v6743_v34, %v3432_v5  ;;  %v3195_v53 = vmul.f32 0.015625, %v3154_v18  ;;  %v3426_v45 = vsel %vm3425_vm8, %v6757_v27, %v3422_v32  ;;  %vm6951_vm8 = vmor %vm3453_vm6, %vm3454_vm0 }
 0x3c0   : > { %v3576_v34 = vmul.f32 %v3436_v40, %v6071_v15  ;;  %v3269_v3 = vmul.f32 %v6819_v22, %v3268_v60  ;;  %v7819_v15 = vld [vmem:[#allocation38_spill] sm:$0xff]  ;;  %vm6962_vm12 = vmor %vm3273_vm7, %vm3274_vm2  ;;  %vm3293_vm2 = vweird.f32 %v6812_v16 }
 0x3c1   : > { %v3644_v20 = vadd.f32 %v6805_v24, %v3609_v46  ;;  %v3251_v46 = vsub.f32 1.5, %v3250_v2 }
 0x3c2   : > { %v3611_v27 = vmul.f32 %v6798_v9, %v3576_v34  ;;  %v3270_v11 = vmul.f32 0.5, %v3269_v3  ;;  %v3451_v34 = vsub.f32 1.5, %v3450_v23 }
 0x3c3   : > { %v3667_v51 = vpack.c.bf16 %v3644_v20, %v3643_v25  ;;  %v3575_v25 = vmul.f32 %v3426_v45, %v7819_v15  ;;  %v3252_v40 = vmul.f32 %v6778_v6, %v3251_v46 }
 0x3c4   : > { %v3646_v21 = vadd.f32 %v6805_v24, %v3611_v27  ;;  %v3271_v27 = vsub.f32 1.5, %v3270_v11 }
 0x3c5   : > { %3787 = vmatmul.bf16.vlgmr.msra.gmra.mxu3 %v3667_v51  ;;  %v6858_v51 = vadd.f32 1e-05, %v3195_v53  ;;  %v3610_v42 = vmul.f32 %v6798_v9, %v3575_v25  ;;  %v3256_v15 = vsel %vm6881_vm15, %v6778_v6, %v3252_v40 }
 0x3c6   : > { %v6827_v37 = vpop.xlane.xlu2 %2975 }
 0x3c7   : > { %v3645_v25 = vadd.f32 %v6805_v24, %v3610_v42  ;;  %v7824_v42 = vld [vmem:[#allocation43_spill] sm:$0xff]  ;;  %vm3463_vm7 = vweird.f32 %v6858_v51 }
 0x3c8   : > { %v3110_v19 = vpop.xlane.xlu0 %3109 }
 0x3c9   : > { %v3173_v48 = vmul.f32 0.015625, %v3110_v19 }
 0x3cb   : > { %v6816_v26 = vadd.f32 1e-05, %v3173_v48  ;;  %v6842_v48 = vmul.f32 %v6764_v61, %v3261_v7 }
 0x3cd   : > { %4193 = vrsqrt.f32 %v6816_v26  ;;  %vm3243_vm9 = vweird.f32 %v6816_v26 }
 0x3ce   : > { %4195 = vrsqrt.f32 %v6812_v16 }
 0x3d0   : > { %v3118_v19 = vpop.xlane.xlu1 %3117  ;;  %v3150_v49 = vpop.xlane.xlu0 %3149 }
 0x3d1   : > { %v3177_v5 = vmul.f32 0.015625, %v3118_v19  ;;  %v3193_v0 = vmul.f32 0.015625, %v3150_v49 }
 0x3d3   : > { %v6846_v29 = vpop.eup %4193  ;;  %v6849_v18 = vadd.f32 1e-05, %v3177_v5  ;;  %v6851_v20 = vadd.f32 1e-05, %v3193_v0 }
 0x3d4   : > { %v6854_v10 = vpop.eup %4195  ;;  %v3238_v2 = vmul.f32 %v6846_v29, %v6816_v26  ;;  %v2942_v60 = vpop.xlane.xlu2 %2941  ;;  %vm3244_vm3 = vweird.f32 %v6846_v29 }
 0x3d5   : > { %4197 = vrsqrt.f32 %v6849_v18  ;;  %v3288_v53 = vmul.f32 %v6854_v10, %v6812_v16  ;;  %vm3245_vm10 = vmor %vm3243_vm9, %vm3244_vm3  ;;  %vm3443_vm13 = vweird.f32 %v6851_v20  ;;  %vm3283_vm15 = vweird.f32 %v6849_v18 }
 0x3d6   : > { %v3239_v32 = vmul.f32 %v6846_v29, %v3238_v2  ;;  %4199 = vrsqrt.f32 %v6851_v20  ;;  %v2993_v2 = vmul.f32 0.015625, %v2942_v60 }
 0x3d7   : > { %4201 = vrsqrt.f32 %v6858_v51 }
 0x3d8   : > { %v3240_v46 = vmul.f32 0.5, %v3239_v32  ;;  %v2940_v5 = vpop.xlane.xlu1 %2939  ;;  %v2972_v0 = vpop.xlane.xlu0 %2971  ;;  %v3025_v26 = vsub.f32 %v6534_v30, %v2993_v2 }
 0x3d9   : > { %v2992_v45 = vmul.f32 0.015625, %v2940_v5  ;;  %v3008_v3 = vmul.f32 0.015625, %v2972_v0  ;;  %v3289_v5 = vmul.f32 %v6854_v10, %v3288_v53  ;;  %v3668_v53 = vpack.c.bf16 %v3646_v21, %v3645_v25 }
 0x3da   : > { %v3241_v23 = vsub.f32 1.5, %v3240_v46  ;;  %v3558_v46 = vmul.f32 %v3256_v15, %v7824_v42  ;;  %v3272_v25 = vmul.f32 %v6819_v22, %v3271_v27  ;;  %v3010_v27 = vmul.f32 0.015625, %v6827_v37 }
 0x3db   : > { %v6894_v32 = vpop.eup %4197  ;;  %v3024_v0 = vsub.f32 %v6552_v1, %v2992_v45  ;;  %v3040_v49 = vsub.f32 %v6550_v28, %v3008_v3  ;;  %3792 = vmatmul.bf16.gmra.mxu3 %v3668_v53  ;;  %v6930_v30 = vmul.f32 0.5, %v3289_v5  ;;  %v6941_v5 = vsel %vm1070_vm4, %v3025_v26, 0.0 }
 0x3dc   : > { %v6900_v6 = vpop.eup %4199  ;;  %v3242_v40 = vmul.f32 %v6846_v29, %v3241_v23  ;;  %v3278_v60 = vmul.f32 %v6894_v32, %v6849_v18  ;;  %v3160_v23 = vpop.xlane.xlu2 %3159  ;;  %v3089_v63 = vmul.f32 %v6941_v5, %v6941_v5  ;;  %vm3284_vm5 = vweird.f32 %v6894_v32 }
 0x3dd   : > { %v3438_v11 = vmul.f32 %v6900_v6, %v6851_v20  ;;  %v6912_v28 = vsel %vm1070_vm4, %v3024_v0, 0.0  ;;  %v6916_v1 = vsel %vm1070_vm4, %v3040_v49, 0.0  ;;  %v6918_v45 = vpop.eup %4201  ;;  %v3452_v0 = vmul.f32 %v6807_v44, %v3451_v34  ;;  %vm7029_vm0 = vmor %vm3283_vm15, %vm3284_vm5 }
 0x3de   : > { %7825 = vst [vmem:[#allocation47_spill] sm:$0xff] %v6912_v28  ;;  %v3088_v3 = vmul.f32 %v6912_v28, %v6912_v28  ;;  %v3104_v15 = vmul.f32 %v6916_v1, %v6916_v1  ;;  %v3246_v42 = vsel %vm3245_vm10, %v6846_v29, %v3242_v40  ;;  %v3198_v49 = vmul.f32 0.015625, %v3160_v23 }
 0x3df   : > { %7826 = vst [vmem:[#allocation37_spill] sm:$0xff] %v6916_v1  ;;  %v3439_v19 = vmul.f32 %v6900_v6, %v3438_v11  ;;  %v3557_v21 = vmul.f32 %v3246_v42, %v6452_v41  ;;  %v3279_v2 = vmul.f32 %v6894_v32, %v3278_v60  ;;  %v3593_v29 = vmul.f32 %v6798_v9, %v3558_v46 }
 0x3e0   : > { %3131 = vadd.xlane.f32.xlu0 %v3088_v3  ;;  %v2974_v28 = vpop.xlane.xlu1 %2973  ;;  %3163 = vadd.xlane.f32.xlu1 %v3104_v15  ;;  %v2938_v1 = vpop.xlane.xlu0 %2937  ;;  %v6934_v11 = vadd.f32 1e-05, %v3198_v49  ;;  %v3458_v41 = vmul.f32 %v6918_v45, %v6858_v51  ;;  %vm3444_vm11 = vweird.f32 %v6900_v6  ;;  %v3042_v23 = vsub.f32 %v6464_v52, %v3010_v27 }
 0x3e1   : > { %v3440_v40 = vmul.f32 0.5, %v3439_v19  ;;  %v3009_v34 = vmul.f32 0.015625, %v2974_v28  ;;  %v2991_v55 = vmul.f32 0.015625, %v2938_v1  ;;  %v3592_v60 = vmul.f32 %v6798_v9, %v3557_v21  ;;  %vm3445_vm14 = vmor %vm3443_vm13, %vm3444_vm11 }
 0x3e2   : > { %v3280_v37 = vmul.f32 0.5, %v3279_v2  ;;  %v3628_v26 = vadd.f32 %v6805_v24, %v3593_v29  ;;  %4203 = vrsqrt.f32 %v6934_v11  ;;  %v3276_v42 = vsel %vm6962_vm12, %v6819_v22, %v3272_v25 }
 0x3e3   : > { %v3441_v53 = vsub.f32 1.5, %v3440_v40  ;;  %v3041_v19 = vsub.f32 %v6596_v43, %v3009_v34  ;;  %v3023_v46 = vsub.f32 %v6593_v58, %v2991_v55  ;;  %v3627_v1 = vadd.f32 %v6805_v24, %v3592_v60 }
 0x3e4   : > { %v3456_v21 = vsel %vm6951_vm8, %v6807_v44, %v3452_v0  ;;  %v3459_v2 = vmul.f32 %v6918_v45, %v3458_v41  ;;  %v3281_v27 = vsub.f32 1.5, %v3280_v37  ;;  %v3291_v0 = vsub.f32 1.5, %v6930_v30 }
 0x3e5   : > { %v3442_v43 = vmul.f32 %v6900_v6, %v3441_v53  ;;  %v6969_v55 = vsel %vm1070_vm4, %v3041_v19, 0.0  ;;  %v6973_v35 = vsel %vm1070_vm4, %v3023_v46, 0.0  ;;  %v3659_v20 = vpack.c.bf16 %v3628_v26, %v3627_v1  ;;  %v7025_v26 = vpop.xlane.xlu2 %3125 }
 0x3e6   : > { %v3105_v3 = vmul.f32 %v6969_v55, %v6969_v55  ;;  %v3087_v15 = vmul.f32 %v6973_v35, %v6973_v35  ;;  %v3578_v52 = vmul.f32 %v3456_v21, %v6255_v14  ;;  %v7832_v14 = vsel %vm6867_vm1, %v6764_v61, %v6842_v48 }
 0x3e7   : > { %v3446_v49 = vsel %vm3445_vm14, %v6900_v6, %v3442_v43  ;;  %3747 = vmatmul.bf16.vlgmr.msra.gmra.mxu1 %v3659_v20  ;;  %v3560_v6 = vmul.f32 %v3276_v42, %v6297_v39  ;;  %v3460_v46 = vmul.f32 0.5, %v3459_v2  ;;  %v7010_v39 = vsel %vm1070_vm4, %v3042_v23, 0.0 }
 0x3e8   : > { %3133 = vadd.xlane.f32.xlu0 %v3089_v63  ;;  %v3124_v29 = vpop.xlane.xlu1 %3123  ;;  %v3156_v40 = vpop.xlane.xlu0 %3155  ;;  %v3577_v34 = vmul.f32 %v3446_v49, %v6493_v54  ;;  %3165 = vadd.xlane.f32.xlu1 %v3105_v3  ;;  %v7831_v54 = vld [vmem:[#allocation36_spill] sm:$0xff]  ;;  %v3613_v28 = vmul.f32 %v6798_v9, %v3578_v52  ;;  %v3282_v37 = vmul.f32 %v6894_v32, %v3281_v27  ;;  %vm3294_vm1 = vweird.f32 %v6854_v10 }
 0x3e9   : > { %v3180_v60 = vmul.f32 0.015625, %v3124_v29  ;;  %3129 = vadd.xlane.f32.xlu2 %v3087_v15  ;;  %v3196_v22 = vmul.f32 0.015625, %v3156_v40  ;;  %v6995_v44 = vpop.eup %4203  ;;  %v3559_v19 = vmul.f32 %v7832_v14, %v7831_v54  ;;  %v3595_v61 = vmul.f32 %v6798_v9, %v3560_v6  ;;  %vm7040_vm3 = vmor %vm3293_vm2, %vm3294_vm1 }
 0x3ea   : > { %v3612_v25 = vmul.f32 %v6798_v9, %v3577_v34  ;;  %v3488_v7 = vmul.f32 %v6995_v44, %v6934_v11  ;;  %v3648_v48 = vadd.f32 %v6805_v24, %v3613_v28  ;;  %v3292_v1 = vmul.f32 %v6854_v10, %v3291_v0 }
 0x3eb   : > { %v6998_v41 = vadd.f32 1e-05, %v3180_v60  ;;  %v7000_v53 = vadd.f32 1e-05, %v3196_v22  ;;  %v3106_v58 = vmul.f32 %v7010_v39, %v7010_v39  ;;  %v3461_v43 = vsub.f32 1.5, %v3460_v46 }
 0x3ec   : > { %v3647_v30 = vadd.f32 %v6805_v24, %v3612_v25  ;;  %v3594_v15 = vmul.f32 %v6798_v9, %v3559_v19  ;;  %v3286_v49 = vsel %vm7029_vm0, %v6894_v32, %v3282_v37  ;;  %v3489_v2 = vmul.f32 %v6995_v44, %v3488_v7 }
 0x3ed   : > { %4205 = vrsqrt.f32 %v6998_v41  ;;  %v3630_v29 = vadd.f32 %v6805_v24, %v3595_v61  ;;  %v3296_v32 = vsel %vm7040_vm3, %v6854_v10, %v3292_v1  ;;  %v3462_v27 = vmul.f32 %v6918_v45, %v3461_v43  ;;  %v2948_v7 = vpop.xlane.xlu2 %2947 }
 0x3ee   : > { %4207 = vrsqrt.f32 %v7000_v53  ;;  %v3669_v23 = vpack.c.bf16 %v3648_v48, %v3647_v30  ;;  %vm3464_vm6 = vweird.f32 %v6918_v45  ;;  %v3629_v60 = vadd.f32 %v6805_v24, %v3594_v15 }
 0x3ef   : > { %v3561_v22 = vmul.f32 %v3286_v49, %v6509_v13  ;;  %v3490_v0 = vmul.f32 0.5, %v3489_v2  ;;  %v3562_v54 = vmul.f32 %v3296_v32, %v6331_v38  ;;  %vm7066_vm9 = vmor %vm3463_vm7, %vm3464_vm6  ;;  %vm3473_vm10 = vweird.f32 %v7000_v53 }
 0x3f0   : > { %v3158_v63 = vpop.xlane.xlu1 %3157  ;;  %v3122_v3 = vpop.xlane.xlu0 %3121  ;;  %3797 = vmatmul.bf16.gmra.mxu3 %v3669_v23  ;;  %v3660_v10 = vpack.c.bf16 %v3630_v29, %v3629_v60  ;;  %v3466_v28 = vsel %vm7066_vm9, %v6918_v45, %v3462_v27  ;;  %vm3494_vm8 = vweird.f32 %v6995_v44  ;;  %v7086_v15 = vmul.f32 0.015625, %v2948_v7 }
 0x3f1   : > { %v3197_v42 = vmul.f32 0.015625, %v3158_v63  ;;  %3167 = vadd.xlane.f32.xlu2 %v3106_v58  ;;  %v3179_v18 = vmul.f32 0.015625, %v3122_v3  ;;  %v3596_v46 = vmul.f32 %v6798_v9, %v3561_v22  ;;  %v3491_v48 = vsub.f32 1.5, %v3490_v0 }
 0x3f2   : > { %v3597_v1 = vmul.f32 %v6798_v9, %v3562_v54  ;;  %vm3493_vm13 = vweird.f32 %v6934_v11  ;;  %vm3313_vm7 = vweird.f32 %v6998_v41  ;;  %v3028_v11 = vsub.f32 %v6667_v12, %v7086_v15 }
 0x3f3   : > { %v7046_v40 = vpop.eup %4205  ;;  %v7048_v16 = vadd.f32 1e-05, %v3197_v42  ;;  %v7050_v34 = vadd.f32 1e-05, %v3179_v18  ;;  %v3631_v23 = vadd.f32 %v6805_v24, %v3596_v46  ;;  %v7839_v42 = vld [vmem:[#allocation44_spill] sm:$0xff]  ;;  %v3492_v2 = vmul.f32 %v6995_v44, %v3491_v48  ;;  %vm7151_vm6 = vmor %vm3493_vm13, %vm3494_vm8 }
 0x3f4   : > { %v4208_v52 = vpop.eup %4207  ;;  %v3308_v6 = vmul.f32 %v7046_v40, %v6998_v41  ;;  %v3579_v18 = vmul.f32 %v3466_v28, %v7839_v42  ;;  %vm3314_vm14 = vweird.f32 %v7046_v40 }
 0x3f5   : > { %v3468_v25 = vmul.f32 %v4208_v52, %v7000_v53  ;;  %4209 = vrsqrt.f32 %v7048_v16  ;;  %vm3474_vm11 = vweird.f32 %v4208_v52  ;;  %vm3483_vm5 = vweird.f32 %v7048_v16  ;;  %vm3315_vm9 = vmor %vm3313_vm7, %vm3314_vm14 }
 0x3f6   : > { %4211 = vrsqrt.f32 %v7050_v34  ;;  %v3309_v30 = vmul.f32 %v7046_v40, %v3308_v6  ;;  %vm3475_vm12 = vmor %vm3473_vm10, %vm3474_vm11  ;;  %v3632_v6 = vadd.f32 %v6805_v24, %v3597_v1  ;;  %v3614_v14 = vmul.f32 %v6798_v9, %v3579_v18 }
 0x3f7   : > { %v3469_v13 = vmul.f32 %v4208_v52, %v3468_v25  ;;  %3752 = vmatmul.bf16.gmra.mxu1 %v3660_v10  ;;  %vm3303_vm0 = vweird.f32 %v7050_v34  ;;  %vm3896_vm14 = vcmask 261120  }
 0x3f8   : > { %v2980_v51 = vpop.xlane.xlu1 %2979  ;;  %v2944_v19 = vpop.xlane.xlu0 %2943  ;;  %v3310_v49 = vmul.f32 0.5, %v3309_v30 }
 0x3f9   : > { %v3470_v37 = vmul.f32 0.5, %v3469_v13  ;;  %v3012_v61 = vmul.f32 0.015625, %v2980_v51  ;;  %v2994_v38 = vmul.f32 0.015625, %v2944_v19 }
 0x3fa   : > { %v3311_v13 = vsub.f32 1.5, %v3310_v49 }
 0x3fb   : > { %v7077_v58 = vpop.eup %4209  ;;  %v3471_v43 = vsub.f32 1.5, %v3470_v37  ;;  %v3044_v20 = vsub.f32 %v6687_v56, %v3012_v61  ;;  %v3026_v63 = vsub.f32 %v6685_v50, %v2994_v38  ;;  %v3649_v61 = vadd.f32 %v6805_v24, %v3614_v14 }
 0x3fc   : > { %v7081_v45 = vpop.eup %4211  ;;  %v3478_v3 = vmul.f32 %v7077_v58, %v7048_v16  ;;  %vm3484_vm1 = vweird.f32 %v7077_v58  ;;  %v3312_v16 = vmul.f32 %v7046_v40, %v3311_v13 }
 0x3fd   : > { %v3472_v21 = vmul.f32 %v4208_v52, %v3471_v43  ;;  %v3298_v56 = vmul.f32 %v7081_v45, %v7050_v34  ;;  %v7094_v50 = vsel %vm1070_vm4, %v3044_v20, 0.0  ;;  %v7104_v32 = vsel %vm1070_vm4, %v3026_v63, 0.0  ;;  %vm7126_vm2 = vmor %vm3483_vm5, %vm3484_vm1 }
 0x3fe   : > { %v3479_v29 = vmul.f32 %v7077_v58, %v3478_v3  ;;  %v3108_v27 = vmul.f32 %v7094_v50, %v7094_v50  ;;  %v3090_v22 = vmul.f32 %v7104_v32, %v7104_v32  ;;  %vm3304_vm15 = vweird.f32 %v7081_v45 }
 0x3ff   : > { %v3299_v60 = vmul.f32 %v7081_v45, %v3298_v56  ;;  %v3476_v25 = vsel %vm3475_vm12, %v4208_v52, %v3472_v21  ;;  %vm7139_vm3 = vmor %vm3303_vm0, %vm3304_vm15  ;;  %v3661_v43 = vpack.c.bf16 %v3632_v6, %v3631_v23  ;;  %v3316_v41 = vsel %vm3315_vm9, %v7046_v40, %v3312_v16 }
 0x400   : > { %v3480_v53 = vmul.f32 0.5, %v3479_v29  ;;  %3171 = vadd.xlane.f32.xlu0 %v3108_v27  ;;  %v2946_v0 = vpop.xlane.xlu1 %2945  ;;  %v2978_v10 = vpop.xlane.xlu0 %2977  ;;  %v3580_v54 = vmul.f32 %v3476_v25, %v6619_v62  ;;  %3135 = vadd.xlane.f32.xlu1 %v3090_v22  ;;  %v7174_v21 = vsel %vm1070_vm4, %v3028_v11, 0.0  ;;  %v3564_v12 = vmul.f32 %v3316_v41, %v6627_v4  ;;  %v7846_v41 = vld [vmem:[#allocation4_spill] sm:$0xff] }
 0x401   : > { %v3300_v51 = vmul.f32 0.5, %v3299_v60  ;;  %v2995_v19 = vmul.f32 0.015625, %v2946_v0  ;;  %v3011_v46 = vmul.f32 0.015625, %v2978_v10  ;;  %v3181_v56 = vmul.f32 0.015625, %v7025_v26 }
 0x402   : > { %v3481_v28 = vsub.f32 1.5, %v3480_v53  ;;  %v3615_v52 = vmul.f32 %v6798_v9, %v3580_v54 }
 0x403   : > { %v3301_v30 = vsub.f32 1.5, %v3300_v51  ;;  %v3027_v37 = vsub.f32 %v6697_v59, %v2995_v19  ;;  %v3043_v62 = vsub.f32 %v6695_v8, %v3011_v46  ;;  %v3213_v36 = vadd.f32 1e-05, %v3181_v56 }
 0x404   : > { %v3482_v7 = vmul.f32 %v7077_v58, %v3481_v28  ;;  %v3650_v38 = vadd.f32 %v6805_v24, %v3615_v52 }
 0x405   : > { %v3302_v1 = vmul.f32 %v7081_v45, %v3301_v30  ;;  %v7133_v59 = vsel %vm1070_vm4, %v3027_v37, 0.0  ;;  %v7137_v8 = vsel %vm1070_vm4, %v3043_v62, 0.0  ;;  %4213 = vrsqrt.f32 %v3213_v36 }
 0x406   : > { %v3670_v20 = vpack.c.bf16 %v3650_v38, %v3649_v61  ;;  %v3091_v63 = vmul.f32 %v7133_v59, %v7133_v59  ;;  %v3107_v3 = vmul.f32 %v7137_v8, %v7137_v8  ;;  %v3486_v18 = vsel %vm7126_vm2, %v7077_v58, %v3482_v7 }
 0x407   : > { %v3306_v23 = vsel %vm7139_vm3, %v7081_v45, %v3302_v1  ;;  %3757 = vmatmul.bf16.gmra.mxu1 %v3661_v43  ;;  %v3496_v45 = vsel %vm7151_vm6, %v6995_v44, %v3492_v2  ;;  %v3581_v58 = vmul.f32 %v3486_v18, %v6664_v17  ;;  %v3092_v44 = vmul.f32 %v7174_v21, %v7174_v21 }
 0x408   : > { %3802 = vmatmul.bf16.gmra.mxu3 %v3670_v20  ;;  %3137 = vadd.xlane.f32.xlu1 %v3091_v63  ;;  %v3563_v49 = vmul.f32 %v3306_v23, %v6660_v47  ;;  %v3582_v15 = vmul.f32 %v3496_v45, %v6566_v33  ;;  %v3599_v47 = vmul.f32 %v6798_v9, %v3564_v12  ;;  %vm3323_vm10 = vweird.f32 %v3213_v36 }
 0x409   : > { %3169 = vadd.xlane.f32.xlu2 %v3107_v3  ;;  %v3616_v29 = vmul.f32 %v6798_v9, %v3581_v58  ;;  %v7847_v45 = vmax.f32 %v7846_v41, 0.0 }
 0x40a   : > { %v3598_v40 = vmul.f32 %v6798_v9, %v3563_v49  ;;  %v3617_v17 = vmul.f32 %v6798_v9, %v3582_v15  ;;  %v3634_v33 = vadd.f32 %v6805_v24, %v3599_v47 }
 0x40b   : > { %v3651_v4 = vadd.f32 %v6805_v24, %v3616_v29  ;;  %v4214_v22 = vpop.eup %4213 }
 0x40c   : > { %v3633_v2 = vadd.f32 %v6805_v24, %v3598_v40  ;;  %v3652_v26 = vadd.f32 %v6805_v24, %v3617_v17  ;;  %v3318_v6 = vmul.f32 %v4214_v22, %v3213_v36  ;;  %vm3324_vm4 = vweird.f32 %v4214_v22  ;;  %v7848_v36 = vld [vmem:[#allocation6_spill] sm:$0xff] }
 0x40d   : > { %vm3325_vm11 = vmor %vm3323_vm10, %vm3324_vm4 }
 0x40e   : > { %v3662_v27 = vpack.c.bf16 %v3634_v33, %v3633_v2  ;;  %v3671_v60 = vpack.c.bf16 %v3652_v26, %v3651_v4  ;;  %v3319_v25 = vmul.f32 %v4214_v22, %v3318_v6  ;;  %v7849_v2 = vmax.f32 %v7848_v36, 0.0  ;;  %v7855_v36 = vld [vmem:[#allocation8_spill] sm:$0xff] }
 0x410   : > { %v3320_v54 = vmul.f32 0.5, %v3319_v25 }
 0x411   : > { %3139 = vadd.xlane.f32.xlu2 %v3092_v44 }
 0x412   : > { %v3321_v14 = vsub.f32 1.5, %v3320_v54 }
 0x414   : > { %v3322_v51 = vmul.f32 %v4214_v22, %v3321_v14 }
 0x416   : > { %v3326_v52 = vsel %vm3325_vm11, %v4214_v22, %v3322_v51 }
 0x417   : > { %3762 = vmatmul.bf16.gmra.mxu1 %v3662_v27  ;;  %v3565_v37 = vmul.f32 %v3326_v52, %v6611_v31 }
 0x418   : > { %3807 = vmatmul.bf16.gmra.mxu3 %v3671_v60 }
 0x419   : > { %v3600_v16 = vmul.f32 %v6798_v9, %v3565_v37  ;;  %v7850_v37 = vld [vmem:[#allocation9_spill] sm:$0xff] }
 0x41b   : > { %v3635_v34 = vadd.f32 %v6805_v24, %v3600_v16  ;;  %v7852_v16 = vld [vmem:[#allocation39_spill] sm:$0xff] }
 0x421   : > { %v3128_v53 = vpop.xlane.xlu0 %3127 }
 0x422   : > { %v3182_v0 = vmul.f32 0.015625, %v3128_v53 }
 0x424   : > { %v3214_v10 = vadd.f32 1e-05, %v3182_v0 }
 0x426   : > { %4215 = vrsqrt.f32 %v3214_v10  ;;  %vm3333_vm13 = vweird.f32 %v3214_v10 }
 0x429   : > { %v3162_v7 = vpop.xlane.xlu0 %3161 }
 0x42a   : > { %v3199_v48 = vmul.f32 0.015625, %v3162_v7 }
 0x42c   : > { %v4216_v13 = vpop.eup %4215  ;;  %v3231_v20 = vadd.f32 1e-05, %v3199_v48 }
 0x42d   : > { %v3328_v19 = vmul.f32 %v4216_v13, %v3214_v10  ;;  %vm3334_vm8 = vweird.f32 %v4216_v13 }
 0x42e   : > { %vm3335_vm12 = vmor %vm3333_vm13, %vm3334_vm8  ;;  %4217 = vrsqrt.f32 %v3231_v20  ;;  %vm3503_vm1 = vweird.f32 %v3231_v20 }
 0x42f   : > { %v3329_v46 = vmul.f32 %v4216_v13, %v3328_v19 }
 0x431   : > { %v3330_v28 = vmul.f32 0.5, %v3329_v46 }
 0x433   : > { %v3331_v30 = vsub.f32 1.5, %v3330_v28 }
 0x434   : > { %v4218_v31 = vpop.eup %4217 }
 0x435   : > { %v3332_v62 = vmul.f32 %v4216_v13, %v3331_v30  ;;  %v3498_v3 = vmul.f32 %v4218_v31, %v3231_v20  ;;  %vm3504_vm5 = vweird.f32 %v4218_v31 }
 0x436   : > { %vm3505_vm15 = vmor %vm3503_vm1, %vm3504_vm5 }
 0x437   : > { %v3336_v61 = vsel %vm3335_vm12, %v4216_v13, %v3332_v62  ;;  %v3499_v42 = vmul.f32 %v4218_v31, %v3498_v3  ;;  %v7851_v62 = vmax.f32 %v7850_v37, 0.0 }
 0x438   : > { %v3566_v38 = vmul.f32 %v3336_v61, %v6727_v57  ;;  %v7198_v57 = vld [vmem:[%s7552_s14] ss:$0 sm:$0xff] }
 0x439   : > { %v3500_v58 = vmul.f32 0.5, %v3499_v42 }
 0x43a   : > { %v3601_v1 = vmul.f32 %v6798_v9, %v3566_v38 }
 0x43b   : > { %v3501_v44 = vsub.f32 1.5, %v3500_v58 }
 0x43c   : > { %v3636_v43 = vadd.f32 %v6805_v24, %v3601_v1 }
 0x43d   : > { %v3502_v33 = vmul.f32 %v4218_v31, %v3501_v44 }
 0x43e   : > { %v3663_v63 = vpack.c.bf16 %v3636_v43, %v3635_v34 }
 0x43f   : > { %v3506_v46 = vsel %vm3505_vm15, %v4218_v31, %v3502_v33  ;;  %v7853_v31 = vld [vmem:[#allocation5_spill] sm:$0xff] }
 0x440   : > { %3767 = vmatmul.bf16.gmra.mxu1 %v3663_v63  ;;  %v3583_v48 = vmul.f32 %v3506_v46, %v7852_v16  ;;  %v7854_v3 = vmax.f32 %v7853_v31, 0.0  ;;  %v7857_v33 = vld [vmem:[#allocation37_spill] sm:$0xff] }
 0x448   : > { %v3788_v23 = vpop.f32.mrf.mxu3 }
 0x449   : > { %v3844_v49 = vadd.f32 %v3788_v23, %v7847_v45 }
 0x44b   : > { %v3880_v56 = vadd.f32 %v7198_v57, %v3844_v49 }
 0x44d   : > { %3913 = vst.msk [vmem:[%s7207_s23 + $0x80] sm:$0xff] %vm3896_vm14, %v3880_v56 }
 0x450   : > { %v3790_v47 = vpop.f32.mrf.mxu3 }
 0x451   : > { %v3845_v4 = vadd.f32 %v3790_v47, %v7849_v2  ;;  %v7856_v2 = vmax.f32 %v7855_v36, 0.0  ;;  %v7867_v36 = vld [vmem:[#allocation12_spill] sm:$0xff] }
 0x453   : > { %v3164_v18 = vpop.xlane.xlu1 %3163  ;;  %v3132_v11 = vpop.xlane.xlu0 %3131  ;;  %v3881_v25 = vadd.f32 %v7198_v57, %v3845_v4 }
 0x454   : > { %v3200_v12 = vmul.f32 0.015625, %v3164_v18  ;;  %v3184_v15 = vmul.f32 0.015625, %v3132_v11 }
 0x455   : > { %3914 = vst.msk [vmem:[%s7207_s23 + $0x88] sm:$0xff] %vm3896_vm14, %v3881_v25 }
 0x456   : > { %v3232_v40 = vadd.f32 1e-05, %v3200_v12  ;;  %v7210_v29 = vadd.f32 1e-05, %v3184_v15  ;;  %v3618_v12 = vmul.f32 %v6798_v9, %v3583_v48  ;;  %v7862_v48 = vld [vmem:[#allocation47_spill] sm:$0xff] }
 0x458   : > { %4219 = vrsqrt.f32 %v3232_v40  ;;  %vm3513_vm2 = vweird.f32 %v3232_v40  ;;  %vm3353_vm7 = vweird.f32 %v7210_v29 }
 0x459   : > { %4221 = vrsqrt.f32 %v7210_v29 }
 0x45b   : > { %v3134_v17 = vpop.xlane.xlu0 %3133  ;;  %v3166_v26 = vpop.xlane.xlu1 %3165 }
 0x45c   : > { %v3130_v27 = vpop.xlane.xlu2 %3129  ;;  %v3201_v60 = vmul.f32 0.015625, %v3166_v26  ;;  %v3185_v6 = vmul.f32 0.015625, %v3134_v17 }
 0x45d   : > { %v3183_v22 = vmul.f32 0.015625, %v3130_v27 }
 0x45e   : > { %v4220_v53 = vpop.eup %4219  ;;  %v7220_v54 = vadd.f32 1e-05, %v3201_v60  ;;  %v7229_v19 = vadd.f32 1e-05, %v3185_v6  ;;  %v3793_v52 = vpop.f32.mrf.mxu3 }
 0x45f   : > { %v7218_v0 = vpop.eup %4221  ;;  %v3508_v10 = vmul.f32 %v4220_v53, %v3232_v40  ;;  %v7222_v14 = vadd.f32 1e-05, %v3183_v22  ;;  %v3846_v7 = vadd.f32 %v3793_v52, %v7851_v62  ;;  %vm3514_vm0 = vweird.f32 %v4220_v53 }
 0x460   : > { %v3348_v13 = vmul.f32 %v7218_v0, %v7210_v29  ;;  %4223 = vrsqrt.f32 %v7220_v54  ;;  %vm3515_vm3 = vmor %vm3513_vm2, %vm3514_vm0  ;;  %vm3354_vm6 = vweird.f32 %v7218_v0  ;;  %vm3523_vm13 = vweird.f32 %v7220_v54 }
 0x461   : > { %v3509_v51 = vmul.f32 %v4220_v53, %v3508_v10  ;;  %4225 = vrsqrt.f32 %v7222_v14  ;;  %v3882_v20 = vadd.f32 %v7198_v57, %v3846_v7  ;;  %vm7263_vm9 = vmor %vm3353_vm7, %vm3354_vm6  ;;  %vm3343_vm10 = vweird.f32 %v7222_v14 }
 0x462   : > { %v3349_v28 = vmul.f32 %v7218_v0, %v3348_v13  ;;  %4227 = vrsqrt.f32 %v7229_v19  ;;  %v7860_v13 = vld [vmem:[#allocation7_spill] sm:$0xff]  ;;  %vm3363_vm2 = vweird.f32 %v7229_v19 }
 0x463   : > { %v3510_v30 = vmul.f32 0.5, %v3509_v51  ;;  %3915 = vst.msk [vmem:[%s7207_s23 + $0x90] sm:$0xff] %vm3896_vm14, %v3882_v20  ;;  %v7861_v51 = vmax.f32 %v7860_v13, 0.0 }
 0x464   : > { %v3350_v61 = vmul.f32 0.5, %v3349_v28  ;;  %v3168_v38 = vpop.xlane.xlu2 %3167  ;;  %v3748_v43 = vpop.f32.mrf.mxu1  ;;  %v3653_v28 = vadd.f32 %v6805_v24, %v3618_v12 }
 0x465   : > { %v3511_v1 = vsub.f32 1.5, %v3510_v30  ;;  %v3202_v34 = vmul.f32 0.015625, %v3168_v38  ;;  %v3828_v42 = vadd.f32 %v3748_v43, %v7854_v3 }
 0x466   : > { %v3351_v63 = vsub.f32 1.5, %v3350_v61  ;;  %v7240_v23 = vpop.eup %4223  ;;  %v3795_v40 = vpop.f32.mrf.mxu3 }
 0x467   : > { %v3512_v18 = vmul.f32 %v4220_v53, %v3511_v1  ;;  %v7242_v11 = vadd.f32 1e-05, %v3202_v34  ;;  %v4226_v41 = vpop.eup %4225  ;;  %v3518_v45 = vmul.f32 %v7240_v23, %v7220_v54  ;;  %v3864_v49 = vadd.f32 %v7198_v57, %v3828_v42 }
 0x468   : > { %v3338_v58 = vmul.f32 %v4226_v41, %v7222_v14  ;;  %v3352_v15 = vmul.f32 %v7218_v0, %v3351_v63  ;;  %v7257_v47 = vpop.eup %4227  ;;  %v3847_v4 = vadd.f32 %v3795_v40, %v7856_v2  ;;  %vm3344_vm4 = vweird.f32 %v4226_v41 }
 0x469   : > { %4229 = vrsqrt.f32 %v7242_v11  ;;  %v3519_v56 = vmul.f32 %v7240_v23, %v3518_v45  ;;  %3897 = vst.msk [vmem:[%s7207_s23] sm:$0xff] %vm3896_vm14, %v3864_v49  ;;  %v3516_v44 = vsel %vm3515_vm3, %v4220_v53, %v3512_v18  ;;  %v3358_v10 = vmul.f32 %v7257_v47, %v7229_v19  ;;  %vm3345_vm11 = vmor %vm3343_vm10, %vm3344_vm4 }
 0x46a   : > { %v3339_v17 = vmul.f32 %v4226_v41, %v3338_v58  ;;  %v3584_v26 = vmul.f32 %v3516_v44, %v7857_v33  ;;  %v3883_v25 = vadd.f32 %v7198_v57, %v3847_v4  ;;  %v3356_v29 = vsel %vm7263_vm9, %v7218_v0, %v3352_v15 }
 0x46b   : > { %v3520_v27 = vmul.f32 0.5, %v3519_v56  ;;  %v3568_v1 = vmul.f32 %v3356_v29, %v7862_v48  ;;  %vm3524_vm8 = vweird.f32 %v7240_v23  ;;  %v3359_v43 = vmul.f32 %v7257_v47, %v3358_v10  ;;  %v7865_v56 = vld [vmem:[#allocation10_spill] sm:$0xff] }
 0x46c   : > { %v3340_v22 = vmul.f32 0.5, %v3339_v17  ;;  %v3750_v6 = vpop.f32.mrf.mxu1  ;;  %v3619_v53 = vmul.f32 %v6798_v9, %v3584_v26  ;;  %3916 = vst.msk [vmem:[%s7207_s23 + $0x98] sm:$0xff] %vm3896_vm14, %v3883_v25  ;;  %vm7294_vm5 = vmor %vm3523_vm13, %vm3524_vm8  ;;  %v7866_v40 = vmax.f32 %v7865_v56, 0.0  ;;  %v7868_v2 = vmax.f32 %v7867_v36, 0.0 }
 0x46d   : > { %v3829_v46 = vadd.f32 %v3750_v6, %v7861_v51  ;;  %v3521_v30 = vsub.f32 1.5, %v3520_v27  ;;  %v3603_v49 = vmul.f32 %v6798_v9, %v3568_v1  ;;  %v3360_v44 = vmul.f32 0.5, %v3359_v43 }
 0x46e   : > { %v3341_v37 = vsub.f32 1.5, %v3340_v22  ;;  %v3654_v62 = vadd.f32 %v6805_v24, %v3619_v53  ;;  %vm3533_vm1 = vweird.f32 %v7242_v11  ;;  %vm3364_vm0 = vweird.f32 %v7257_v47 }
 0x46f   : > { %v4230_v52 = vpop.eup %4229  ;;  %v3865_v61 = vadd.f32 %v7198_v57, %v3829_v46  ;;  %v3522_v34 = vmul.f32 %v7240_v23, %v3521_v30  ;;  %v3638_v60 = vadd.f32 %v6805_v24, %v3603_v49  ;;  %vm7353_vm3 = vmor %vm3363_vm2, %vm3364_vm0 }
 0x470   : > { %v3528_v7 = vmul.f32 %v4230_v52, %v7242_v11  ;;  %v3342_v38 = vmul.f32 %v4226_v41, %v3341_v37  ;;  %v3672_v16 = vpack.c.bf16 %v3654_v62, %v3653_v28  ;;  %vm3534_vm12 = vweird.f32 %v4230_v52  ;;  %v7871_v37 = vld [vmem:[#allocation14_spill] sm:$0xff] }
 0x471   : > { %3898 = vst.msk [vmem:[%s7207_s23 + $0x8] sm:$0xff] %vm3896_vm14, %v3865_v61  ;;  %v3526_v33 = vsel %vm7294_vm5, %v7240_v23, %v3522_v34  ;;  %vm3535_vm15 = vmor %vm3533_vm1, %vm3534_vm12  ;;  %v3361_v11 = vsub.f32 1.5, %v3360_v44  ;;  %v7872_v62 = vmax.f32 %v7871_v37, 0.0  ;;  %v7875_v44 = vld [vmem:[#allocation15_spill] sm:$0xff] }
 0x472   : > { %v3529_v0 = vmul.f32 %v4230_v52, %v3528_v7  ;;  %3812 = vmatmul.bf16.gmra.mxu3 %v3672_v16  ;;  %v3346_v63 = vsel %vm3345_vm11, %v4226_v41, %v3342_v38  ;;  %v3585_v6 = vmul.f32 %v3526_v33, %v6969_v55  ;;  %v7876_v36 = vmax.f32 %v7875_v44, 0.0 }
 0x473   : > { %v3172_v20 = vpop.xlane.xlu0 %3171  ;;  %v3136_v3 = vpop.xlane.xlu1 %3135  ;;  %v3567_v14 = vmul.f32 %v3346_v63, %v6973_v35  ;;  %v3362_v48 = vmul.f32 %v7257_v47, %v3361_v11 }
 0x474   : > { %v3530_v31 = vmul.f32 0.5, %v3529_v0  ;;  %v3204_v42 = vmul.f32 0.015625, %v3172_v20  ;;  %v3186_v18 = vmul.f32 0.015625, %v3136_v3  ;;  %v3753_v45 = vpop.f32.mrf.mxu1  ;;  %v3798_v58 = vpop.f32.mrf.mxu3 }
 0x475   : > { %v3830_v35 = vadd.f32 %v3753_v45, %v7866_v40  ;;  %v3602_v54 = vmul.f32 %v6798_v9, %v3567_v14  ;;  %v3848_v4 = vadd.f32 %v3798_v58, %v7868_v2  ;;  %v7363_v14 = vld [vmem:[%s7550_s12] ss:$0 sm:$0xff]  ;;  %v3366_v49 = vsel %vm7353_vm3, %v7257_v47, %v3362_v48 }
 0x476   : > { %v3531_v41 = vsub.f32 1.5, %v3530_v31  ;;  %v7298_v15 = vadd.f32 1e-05, %v3204_v42  ;;  %v7303_v17 = vadd.f32 1e-05, %v3186_v18 }
 0x477   : > { %v3866_v27 = vadd.f32 %v7198_v57, %v3830_v35  ;;  %v3637_v9 = vadd.f32 %v6805_v24, %v3602_v54  ;;  %v3884_v22 = vadd.f32 %v7198_v57, %v3848_v4  ;;  %v3569_v4 = vmul.f32 %v3366_v49, %v6941_v5 }
 0x478   : > { %v3532_v26 = vmul.f32 %v4230_v52, %v3531_v41  ;;  %4231 = vrsqrt.f32 %v7298_v15  ;;  %vm3373_vm7 = vweird.f32 %v7303_v17  ;;  %vm3553_vm10 = vweird.f32 %v7298_v15 }
 0x479   : > { %4233 = vrsqrt.f32 %v7303_v17  ;;  %3899 = vst.msk [vmem:[%s7207_s23 + $0x10] sm:$0xff] %vm3896_vm14, %v3866_v27  ;;  %v3664_v25 = vpack.c.bf16 %v3638_v60, %v3637_v9 }
 0x47a   : > { %v3536_v23 = vsel %vm3535_vm15, %v4230_v52, %v3532_v26  ;;  %3917 = vst.msk [vmem:[%s7207_s23 + $0xa0] sm:$0xff] %vm3896_vm14, %v3884_v22  ;;  %v7869_v52 = vld [vmem:[#allocation11_spill] sm:$0xff] }
 0x47b   : > { %v3586_v53 = vmul.f32 %v3536_v23, %v7010_v39  ;;  %v3138_v10 = vpop.xlane.xlu1 %3137  ;;  %3772 = vmatmul.bf16.gmra.mxu1 %v3664_v25  ;;  %v7870_v30 = vmax.f32 %v7869_v52, 0.0  ;;  %v7334_v39 = vld [vmem:[%s7549_s11] ss:$0 sm:$0xff] }
 0x47c   : > { %v3170_v13 = vpop.xlane.xlu2 %3169  ;;  %v3187_v51 = vmul.f32 0.015625, %v3138_v10  ;;  %v3755_v46 = vpop.f32.mrf.mxu1  ;;  %v3620_v61 = vmul.f32 %v7334_v39, %v3585_v6  ;;  %v3604_v6 = vmul.f32 %v7334_v39, %v3569_v4 }
 0x47d   : > { %v3203_v24 = vmul.f32 0.015625, %v3170_v13  ;;  %v3800_v28 = vpop.f32.mrf.mxu3  ;;  %v3831_v55 = vadd.f32 %v3755_v46, %v7870_v30  ;;  %v3621_v38 = vmul.f32 %v7334_v39, %v3586_v53 }
 0x47e   : > { %v7325_v29 = vpop.eup %4231  ;;  %v3849_v7 = vadd.f32 %v3800_v28, %v7872_v62  ;;  %v7341_v0 = vadd.f32 1e-05, %v3187_v51  ;;  %v3655_v19 = vadd.f32 %v7363_v14, %v3620_v61  ;;  %v7879_v51 = vld [vmem:[#allocation19_spill] sm:$0xff]  ;;  %v7881_v62 = vld [vmem:[#allocation13_spill] sm:$0xff] }
 0x47f   : > { %v4234_v16 = vpop.eup %4233  ;;  %v3548_v1 = vmul.f32 %v7325_v29, %v7298_v15  ;;  %v7343_v34 = vadd.f32 1e-05, %v3203_v24  ;;  %v3867_v20 = vadd.f32 %v7198_v57, %v3831_v55  ;;  %v3656_v18 = vadd.f32 %v7363_v14, %v3621_v38 }
 0x480   : > { %v3368_v43 = vmul.f32 %v4234_v16, %v7303_v17  ;;  %v3885_v63 = vadd.f32 %v7198_v57, %v3849_v7  ;;  %4235 = vrsqrt.f32 %v7341_v0  ;;  %vm3374_vm6 = vweird.f32 %v4234_v16 }
 0x481   : > { %v3549_v31 = vmul.f32 %v7325_v29, %v3548_v1  ;;  %4237 = vrsqrt.f32 %v7343_v34  ;;  %3900 = vst.msk [vmem:[%s7207_s23 + $0x18] sm:$0xff] %vm3896_vm14, %v3867_v20  ;;  %v3673_v12 = vpack.c.bf16 %v3656_v18, %v3655_v19  ;;  %vm3554_vm9 = vweird.f32 %v7325_v29  ;;  %vm3375_vm4 = vmor %vm3373_vm7, %vm3374_vm6 }
 0x482   : > { %v3369_v42 = vmul.f32 %v4234_v16, %v3368_v43  ;;  %3918 = vst.msk [vmem:[%s7207_s23 + $0xa8] sm:$0xff] %vm3896_vm14, %v3885_v63  ;;  %vm7394_vm11 = vmor %vm3553_vm10, %vm3554_vm9  ;;  %v7880_v24 = vmax.f32 %v7879_v51, 0.0  ;;  %v7882_v7 = vmax.f32 %v7881_v62, 0.0  ;;  %vm3543_vm12 = vweird.f32 %v7343_v34 }
 0x483   : > { %v3550_v45 = vmul.f32 0.5, %v3549_v31  ;;  %3817 = vmatmul.bf16.gmra.mxu3 %v3673_v12  ;;  %vm3383_vm5 = vweird.f32 %v7341_v0 }
 0x484   : > { %v3370_v58 = vmul.f32 0.5, %v3369_v42  ;;  %v3140_v41 = vpop.xlane.xlu2 %3139  ;;  %v3758_v35 = vpop.f32.mrf.mxu1 }
 0x485   : > { %v3551_v56 = vsub.f32 1.5, %v3550_v45  ;;  %v3188_v40 = vmul.f32 0.015625, %v3140_v41  ;;  %v3832_v2 = vadd.f32 %v3758_v35, %v7876_v36  ;;  %v7887_v35 = vld [vmem:[#allocation18_spill] sm:$0xff] }
 0x486   : > { %v3371_v54 = vsub.f32 1.5, %v3370_v58  ;;  %v7375_v33 = vpop.eup %4235 }
 0x487   : > { %v7379_v47 = vadd.f32 1e-05, %v3188_v40  ;;  %v4238_v26 = vpop.eup %4237  ;;  %v3552_v9 = vmul.f32 %v7325_v29, %v3551_v56  ;;  %v3378_v60 = vmul.f32 %v7375_v33, %v7341_v0  ;;  %v3868_v22 = vadd.f32 %v7198_v57, %v3832_v2  ;;  %v7885_v0 = vld [vmem:[#allocation16_spill] sm:$0xff] }
 0x488   : > { %v3372_v27 = vmul.f32 %v4234_v16, %v3371_v54  ;;  %v3538_v5 = vmul.f32 %v4238_v26, %v7343_v34  ;;  %vm3544_vm8 = vweird.f32 %v4238_v26  ;;  %vm3384_vm13 = vweird.f32 %v7375_v33 }
 0x489   : > { %4239 = vrsqrt.f32 %v7379_v47  ;;  %v3379_v17 = vmul.f32 %v7375_v33, %v3378_v60  ;;  %3901 = vst.msk [vmem:[%s7207_s23 + $0x20] sm:$0xff] %vm3896_vm14, %v3868_v22  ;;  %v3556_v15 = vsel %vm7394_vm11, %v7325_v29, %v3552_v9  ;;  %vm3545_vm1 = vmor %vm3543_vm12, %vm3544_vm8  ;;  %v7886_v49 = vmax.f32 %v7885_v0, 0.0  ;;  %v7889_v22 = vld [vmem:[#allocation21_spill] sm:$0xff] }
 0x48a   : > { %v3376_v23 = vsel %vm3375_vm4, %v4234_v16, %v3372_v27  ;;  %v3539_v25 = vmul.f32 %v4238_v26, %v3538_v5  ;;  %v3588_v48 = vmul.f32 %v3556_v15, %v7094_v50  ;;  %vm7421_vm15 = vmor %vm3383_vm5, %vm3384_vm13  ;;  %v7888_v54 = vmax.f32 %v7887_v35, 0.0  ;;  %v7907_v35 = vld [vmem:[#allocation31_spill] sm:$0xff] }
 0x48b   : > { %v3803_v53 = vpop.f32.mrf.mxu3  ;;  %v3570_v10 = vmul.f32 %v3376_v23, %v7104_v32  ;;  %v3380_v13 = vmul.f32 0.5, %v3379_v17  ;;  %v3639_v32 = vadd.f32 %v7363_v14, %v3604_v6  ;;  %vm3393_vm2 = vweird.f32 %v7379_v47 }
 0x48c   : > { %v3850_v46 = vadd.f32 %v3803_v53, %v7880_v24  ;;  %v3540_v28 = vmul.f32 0.5, %v3539_v25  ;;  %v3760_v52 = vpop.f32.mrf.mxu1  ;;  %v3623_v18 = vmul.f32 %v7334_v39, %v3588_v48  ;;  %v7890_v5 = vmax.f32 %v7889_v22, 0.0  ;;  %v7891_v25 = vld [vmem:[#allocation17_spill] sm:$0xff]  ;;  %v7893_v24 = vld [vmem:[#allocation20_spill] sm:$0xff] }
 0x48d   : > { %v3605_v30 = vmul.f32 %v7334_v39, %v3570_v10  ;;  %v3381_v55 = vsub.f32 1.5, %v3380_v13  ;;  %v3833_v61 = vadd.f32 %v3760_v52, %v7882_v7  ;;  %v7892_v53 = vmax.f32 %v7891_v25, 0.0  ;;  %v7899_v48 = vld [vmem:[#allocation24_spill] sm:$0xff]  ;;  %v7915_v25 = vld [vmem:[#allocation33_spill] sm:$0xff] }
 0x48e   : > { %v3886_v37 = vadd.f32 %v7198_v57, %v3850_v46  ;;  %v3541_v29 = vsub.f32 1.5, %v3540_v28  ;;  %v7894_v46 = vmax.f32 %v7893_v24, 0.0 }
 0x48f   : > { %v4240_v38 = vpop.eup %4239  ;;  %v3640_v16 = vadd.f32 %v7363_v14, %v3605_v30  ;;  %v3382_v1 = vmul.f32 %v7375_v33, %v3381_v55  ;;  %v3869_v20 = vadd.f32 %v7198_v57, %v3833_v61  ;;  %v7897_v61 = vld [vmem:[#allocation23_spill] sm:$0xff] }
 0x490   : > { %v3388_v43 = vmul.f32 %v4240_v38, %v7379_v47  ;;  %3919 = vst.msk [vmem:[%s7207_s23 + $0xb0] sm:$0xff] %vm3896_vm14, %v3886_v37  ;;  %v3542_v63 = vmul.f32 %v4238_v26, %v3541_v29  ;;  %vm3394_vm0 = vweird.f32 %v4240_v38 }
 0x491   : > { %v3665_v31 = vpack.c.bf16 %v3640_v16, %v3639_v32  ;;  %3902 = vst.msk [vmem:[%s7207_s23 + $0x28] sm:$0xff] %vm3896_vm14, %v3869_v20  ;;  %v3386_v34 = vsel %vm7421_vm15, %v7375_v33, %v3382_v1  ;;  %vm3395_vm3 = vmor %vm3393_vm2, %vm3394_vm0  ;;  %v7898_v32 = vmax.f32 %v7897_v61, 0.0  ;;  %v7900_v1 = vmax.f32 %v7899_v48, 0.0 }
 0x492   : > { %v3389_v3 = vmul.f32 %v4240_v38, %v3388_v43  ;;  %v3546_v19 = vsel %vm3545_vm1, %v4238_v26, %v3542_v63  ;;  %v3571_v2 = vmul.f32 %v3386_v34, %v7133_v59  ;;  %v3658_v26 = vadd.f32 %v7363_v14, %v3623_v18  ;;  %v7903_v18 = vld [vmem:[#allocation26_spill] sm:$0xff] }
 0x493   : > { %3777 = vmatmul.bf16.gmra.mxu1 %v3665_v31  ;;  %v3805_v42 = vpop.f32.mrf.mxu3  ;;  %v3587_v12 = vmul.f32 %v3546_v19, %v7137_v8  ;;  %v7901_v31 = vld [vmem:[#allocation27_spill] sm:$0xff]  ;;  %v7904_v34 = vmax.f32 %v7903_v18, 0.0 }
 0x494   : > { %v3390_v45 = vmul.f32 0.5, %v3389_v3  ;;  %v3851_v58 = vadd.f32 %v3805_v42, %v7886_v49  ;;  %v3763_v41 = vpop.f32.mrf.mxu1  ;;  %v3606_v59 = vmul.f32 %v7334_v39, %v3571_v2  ;;  %v7902_v3 = vmax.f32 %v7901_v31, 0.0 }
 0x495   : > { %v3834_v44 = vadd.f32 %v3763_v41, %v7888_v54  ;;  %v3622_v36 = vmul.f32 %v7334_v39, %v3587_v12  ;;  %v7908_v54 = vmax.f32 %v7907_v35, 0.0 }
 0x496   : > { %v3391_v56 = vsub.f32 1.5, %v3390_v45  ;;  %v3887_v40 = vadd.f32 %v7198_v57, %v3851_v58  ;;  %v3641_v15 = vadd.f32 %v7363_v14, %v3606_v59  ;;  %v7905_v58 = vld [vmem:[#allocation25_spill] sm:$0xff] }
 0x497   : > { %v3870_v8 = vadd.f32 %v7198_v57, %v3834_v44  ;;  %v3657_v33 = vadd.f32 %v7363_v14, %v3622_v36  ;;  %v7906_v12 = vmax.f32 %v7905_v58, 0.0 }
 0x498   : > { %v3392_v4 = vmul.f32 %v4240_v38, %v3391_v56  ;;  %3920 = vst.msk [vmem:[%s7207_s23 + $0xb8] sm:$0xff] %vm3896_vm14, %v3887_v40 }
 0x499   : > { %3903 = vst.msk [vmem:[%s7207_s23 + $0x30] sm:$0xff] %vm3896_vm14, %v3870_v8  ;;  %v3674_v9 = vpack.c.bf16 %v3658_v26, %v3657_v33  ;;  %v7909_v8 = vld [vmem:[#allocation30_spill] sm:$0xff] }
 0x49a   : > { %v3396_v27 = vsel %vm3395_vm3, %v4240_v38, %v3392_v4  ;;  %v7910_v33 = vmax.f32 %v7909_v8, 0.0 }
 0x49b   : > { %v3808_v60 = vpop.f32.mrf.mxu3  ;;  %v3572_v47 = vmul.f32 %v3396_v27, %v7174_v21  ;;  %3822 = vmatmul.bf16.gmra.mxu3 %v3674_v9  ;;  %v7911_v27 = vld [vmem:[#allocation28_spill] sm:$0xff] }
 0x49c   : > { %v3852_v17 = vadd.f32 %v3808_v60, %v7890_v5  ;;  %v3765_v23 = vpop.f32.mrf.mxu1  ;;  %v7912_v9 = vmax.f32 %v7911_v27, 0.0  ;;  %v7913_v5 = vld [vmem:[#allocation29_spill] sm:$0xff] }
 0x49d   : > { %v3607_v6 = vmul.f32 %v7334_v39, %v3572_v47  ;;  %v3835_v10 = vadd.f32 %v3765_v23, %v7892_v53  ;;  %v7916_v53 = vmax.f32 %v7915_v25, 0.0 }
 0x49e   : > { %v3888_v11 = vadd.f32 %v7198_v57, %v3852_v17  ;;  %v7914_v17 = vmax.f32 %v7913_v5, 0.0 }
 0x49f   : > { %v3642_v21 = vadd.f32 %v7363_v14, %v3607_v6  ;;  %v3871_v13 = vadd.f32 %v7198_v57, %v3835_v10  ;;  %v7895_v14 = vld [vmem:[#allocation22_spill] sm:$0xff] }
 0x4a0   : > { %3921 = vst.msk [vmem:[%s7207_s23 + $0xc0] sm:$0xff] %vm3896_vm14, %v3888_v11  ;;  %v7896_v55 = vmax.f32 %v7895_v14, 0.0 }
 0x4a1   : > { %v3666_v51 = vpack.c.bf16 %v3642_v21, %v3641_v15  ;;  %3904 = vst.msk [vmem:[%s7207_s23 + $0x38] sm:$0xff] %vm3896_vm14, %v3871_v13  ;;  %v7917_v21 = vld [vmem:[#allocation34_spill] sm:$0xff] }
 0x4a2   : > { %v7918_v13 = vmax.f32 %v7917_v21, 0.0 }
 0x4a3   : > { %3782 = vmatmul.bf16.gmra.mxu1 %v3666_v51  ;;  %v3810_v39 = vpop.f32.mrf.mxu3 }
 0x4a4   : > { %v3853_v28 = vadd.f32 %v3810_v39, %v7894_v46 }
 0x4a6   : > { %v3889_v52 = vadd.f32 %v7198_v57, %v3853_v28  ;;  %v7919_v28 = vld [vmem:[#allocation32_spill] sm:$0xff] }
 0x4a8   : > { %3922 = vst.msk [vmem:[%s7207_s23 + $0xc8] sm:$0xff] %vm3896_vm14, %v3889_v52  ;;  %v7920_v52 = vmax.f32 %v7919_v28, 0.0 }
 0x4bd   : > { %v3768_v30 = vpop.f32.mrf.mxu1 }
 0x4be   : > { %v3836_v37 = vadd.f32 %v3768_v30, %v7896_v55  ;;  %v7921_v55 = vld [vmem:[#allocation35_spill] sm:$0xff] }
 0x4c0   : > { %v3872_v62 = vadd.f32 %v7198_v57, %v3836_v37  ;;  %v7922_v37 = vmax.f32 %v7921_v55, 0.0 }
 0x4c2   : > { %3905 = vst.msk [vmem:[%s7207_s23 + $0x40] sm:$0xff] %vm3896_vm14, %v3872_v62 }
 0x4c5   : > { %v3770_v7 = vpop.f32.mrf.mxu1 }
 0x4c6   : > { %v3837_v38 = vadd.f32 %v3770_v7, %v7898_v32 }
 0x4c8   : > { %v3873_v29 = vadd.f32 %v7198_v57, %v3837_v38 }
 0x4ca   : > { %3906 = vst.msk [vmem:[%s7207_s23 + $0x48] sm:$0xff] %vm3896_vm14, %v3873_v29 }
 0x4f5   : > { %v3813_v16 = vpop.f32.mrf.mxu3 }
 0x4f6   : > { %v3854_v43 = vadd.f32 %v3813_v16, %v7900_v1 }
 0x4f8   : > { %v3890_v20 = vadd.f32 %v7198_v57, %v3854_v43  ;;  %v3773_v63 = vpop.f32.mrf.mxu1 }
 0x4f9   : > { %v3838_v50 = vadd.f32 %v3773_v63, %v7902_v3 }
 0x4fa   : > { %3923 = vst.msk [vmem:[%s7207_s23 + $0xd0] sm:$0xff] %vm3896_vm14, %v3890_v20 }
 0x4fb   : > { %v3874_v42 = vadd.f32 %v7198_v57, %v3838_v50 }
 0x4fd   : > { %v3815_v19 = vpop.f32.mrf.mxu3  ;;  %3907 = vst.msk [vmem:[%s7207_s23 + $0x50] sm:$0xff] %vm3896_vm14, %v3874_v42 }
 0x4fe   : > { %v3855_v45 = vadd.f32 %v3815_v19, %v7904_v34 }
 0x500   : > { %v3891_v0 = vadd.f32 %v7198_v57, %v3855_v45  ;;  %v3775_v49 = vpop.f32.mrf.mxu1 }
 0x501   : > { %v3839_v41 = vadd.f32 %v3775_v49, %v7906_v12 }
 0x502   : > { %3924 = vst.msk [vmem:[%s7207_s23 + $0xd8] sm:$0xff] %vm3896_vm14, %v3891_v0 }
 0x503   : > { %v3875_v56 = vadd.f32 %v7198_v57, %v3839_v41 }
 0x505   : > { %3908 = vst.msk [vmem:[%s7207_s23 + $0x58] sm:$0xff] %vm3896_vm14, %v3875_v56 }
 0x506   : > { %v3818_v40 = vpop.f32.mrf.mxu3 }
 0x507   : > { %v3856_v44 = vadd.f32 %v3818_v40, %v7908_v54 }
 0x509   : > { %v3892_v36 = vadd.f32 %v7198_v57, %v3856_v44 }
 0x50b   : > { %3925 = vst.msk [vmem:[%s7207_s23 + $0xe0] sm:$0xff] %vm3896_vm14, %v3892_v36 }
 0x50e   : > { %v3820_v4 = vpop.f32.mrf.mxu3 }
 0x50f   : > { %v3857_v60 = vadd.f32 %v3820_v4, %v7912_v9 }
 0x510   : > { %v3778_v2 = vpop.f32.mrf.mxu1 }
 0x511   : > { %v3840_v26 = vadd.f32 %v3778_v2, %v7910_v33  ;;  %v3893_v59 = vadd.f32 %v7198_v57, %v3857_v60 }
 0x513   : > { %v3876_v47 = vadd.f32 %v7198_v57, %v3840_v26  ;;  %3926 = vst.msk [vmem:[%s7207_s23 + $0xe8] sm:$0xff] %vm3896_vm14, %v3893_v59 }
 0x515   : > { %3909 = vst.msk [vmem:[%s7207_s23 + $0x60] sm:$0xff] %vm3896_vm14, %v3876_v47 }
 0x518   : > { %v3780_v22 = vpop.f32.mrf.mxu1 }
 0x519   : > { %v3841_v23 = vadd.f32 %v3780_v22, %v7914_v17 }
 0x51b   : > { %v3877_v6 = vadd.f32 %v7198_v57, %v3841_v23 }
 0x51d   : > { %3910 = vst.msk [vmem:[%s7207_s23 + $0x68] sm:$0xff] %vm3896_vm14, %v3877_v6 }
 0x51e   : > { %v3823_v11 = vpop.f32.mrf.mxu3 }
 0x51f   : > { %v3858_v10 = vadd.f32 %v3823_v11, %v7916_v53 }
 0x520   : > { %v3783_v15 = vpop.f32.mrf.mxu1 }
 0x521   : > { %v3842_v51 = vadd.f32 %v3783_v15, %v7918_v13  ;;  %v3894_v39 = vadd.f32 %v7198_v57, %v3858_v10 }
 0x523   : > { %v3878_v24 = vadd.f32 %v7198_v57, %v3842_v51  ;;  %3927 = vst.msk [vmem:[%s7207_s23 + $0xf0] sm:$0xff] %vm3896_vm14, %v3894_v39 }
 0x525   : > { %3911 = vst.msk [vmem:[%s7207_s23 + $0x70] sm:$0xff] %vm3896_vm14, %v3878_v24 }
 0x526   : > { %v3825_v46 = vpop.f32.mrf.mxu3 }
 0x527   : > { %v3859_v30 = vadd.f32 %v3825_v46, %v7920_v52 }
 0x528   : > { %v3785_v14 = vpop.f32.mrf.mxu1 }
 0x529   : > { %v3843_v62 = vadd.f32 %v3785_v14, %v7922_v37  ;;  %v3895_v7 = vadd.f32 %v7198_v57, %v3859_v30 }
 0x52b   : > { %v3879_v61 = vadd.f32 %v7198_v57, %v3843_v62  ;;  %3928 = vst.msk [vmem:[%s7207_s23 + $0xf8] sm:$0xff] %vm3896_vm14, %v3895_v7 }
 0x52d   : > { %3912 = vst.msk [vmem:[%s7207_s23 + $0x78] sm:$0xff] %vm3896_vm14, %v3879_v61 }
 0x52e PF: > { %s27_s22 = sadd.s32 1, %s4254_s22  }
 0x52f   : > { %p24_p4 = scmp.ge.s32.totalorder %s27_s22, 4  }
 0x531   :  { %26 = sbr.rel (!%p24_p4) target bundleno = 3 (0x3), region = 110 }

</bundles_post_ra>
